<compile_context>
chip_gen: v7x
topology: tpu7x:2x2x1
jax: 0.10.0
libtpu: 0.0.40
codegen_flags: <defaults>
</compile_context>

<pallas_src>
import jax
import jax.numpy as jnp
import numpy as np
from jax.experimental import pallas as pl
from jax.experimental.pallas import tpu as pltpu

BN_EPS = 1e-5


# -----------------------------------------------------------------------------
# Small helpers: VMEM accounting / tile picking
# -----------------------------------------------------------------------------
def _round_up(n, m):
    return -(-n // m) * m


def _padded_bytes(shape, dtype):
    """VMEM footprint of one buffer including (sublane, 128) tile padding."""
    itemsize = jnp.dtype(dtype).itemsize
    sub = max(8, 32 // max(itemsize, 1))          # 8 for f32, 16 for bf16
    shape = tuple(int(s) for s in shape)
    if len(shape) == 0:
        return 4
    if len(shape) == 1:
        lead, rows, cols = 1, 1, shape[0]
    else:
        lead = int(np.prod(shape[:-2])) if len(shape) > 2 else 1
        rows, cols = shape[-2], shape[-1]
    return lead * _round_up(rows, sub) * _round_up(cols, 128) * itemsize


def _vmem_budget():
    """~75% of the per-core VMEM capacity (headroom for Mosaic internals)."""
    cap = 64 << 20
    try:
        info = pltpu.get_tpu_info()
        cap = int(getattr(info, "vmem_capacity_bytes", cap))
    except Exception:
        pass
    return int(cap) * 3 // 4


def _block_bytes(tb, tt, feat_p, atn_p, num_heads, num_class):
    """VMEM needed for the per-grid-step blocks, scratch and big temporaries."""
    b = 2 * _padded_bytes((tb, tt, feat_p), jnp.bfloat16)     # x block, 2 buffers
    b += 2 * _padded_bytes((tb, num_class), jnp.float32)      # out block, 2 buffers
    b += 2 * _padded_bytes((tb, num_heads, 1), jnp.float32)   # m_sc, l_sc (tile padded)
    b += _padded_bytes((tb, num_heads, feat_p), jnp.float32)  # acc_sc (tile padded)
    # per-step VMEM temporaries: layer-1 activation (f32 + bf16 copy) and the
    # sublane-padded (tb, H, tt) score / prob planes.
    b += tb * tt * (6 * atn_p + 2 * 8 * 4 + 8 * 2)
    return b


def _divisor_tiles(n, step):
    cands = {c for c in range(step, n + 1, step) if n % c == 0}
    cands.add(n)                                  # full extent is always legal
    return sorted(cands)


def _pick_tiles(bs, nbt, feat_p, atn_p, num_heads, num_class,
                weight_bytes, budget):
    tb_cands = _divisor_tiles(bs, 8)
    if bs >= 16:
        multi = [c for c in tb_cands if bs // c >= 2]   # keep >=2 parallel blocks (v7x)
        if multi:
            tb_cands = multi
    tt_cands = _divisor_tiles(nbt, 16)                  # bf16 packs (16,128) tiles
    best = None
    for ctb in tb_cands:
        for ctt in tt_cands:
            need = weight_bytes + _block_bytes(ctb, ctt, feat_p, atn_p,
                                               num_heads, num_class)
            if need > budget:
                continue
            key = (ctb * ctt, ctt, ctb)
            if best is None or key > best[0]:
                best = (key, ctb, ctt)
    if best is None:
        return tb_cands[0], tt_cands[0]
    return best[1], best[2]


# -----------------------------------------------------------------------------
# Kernel
# -----------------------------------------------------------------------------
def _build_kernel(tb, tt, feat_p, num_heads, width_fe, num_class, n_mid):
    """Kernel over grid (batch_blocks, tile_blocks); tile axis streamed with an
    online softmax; classifier runs once per batch block on the last tile."""

    def kernel(x_ref, w1t_ref, b1_ref, w2blk_ref, b2_ref, w0_ref, b0_ref, *rest):
        mid_refs = rest[: 2 * n_mid]
        woutT_ref = rest[2 * n_mid]
        bout_ref = rest[2 * n_mid + 1]
        out_ref = rest[2 * n_mid + 2]
        m_sc = rest[2 * n_mid + 3]        # (tb, H, 1) running max
        l_sc = rest[2 * n_mid + 4]        # (tb, H, 1) running sum of exp
        acc_sc = rest[2 * n_mid + 5]      # (tb, H, Fp) running un-normalized slide

        t = pl.program_id(1)

        @pl.when(t == 0)
        def _init():
            m_sc[...] = jnp.full(m_sc.shape, -jnp.inf, m_sc.dtype)
            l_sc[...] = jnp.zeros(l_sc.shape, l_sc.dtype)
            acc_sc[...] = jnp.zeros(acc_sc.shape, acc_sc.dtype)

        xb = x_ref[...]                                   # (tb, tt, Fp) bf16
        x2d = xb.reshape(tb * tt, feat_p)                 # leading-dim merge

        # ---- attention layer 1: tanh(x @ W1^T + b1) -----------------------
        a = jnp.tanh(
            jnp.dot(x2d, w1t_ref[...], preferred_element_type=jnp.float32)
            + b1_ref[...]
        )                                                 # (tb*tt, atn_p) f32

        # ---- attention layer 2 (per-head dot as block-diag matmul) --------
        s2 = (
            jnp.dot(a.astype(jnp.bfloat16), w2blk_ref[...],
                    preferred_element_type=jnp.float32)
            + b2_ref[...]
        )                                                 # (tb*tt, H) f32
        # TODO(synk): small per-step relayout; restructure to a (tb*H, tt)
        #             layout if a v7x bundle dump shows this on the crit path.
        sT = jnp.swapaxes(s2.reshape(tb, tt, num_heads), 1, 2)  # (tb, H, tt)

        # ---- online softmax over the bag (tile) axis -----------------------
        m_prev = m_sc[...]
        m_new = jnp.maximum(m_prev, jnp.max(sT, axis=-1, keepdims=True))
        alpha = jnp.exp(m_prev - m_new)                   # (tb, H, 1)
        p = jnp.exp(sT - m_new)                           # (tb, H, tt)
        l_sc[...] = alpha * l_sc[...] + jnp.sum(p, axis=-1, keepdims=True)
        # attention pooling on the MXU: (tb, H, tt) @ (tb, tt, Fp) -> (tb, H, Fp)
        acc_sc[...] = alpha * acc_sc[...] + jnp.einsum(
            "bht,btf->bhf", p.astype(jnp.bfloat16), xb,
            preferred_element_type=jnp.float32)
        m_sc[...] = m_new

        # ---- finalize: normalize + classifier on the last tile step --------
        @pl.when(t == pl.num_programs(1) - 1)
        def _finalize():
            inv_l = pl.reciprocal(l_sc[...], approx=True)     # EUP slot
            slide = acc_sc[...] * inv_l                       # (tb, H, Fp) f32

            # flatten heads along lanes (lane-aligned concat, Fp % 128 == 0)
            # -> one (tb, H*Fp) @ (H*Fp, width_fe) matmul for the first block.
            hflat = jnp.concatenate(
                [slide[:, hd, :] for hd in range(num_heads)], axis=-1)
            h = jnp.dot(hflat.astype(jnp.bfloat16), w0_ref[...],
                        preferred_element_type=jnp.float32) + b0_ref[...]
            h = jnp.maximum(h, 0.0)                           # Linear + ReLU

            # remaining blocks: previous block's eval-BN folded into these
            # linears on the host -> just Linear + ReLU here.
            for i in range(n_mid):
                w_ref = mid_refs[2 * i]
                b_ref = mid_refs[2 * i + 1]
                h = jnp.dot(h.astype(jnp.bfloat16), w_ref[...],
                            preferred_element_type=jnp.float32) + b_ref[...]
                h = jnp.maximum(h, 0.0)

            # final Linear (last block's BN folded in on the host)
            out = jnp.dot(h.astype(jnp.bfloat16), woutT_ref[...],
                          preferred_element_type=jnp.float32) + bout_ref[...]
            out_ref[...] = out.astype(out_ref.dtype)

    return kernel


# -----------------------------------------------------------------------------
# Wrapper
# -----------------------------------------------------------------------------
def _const_weight_spec(arr, single_buffer):
    """Whole-array block, constant across the grid; single-buffered if possible."""
    idx = lambda b, t, nd=arr.ndim: (0,) * nd
    buffered = getattr(pl, "Buffered", None)
    if single_buffer and buffered is not None:
        try:
            return pl.BlockSpec(arr.shape, idx, pipeline_mode=buffered(1))
        except TypeError:
            pass
    return pl.BlockSpec(arr.shape, idx)


def mil_forward_pallas(x, kp, *, tb=None, tt=None):
    bs, nbt, feat = x.shape
    feat_p, atn_p = kp["w1t"].shape
    num_heads = kp["b2"].shape[1]
    width_fe = kp["b0"].shape[1]
    num_class = kp["woutT"].shape[1]
    n_mid = len(kp["mids"])

    weights = [kp["w1t"], kp["b1"], kp["w2blk"], kp["b2"], kp["w0flat"], kp["b0"]]
    for (w, b) in kp["mids"]:
        weights += [w, b]
    weights += [kp["woutT"], kp["bout"]]

    weight_bytes = sum(_padded_bytes(a.shape, a.dtype) for a in weights)
    budget = _vmem_budget()

    if tb is None or tt is None:
        ptb, ptt = _pick_tiles(bs, nbt, feat_p, atn_p, num_heads, num_class,
                               weight_bytes, budget)
        tb = ptb if tb is None else tb
        tt = ptt if tt is None else tt
    assert bs % tb == 0 and (tb % 8 == 0 or tb == bs)
    assert nbt % tt == 0 and (tt % 16 == 0 or tt == nbt)

    needed = weight_bytes + _block_bytes(tb, tt, feat_p, atn_p, num_heads, num_class)
    vmem_limit = int(min(budget, max(32 << 20, int(needed * 1.25) + weight_bytes)))

    # bf16 halves DMA bytes (f32 accumulation in the matmuls); zero-pad the
    # feature dim to a lane-dense multiple of 128 (pads hit zero weight rows).
    xp = x.astype(jnp.bfloat16)
    if feat_p != feat:
        xp = jnp.pad(xp, ((0, 0), (0, 0), (0, feat_p - feat)))

    kernel = _build_kernel(tb, tt, feat_p, num_heads, width_fe, num_class, n_mid)

    def build(single_buffer_weights):
        # TODO(synk): sweep pipeline_mode=pl.Buffered(3) on the x spec on v7x
        #             once the 64 MiB budget forces small x blocks.
        in_specs = [pl.BlockSpec((tb, tt, feat_p), lambda b, t: (b, t, 0))]
        for arr in weights:
            in_specs.append(_const_weight_spec(arr, single_buffer_weights))
        return pl.pallas_call(
            kernel,
            out_shape=jax.ShapeDtypeStruct((bs, num_class), jnp.float32),
            grid_spec=pltpu.PrefetchScalarGridSpec(
                num_scalar_prefetch=0,
                grid=(bs // tb, nbt // tt),
                in_specs=in_specs,
                out_specs=pl.BlockSpec((tb, num_class), lambda b, t: (b, 0)),
                scratch_shapes=[
                    pltpu.VMEM((tb, num_heads, 1), jnp.float32),       # running max
                    pltpu.VMEM((tb, num_heads, 1), jnp.float32),       # running sum
                    pltpu.VMEM((tb, num_heads, feat_p), jnp.float32),  # running slide
                ],
            ),
            compiler_params=pltpu.CompilerParams(
                dimension_semantics=("parallel", "arbitrary"),
                vmem_limit_bytes=vmem_limit,
            ),
        )

    try:
        out = build(True)(xp, *weights)
        return jax.block_until_ready(out)
    except Exception:
        # fallback: default (double) buffering for the constant weight blocks
        return build(False)(xp, *weights)


# -----------------------------------------------------------------------------
# Parameters: raw (PyTorch-like, eval mode) and kernel-prepped (folded, padded)
# -----------------------------------------------------------------------------
def init_params(key, feature_depth, atn_dim, num_heads, width_fe, num_class,
                n_layers_classif):
    """Raw parameters mimicking a trained module in eval mode."""
    dim_heads = atn_dim // num_heads
    n_lbn = 1 + n_layers_classif
    keys = list(jax.random.split(key, 4 + 6 * n_lbn + 2))
    kit = iter(keys)

    def xavier_uniform(k, shape, fan_in, fan_out):
        bound = float(np.sqrt(6.0 / (fan_in + fan_out)))
        return jax.random.uniform(k, shape, jnp.float32, -bound, bound)

    def torch_linear(kw, kb, fan_in, fan_out):
        bound = float(1.0 / np.sqrt(fan_in))
        w = jax.random.uniform(kw, (fan_out, fan_in), jnp.float32, -bound, bound)
        b = jax.random.uniform(kb, (fan_out,), jnp.float32, -bound, bound)
        return w, b

    w1 = xavier_uniform(next(kit), (atn_dim, feature_depth), feature_depth, atn_dim)
    b1 = 0.05 * jax.random.normal(next(kit), (atn_dim,), jnp.float32)
    w2 = xavier_uniform(next(kit), (num_heads, dim_heads), dim_heads, 1)
    b2 = 0.05 * jax.random.normal(next(kit), (num_heads,), jnp.float32)

    lbn = []
    in_dim = feature_depth * num_heads
    for _ in range(n_lbn):
        w, b = torch_linear(next(kit), next(kit), in_dim, width_fe)
        gamma = 1.0 + 0.1 * jax.random.normal(next(kit), (width_fe,), jnp.float32)
        beta = 0.1 * jax.random.normal(next(kit), (width_fe,), jnp.float32)
        r_mean = 0.1 * jax.random.normal(next(kit), (width_fe,), jnp.float32)
        r_var = jax.random.uniform(next(kit), (width_fe,), jnp.float32, 0.5, 1.5)
        lbn.append((w, b, gamma, beta, r_mean, r_var))
        in_dim = width_fe

    wout, bout = torch_linear(next(kit), next(kit), width_fe, num_class)
    return dict(w1=w1, b1=b1, w2=w2, b2=b2, lbn=lbn, wout=wout, bout=bout)


def prepare_kernel_params(raw):
    """Pre-transpose, fold eval-BN into adjacent Linears, zero-pad atn/feat to
    lane-dense multiples of 128, cast matmul operands to bf16 (biases f32)."""
    num_heads, dim_heads = raw["w2"].shape
    atn_dim = num_heads * dim_heads
    feat = raw["w1"].shape[1]
    width_fe = raw["lbn"][0][0].shape[0]
    num_class = raw["wout"].shape[0]

    feat_p = _round_up(feat, 128)
    atn_p = _round_up(atn_dim, 128)

    # layer 1: (F, atn) -> padded (Fp, atn_p); padded columns give tanh(0)=0
    w1t = np.zeros((feat_p, atn_p), np.float32)
    w1t[:feat, :atn_dim] = np.asarray(raw["w1"]).T
    b1 = np.zeros((1, atn_p), np.float32)
    b1[0, :atn_dim] = np.asarray(raw["b1"])

    # block-diagonal per-head second attention layer: (atn_p, H); padded rows zero
    w2blk = np.zeros((atn_p, num_heads), np.float32)
    w2np = np.asarray(raw["w2"])
    for h in range(num_heads):
        w2blk[h * dim_heads:(h + 1) * dim_heads, h] = w2np[h]
    b2 = np.asarray(raw["b2"]).astype(np.float32).reshape(1, num_heads)

    # eval-mode BN as affine (scale, shift) per block
    scs, shs = [], []
    for (_, _, gamma, beta, r_mean, r_var) in raw["lbn"]:
        sc = np.asarray(gamma) / np.sqrt(np.asarray(r_var) + BN_EPS)
        scs.append(sc)
        shs.append(np.asarray(beta) - np.asarray(r_mean) * sc)

    # block 0 linear (nothing folds into it): (width, H*F) -> (H*Fp, width)
    w0 = np.asarray(raw["lbn"][0][0])
    b0 = np.asarray(raw["lbn"][0][1])
    w0_3d = w0.T.reshape(num_heads, feat, width_fe)
    w0_pad = np.zeros((num_heads, feat_p, width_fe), np.float32)
    w0_pad[:, :feat, :] = w0_3d
    w0flat = w0_pad.reshape(num_heads * feat_p, width_fe)

    # mid blocks: fold previous block's BN into this linear
    mids = []
    for i in range(1, len(raw["lbn"])):
        wi = np.asarray(raw["lbn"][i][0])
        bi = np.asarray(raw["lbn"][i][1])
        wit = wi.T                                        # (width_fe, width_fe)
        wit_f = scs[i - 1][:, None] * wit
        bi_f = bi + shs[i - 1] @ wit
        mids.append((jnp.asarray(wit_f).astype(jnp.bfloat16),
                     jnp.asarray(bi_f.astype(np.float32)).reshape(1, width_fe)))

    # final linear: fold the last block's BN
    woutT = np.asarray(raw["wout"]).T                     # (width_fe, num_class)
    woutT_f = scs[-1][:, None] * woutT
    bout_f = np.asarray(raw["bout"]) + shs[-1] @ woutT

    return dict(
        w1t=jnp.asarray(w1t).astype(jnp.bfloat16), b1=jnp.asarray(b1),
        w2blk=jnp.asarray(w2blk).astype(jnp.bfloat16), b2=jnp.asarray(b2),
        w0flat=jnp.asarray(w0flat).astype(jnp.bfloat16),
        b0=jnp.asarray(b0.astype(np.float32)).reshape(1, width_fe),
        mids=mids,
        woutT=jnp.asarray(woutT_f).astype(jnp.bfloat16),
        bout=jnp.asarray(bout_f.astype(np.float32)).reshape(1, num_class),
    )


# -----------------------------------------------------------------------------
# References
# -----------------------------------------------------------------------------
def mil_forward_ref(x, raw):
    """Pure-JAX f32 mirror of the PyTorch forward (eval mode)."""
    bs, nbt, feat = x.shape
    num_heads, dim_heads = raw["w2"].shape
    a = jnp.tanh(jnp.einsum("btf,af->bta", x, raw["w1"]) + raw["b1"])
    scores = jnp.einsum("bthd,hd->bth",
                        a.reshape(bs, nbt, num_heads, dim_heads), raw["w2"]) + raw["b2"]
    attn = jax.nn.softmax(scores, axis=1)                 # Softmax(dim=-2)
    slide = jnp.einsum("bth,btf->bhf", attn, x)           # matmul(attn^T, x)
    h = slide.reshape(bs, num_heads * feat)               # flatten(1, -1)
    for (w, b, gamma, beta, r_mean, r_var) in raw["lbn"]:
        h = jnp.maximum(h @ w.T + b, 0.0)                 # Linear+ReLU (Dropout=id)
        sc = gamma / jnp.sqrt(r_var + BN_EPS)
        h = h * sc + (beta - r_mean * sc)                 # BatchNorm1d (eval)
    return h @ raw["wout"].T + raw["bout"]


def mil_forward_mirror(x, kp):
    """Pure-JAX mirror of the kernel numerics (padded bf16 operands, f32 accum,
    folded BN), with a plain (non-streamed) softmax -- tighter check."""
    bs, nbt, feat = x.shape
    feat_p, atn_p = kp["w1t"].shape
    num_heads = kp["b2"].shape[1]
    xb = x.astype(jnp.bfloat16)
    if feat_p != feat:
        xb = jnp.pad(xb, ((0, 0), (0, 0), (0, feat_p - feat)))
    x2d = xb.reshape(bs * nbt, feat_p)
    a = jnp.tanh(jnp.dot(x2d, kp["w1t"], preferred_element_type=jnp.float32) + kp["b1"])
    s = jnp.dot(a.astype(jnp.bfloat16), kp["w2blk"],
                preferred_element_type=jnp.float32) + kp["b2"]
    sT = jnp.swapaxes(s.reshape(bs, nbt, num_heads), 1, 2)
    m = jnp.max(sT, axis=-1, keepdims=True)
    p = jnp.exp(sT - m)
    l = jnp.sum(p, axis=-1, keepdims=True)
    acc = jnp.einsum("bht,btf->bhf", p.astype(jnp.bfloat16), xb,
                     preferred_element_type=jnp.float32)
    slide = acc / l
    hflat = jnp.concatenate([slide[:, hd, :] for hd in range(num_heads)], axis=-1)
    h = jnp.dot(hflat.astype(jnp.bfloat16), kp["w0flat"],
                preferred_element_type=jnp.float32) + kp["b0"]
    h = jnp.maximum(h, 0.0)
    for (w, b) in kp["mids"]:
        h = jnp.maximum(jnp.dot(h.astype(jnp.bfloat16), w,
                                preferred_element_type=jnp.float32) + b, 0.0)
    return jnp.dot(h.astype(jnp.bfloat16), kp["woutT"],
                   preferred_element_type=jnp.float32) + kp["bout"]


# -----------------------------------------------------------------------------
if __name__ == "__main__":
    key = jax.random.PRNGKey(0)
    bs, nbt = 16, 32
    feature_depth, atn_dim, num_heads = 32, 16, 2
    width_fe, num_class, n_layers_classif = 32, 3, 1

    k_x, k_p = jax.random.split(key)
    x = jax.random.normal(k_x, (bs, nbt, feature_depth), dtype=jnp.float32)
    raw = init_params(k_p, feature_depth, atn_dim, num_heads, width_fe,
                      num_class, n_layers_classif)
    kp = prepare_kernel_params(raw)

    # Explicit tb=8, tt=16 -> grid (2, 2): exercises batch blocking AND the
    # streamed online-softmax path.
    out = mil_forward_pallas(x, kp, tb=8, tt=16)
    out = jax.block_until_ready(out)

    # Also exercise the VMEM-budget-driven tile picker.
    out_auto = mil_forward_pallas(x, kp)
    out_auto = jax.block_until_ready(out_auto)

    mirror = mil_forward_mirror(x, kp)        # same numerics as the kernel
    ref32 = mil_forward_ref(x, raw)           # exact module semantics (f32)

    np.testing.assert_allclose(np.asarray(out), np.asarray(mirror),
                               rtol=1e-2, atol=1e-2)
    np.testing.assert_allclose(np.asarray(out_auto), np.asarray(mirror),
                               rtol=1e-2, atol=1e-2)
    np.testing.assert_allclose(np.asarray(out), np.asarray(ref32),
                               rtol=3e-2, atol=3e-2)
    print("KERNEL_OK")
</pallas_src>

<mosaic_0001>
module attributes {stable_mosaic.version = 11 : i64} {
  func.func @kernel(%arg0: i32, %arg1: i32, %arg2: memref<8x16x128xbf16, #tpu.memory_space<vmem>>, %arg3: memref<128x128xbf16, #tpu.memory_space<vmem>>, %arg4: memref<1x128xf32, #tpu.memory_space<vmem>>, %arg5: memref<128x2xbf16, #tpu.memory_space<vmem>>, %arg6: memref<1x2xf32, #tpu.memory_space<vmem>>, %arg7: memref<256x32xbf16, #tpu.memory_space<vmem>>, %arg8: memref<1x32xf32, #tpu.memory_space<vmem>>, %arg9: memref<32x32xbf16, #tpu.memory_space<vmem>>, %arg10: memref<1x32xf32, #tpu.memory_space<vmem>>, %arg11: memref<32x3xbf16, #tpu.memory_space<vmem>>, %arg12: memref<1x3xf32, #tpu.memory_space<vmem>>, %arg13: memref<8x3xf32, #tpu.memory_space<vmem>>, %arg14: memref<8x2x1xf32, #tpu.memory_space<vmem>>, %arg15: memref<8x2x1xf32, #tpu.memory_space<vmem>>, %arg16: memref<8x2x128xf32, #tpu.memory_space<vmem>>) attributes {dimension_semantics = [#tpu.dimension_semantics<parallel>, #tpu.dimension_semantics<arbitrary>], iteration_bounds = array<i64: 2, 2>, scalar_prefetch = 0 : i64, scratch_operands = 3 : i64, tpu.core_type = #tpu.core_type<tc>, window_params = [{transform_indices = @transform_0, window_bounds = array<i64: 8, 16, 128>}, {pipeline_mode = #tpu.pipeline_mode<synchronous>, transform_indices = @transform_1, window_bounds = array<i64: 128, 128>}, {pipeline_mode = #tpu.pipeline_mode<synchronous>, transform_indices = @transform_2, window_bounds = array<i64: 1, 128>}, {pipeline_mode = #tpu.pipeline_mode<synchronous>, transform_indices = @transform_3, window_bounds = array<i64: 128, 2>}, {pipeline_mode = #tpu.pipeline_mode<synchronous>, transform_indices = @transform_4, window_bounds = array<i64: 1, 2>}, {pipeline_mode = #tpu.pipeline_mode<synchronous>, transform_indices = @transform_5, window_bounds = array<i64: 256, 32>}, {pipeline_mode = #tpu.pipeline_mode<synchronous>, transform_indices = @transform_6, window_bounds = array<i64: 1, 32>}, {pipeline_mode = #tpu.pipeline_mode<synchronous>, transform_indices = @transform_7, window_bounds = array<i64: 32, 32>}, {pipeline_mode = #tpu.pipeline_mode<synchronous>, transform_indices = @transform_8, window_bounds = array<i64: 1, 32>}, {pipeline_mode = #tpu.pipeline_mode<synchronous>, transform_indices = @transform_9, window_bounds = array<i64: 32, 3>}, {pipeline_mode = #tpu.pipeline_mode<synchronous>, transform_indices = @transform_10, window_bounds = array<i64: 1, 3>}, {transform_indices = @transform_11, window_bounds = array<i64: 8, 3>}]} {
    %c0_i32 = arith.constant 0 : i32
    %0 = arith.cmpi eq, %arg1, %c0_i32 : i32
    %1 = arith.extui %0 : i1 to i32
    %c0_i32_0 = arith.constant 0 : i32
    %2 = arith.cmpi ne, %1, %c0_i32_0 : i32
    scf.if %2 {
      %cst_34 = arith.constant 0xFF800000 : f32
      %45 = vector.broadcast %cst_34 : f32 to vector<8x2x1xf32>
      %c0_35 = arith.constant 0 : index
      %c0_36 = arith.constant 0 : index
      %c0_37 = arith.constant 0 : index
      %46 = vector.load %arg14[%c0_35, %c0_36, %c0_37] : memref<8x2x1xf32, #tpu.memory_space<vmem>>, vector<8x2x1xf32>
      tpu.vector_store %arg14[%c0_35, %c0_36, %c0_37], %45 {strides = array<i32>} : memref<8x2x1xf32, #tpu.memory_space<vmem>>, vector<8x2x1xf32>,
      %cst_38 = arith.constant 0.000000e+00 : f32
      %47 = vector.broadcast %cst_38 : f32 to vector<8x2x1xf32>
      %c0_39 = arith.constant 0 : index
      %c0_40 = arith.constant 0 : index
      %c0_41 = arith.constant 0 : index
      %48 = vector.load %arg15[%c0_39, %c0_40, %c0_41] : memref<8x2x1xf32, #tpu.memory_space<vmem>>, vector<8x2x1xf32>
      tpu.vector_store %arg15[%c0_39, %c0_40, %c0_41], %47 {strides = array<i32>} : memref<8x2x1xf32, #tpu.memory_space<vmem>>, vector<8x2x1xf32>,
      %cst_42 = arith.constant 0.000000e+00 : f32
      %49 = vector.broadcast %cst_42 : f32 to vector<8x2x128xf32>
      %c0_43 = arith.constant 0 : index
      %c0_44 = arith.constant 0 : index
      %c0_45 = arith.constant 0 : index
      %50 = vector.load %arg16[%c0_43, %c0_44, %c0_45] : memref<8x2x128xf32, #tpu.memory_space<vmem>>, vector<8x2x128xf32>
      tpu.vector_store %arg16[%c0_43, %c0_44, %c0_45], %49 {strides = array<i32>} : memref<8x2x128xf32, #tpu.memory_space<vmem>>, vector<8x2x128xf32>,
    } else {
    }
    %c0 = arith.constant 0 : index
    %c0_1 = arith.constant 0 : index
    %c0_2 = arith.constant 0 : index
    %3 = vector.load %arg2[%c0, %c0_1, %c0_2] : memref<8x16x128xbf16, #tpu.memory_space<vmem>>, vector<8x16x128xbf16>
    %4 = vector.shape_cast %3 : vector<8x16x128xbf16> to vector<128x128xbf16>
    %c0_3 = arith.constant 0 : index
    %c0_4 = arith.constant 0 : index
    %5 = vector.load %arg3[%c0_3, %c0_4] : memref<128x128xbf16, #tpu.memory_space<vmem>>, vector<128x128xbf16>
    %cst = arith.constant dense<0.000000e+00> : vector<128x128xf32>
    %6 = tpu.matmul %4, %5, %cst {dimension_numbers = #tpu.dot_dimension_numbers<[1], [0], [0], [1], [0, 0, 1, 1], [], []>} : vector<128x128xbf16>, vector<128x128xbf16>, vector<128x128xf32> -> vector<128x128xf32>
    %c0_5 = arith.constant 0 : index
    %c0_6 = arith.constant 0 : index
    %7 = vector.load %arg4[%c0_5, %c0_6] : memref<1x128xf32, #tpu.memory_space<vmem>>, vector<1x128xf32>
    %8 = vector.broadcast %7 : vector<1x128xf32> to vector<128x128xf32>
    %9 = arith.addf %6, %8 : vector<128x128xf32>
    %10 = math.tanh %9 : vector<128x128xf32>
    %11 = arith.truncf %10 : vector<128x128xf32> to vector<128x128xbf16>
    %c0_7 = arith.constant 0 : index
    %c0_8 = arith.constant 0 : index
    %12 = vector.load %arg5[%c0_7, %c0_8] : memref<128x2xbf16, #tpu.memory_space<vmem>>, vector<128x2xbf16>
    %cst_9 = arith.constant dense<0.000000e+00> : vector<128x2xf32>
    %13 = tpu.matmul %11, %12, %cst_9 {dimension_numbers = #tpu.dot_dimension_numbers<[1], [0], [0], [1], [0, 0, 1, 1], [], []>} : vector<128x128xbf16>, vector<128x2xbf16>, vector<128x2xf32> -> vector<128x2xf32>
    %c0_10 = arith.constant 0 : index
    %c0_11 = arith.constant 0 : index
    %14 = vector.load %arg6[%c0_10, %c0_11] : memref<1x2xf32, #tpu.memory_space<vmem>>, vector<1x2xf32>
    %15 = vector.broadcast %14 : vector<1x2xf32> to vector<128x2xf32>
    %16 = arith.addf %13, %15 : vector<128x2xf32>
    %17 = vector.shape_cast %16 : vector<128x2xf32> to vector<8x16x2xf32>
    %18 = tpu.transpose %17, [0, 2, 1] : vector<8x16x2xf32> -> vector<8x2x16xf32>
    %c0_12 = arith.constant 0 : index
    %c0_13 = arith.constant 0 : index
    %c0_14 = arith.constant 0 : index
    %19 = vector.load %arg14[%c0_12, %c0_13, %c0_14] : memref<8x2x1xf32, #tpu.memory_space<vmem>>, vector<8x2x1xf32>
    %cst_15 = arith.constant dense<0xFF800000> : vector<8x2xf32>
    %20 = vector.multi_reduction <maximumf>, %18, %cst_15 [2] : vector<8x2x16xf32> to vector<8x2xf32>
    %21 = vector.shape_cast %20 : vector<8x2xf32> to vector<8x2x1xf32>
    %22 = arith.maximumf %19, %21 : vector<8x2x1xf32>
    %23 = arith.subf %19, %22 : vector<8x2x1xf32>
    %24 = math.exp %23 : vector<8x2x1xf32>
    %25 = vector.broadcast %22 : vector<8x2x1xf32> to vector<8x2x16xf32>
    %26 = arith.subf %18, %25 : vector<8x2x16xf32>
    %27 = math.exp %26 : vector<8x2x16xf32>
    %c0_16 = arith.constant 0 : index
    %c0_17 = arith.constant 0 : index
    %c0_18 = arith.constant 0 : index
    %28 = vector.load %arg15[%c0_16, %c0_17, %c0_18] : memref<8x2x1xf32, #tpu.memory_space<vmem>>, vector<8x2x1xf32>
    %29 = arith.mulf %24, %28 : vector<8x2x1xf32>
    %cst_19 = arith.constant dense<0.000000e+00> : vector<8x2xf32>
    %30 = vector.multi_reduction <add>, %27, %cst_19 [2] : vector<8x2x16xf32> to vector<8x2xf32>
    %31 = vector.shape_cast %30 : vector<8x2xf32> to vector<8x2x1xf32>
    %32 = arith.addf %29, %31 : vector<8x2x1xf32>
    %c0_20 = arith.constant 0 : index
    %c0_21 = arith.constant 0 : index
    %c0_22 = arith.constant 0 : index
    %33 = vector.load %arg15[%c0_20, %c0_21, %c0_22] : memref<8x2x1xf32, #tpu.memory_space<vmem>>, vector<8x2x1xf32>
    tpu.vector_store %arg15[%c0_20, %c0_21, %c0_22], %32 {strides = array<i32>} : memref<8x2x1xf32, #tpu.memory_space<vmem>>, vector<8x2x1xf32>,
    %c0_23 = arith.constant 0 : index
    %c0_24 = arith.constant 0 : index
    %c0_25 = arith.constant 0 : index
    %34 = vector.load %arg16[%c0_23, %c0_24, %c0_25] : memref<8x2x128xf32, #tpu.memory_space<vmem>>, vector<8x2x128xf32>
    %35 = vector.broadcast %24 : vector<8x2x1xf32> to vector<8x2x128xf32>
    %36 = arith.mulf %35, %34 : vector<8x2x128xf32>
    %37 = arith.truncf %27 : vector<8x2x16xf32> to vector<8x2x16xbf16>
    "tpu.trace_start"() <{level = 10 : i32, message = "bht,btf->bhf"}> : () -> ()
    %cst_26 = arith.constant dense<0.000000e+00> : vector<8x2x128xf32>
    %38 = tpu.matmul %37, %3, %cst_26 {dimension_numbers = #tpu.dot_dimension_numbers<[2], [1], [1], [2], [0, 0, 0, 1, 1, 2], [0], [0]>} : vector<8x2x16xbf16>, vector<8x16x128xbf16>, vector<8x2x128xf32> -> vector<8x2x128xf32>
    "tpu.trace_stop"() : () -> ()
    %39 = arith.addf %36, %38 : vector<8x2x128xf32>
    %c0_27 = arith.constant 0 : index
    %c0_28 = arith.constant 0 : index
    %c0_29 = arith.constant 0 : index
    %40 = vector.load %arg16[%c0_27, %c0_28, %c0_29] : memref<8x2x128xf32, #tpu.memory_space<vmem>>, vector<8x2x128xf32>
    tpu.vector_store %arg16[%c0_27, %c0_28, %c0_29], %39 {strides = array<i32>} : memref<8x2x128xf32, #tpu.memory_space<vmem>>, vector<8x2x128xf32>,
    %c0_30 = arith.constant 0 : index
    %c0_31 = arith.constant 0 : index
    %c0_32 = arith.constant 0 : index
    %41 = vector.load %arg14[%c0_30, %c0_31, %c0_32] : memref<8x2x1xf32, #tpu.memory_space<vmem>>, vector<8x2x1xf32>
    tpu.vector_store %arg14[%c0_30, %c0_31, %c0_32], %22 {strides = array<i32>} : memref<8x2x1xf32, #tpu.memory_space<vmem>>, vector<8x2x1xf32>,
    %c1_i32 = arith.constant 1 : i32
    %42 = arith.cmpi eq, %arg1, %c1_i32 : i32
    %43 = arith.extui %42 : i1 to i32
    %c0_i32_33 = arith.constant 0 : i32
    %44 = arith.cmpi ne, %43, %c0_i32_33 : i32
    scf.if %44 {
      %c0_34 = arith.constant 0 : index
      %c0_35 = arith.constant 0 : index
      %c0_36 = arith.constant 0 : index
      %45 = vector.load %arg15[%c0_34, %c0_35, %c0_36] : memref<8x2x1xf32, #tpu.memory_space<vmem>>, vector<8x2x1xf32>
      %46 = tpu.reciprocal %45 {approx = true} : vector<8x2x1xf32> -> vector<8x2x1xf32>
      %c0_37 = arith.constant 0 : index
      %c0_38 = arith.constant 0 : index
      %c0_39 = arith.constant 0 : index
      %47 = vector.load %arg16[%c0_37, %c0_38, %c0_39] : memref<8x2x128xf32, #tpu.memory_space<vmem>>, vector<8x2x128xf32>
      %48 = vector.broadcast %46 : vector<8x2x1xf32> to vector<8x2x128xf32>
      %49 = arith.mulf %47, %48 : vector<8x2x128xf32>
      %50 = vector.extract_strided_slice %49 {offsets = [0, 0, 0], sizes = [8, 1, 128], strides = [1, 1, 1]} : vector<8x2x128xf32> to vector<8x1x128xf32>
      %51 = vector.shape_cast %50 : vector<8x1x128xf32> to vector<8x128xf32>
      %52 = vector.extract_strided_slice %49 {offsets = [0, 1, 0], sizes = [8, 1, 128], strides = [1, 1, 1]} : vector<8x2x128xf32> to vector<8x1x128xf32>
      %53 = vector.shape_cast %52 : vector<8x1x128xf32> to vector<8x128xf32>
      %54 = tpu.concatenate %51, %53 in 1 : vector<8x128xf32>, vector<8x128xf32> -> vector<8x256xf32>
      %55 = arith.truncf %54 : vector<8x256xf32> to vector<8x256xbf16>
      %c0_40 = arith.constant 0 : index
      %c0_41 = arith.constant 0 : index
      %56 = vector.load %arg7[%c0_40, %c0_41] : memref<256x32xbf16, #tpu.memory_space<vmem>>, vector<256x32xbf16>
      %cst_42 = arith.constant dense<0.000000e+00> : vector<8x32xf32>
      %57 = tpu.matmul %55, %56, %cst_42 {dimension_numbers = #tpu.dot_dimension_numbers<[1], [0], [0], [1], [0, 0, 1, 1], [], []>} : vector<8x256xbf16>, vector<256x32xbf16>, vector<8x32xf32> -> vector<8x32xf32>
      %c0_43 = arith.constant 0 : index
      %c0_44 = arith.constant 0 : index
      %58 = vector.load %arg8[%c0_43, %c0_44] : memref<1x32xf32, #tpu.memory_space<vmem>>, vector<1x32xf32>
      %59 = vector.broadcast %58 : vector<1x32xf32> to vector<8x32xf32>
      %60 = arith.addf %57, %59 : vector<8x32xf32>
      %cst_45 = arith.constant 0.000000e+00 : f32
      %61 = vector.broadcast %cst_45 : f32 to vector<8x32xf32>
      %62 = arith.maximumf %60, %61 : vector<8x32xf32>
      %63 = arith.truncf %62 : vector<8x32xf32> to vector<8x32xbf16>
      %c0_46 = arith.constant 0 : index
      %c0_47 = arith.constant 0 : index
      %64 = vector.load %arg9[%c0_46, %c0_47] : memref<32x32xbf16, #tpu.memory_space<vmem>>, vector<32x32xbf16>
      %cst_48 = arith.constant dense<0.000000e+00> : vector<8x32xf32>
      %65 = tpu.matmul %63, %64, %cst_48 {dimension_numbers = #tpu.dot_dimension_numbers<[1], [0], [0], [1], [0, 0, 1, 1], [], []>} : vector<8x32xbf16>, vector<32x32xbf16>, vector<8x32xf32> -> vector<8x32xf32>
      %c0_49 = arith.constant 0 : index
      %c0_50 = arith.constant 0 : index
      %66 = vector.load %arg10[%c0_49, %c0_50] : memref<1x32xf32, #tpu.memory_space<vmem>>, vector<1x32xf32>
      %67 = vector.broadcast %66 : vector<1x32xf32> to vector<8x32xf32>
      %68 = arith.addf %65, %67 : vector<8x32xf32>
      %cst_51 = arith.constant 0.000000e+00 : f32
      %69 = vector.broadcast %cst_51 : f32 to vector<8x32xf32>
      %70 = arith.maximumf %68, %69 : vector<8x32xf32>
      %71 = arith.truncf %70 : vector<8x32xf32> to vector<8x32xbf16>
      %c0_52 = arith.constant 0 : index
      %c0_53 = arith.constant 0 : index
      %72 = vector.load %arg11[%c0_52, %c0_53] : memref<32x3xbf16, #tpu.memory_space<vmem>>, vector<32x3xbf16>
      %cst_54 = arith.constant dense<0.000000e+00> : vector<8x3xf32>
      %73 = tpu.matmul %71, %72, %cst_54 {dimension_numbers = #tpu.dot_dimension_numbers<[1], [0], [0], [1], [0, 0, 1, 1], [], []>} : vector<8x32xbf16>, vector<32x3xbf16>, vector<8x3xf32> -> vector<8x3xf32>
      %c0_55 = arith.constant 0 : index
      %c0_56 = arith.constant 0 : index
      %74 = vector.load %arg12[%c0_55, %c0_56] : memref<1x3xf32, #tpu.memory_space<vmem>>, vector<1x3xf32>
      %75 = vector.broadcast %74 : vector<1x3xf32> to vector<8x3xf32>
      %76 = arith.addf %73, %75 : vector<8x3xf32>
      %c0_57 = arith.constant 0 : index
      %c0_58 = arith.constant 0 : index
      %77 = vector.load %arg13[%c0_57, %c0_58] : memref<8x3xf32, #tpu.memory_space<vmem>>, vector<8x3xf32>
      tpu.vector_store %arg13[%c0_57, %c0_58], %76 {strides = array<i32>} : memref<8x3xf32, #tpu.memory_space<vmem>>, vector<8x3xf32>,
    } else {
    }
    return
  }
  func.func @transform_0(%arg0: i32, %arg1: i32) -> (i32, i32, i32) {
    %c0_i32 = arith.constant 0 : i32
    %c0_i32_0 = arith.constant 0 : i32
    return %arg0, %arg1, %c0_i32 : i32, i32, i32
  }
  func.func @transform_1(%arg0: i32, %arg1: i32) -> (i32, i32) {
    %c0_i32 = arith.constant 0 : i32
    %c0_i32_0 = arith.constant 0 : i32
    %c0_i32_1 = arith.constant 0 : i32
    return %c0_i32, %c0_i32_0 : i32, i32
  }
  func.func @transform_2(%arg0: i32, %arg1: i32) -> (i32, i32) {
    %c0_i32 = arith.constant 0 : i32
    %c0_i32_0 = arith.constant 0 : i32
    %c0_i32_1 = arith.constant 0 : i32
    return %c0_i32, %c0_i32_0 : i32, i32
  }
  func.func @transform_3(%arg0: i32, %arg1: i32) -> (i32, i32) {
    %c0_i32 = arith.constant 0 : i32
    %c0_i32_0 = arith.constant 0 : i32
    %c0_i32_1 = arith.constant 0 : i32
    return %c0_i32, %c0_i32_0 : i32, i32
  }
  func.func @transform_4(%arg0: i32, %arg1: i32) -> (i32, i32) {
    %c0_i32 = arith.constant 0 : i32
    %c0_i32_0 = arith.constant 0 : i32
    %c0_i32_1 = arith.constant 0 : i32
    return %c0_i32, %c0_i32_0 : i32, i32
  }
  func.func @transform_5(%arg0: i32, %arg1: i32) -> (i32, i32) {
    %c0_i32 = arith.constant 0 : i32
    %c0_i32_0 = arith.constant 0 : i32
    %c0_i32_1 = arith.constant 0 : i32
    return %c0_i32, %c0_i32_0 : i32, i32
  }
  func.func @transform_6(%arg0: i32, %arg1: i32) -> (i32, i32) {
    %c0_i32 = arith.constant 0 : i32
    %c0_i32_0 = arith.constant 0 : i32
    %c0_i32_1 = arith.constant 0 : i32
    return %c0_i32, %c0_i32_0 : i32, i32
  }
  func.func @transform_7(%arg0: i32, %arg1: i32) -> (i32, i32) {
    %c0_i32 = arith.constant 0 : i32
    %c0_i32_0 = arith.constant 0 : i32
    %c0_i32_1 = arith.constant 0 : i32
    return %c0_i32, %c0_i32_0 : i32, i32
  }
  func.func @transform_8(%arg0: i32, %arg1: i32) -> (i32, i32) {
    %c0_i32 = arith.constant 0 : i32
    %c0_i32_0 = arith.constant 0 : i32
    %c0_i32_1 = arith.constant 0 : i32
    return %c0_i32, %c0_i32_0 : i32, i32
  }
  func.func @transform_9(%arg0: i32, %arg1: i32) -> (i32, i32) {
    %c0_i32 = arith.constant 0 : i32
    %c0_i32_0 = arith.constant 0 : i32
    %c0_i32_1 = arith.constant 0 : i32
    return %c0_i32, %c0_i32_0 : i32, i32
  }
  func.func @transform_10(%arg0: i32, %arg1: i32) -> (i32, i32) {
    %c0_i32 = arith.constant 0 : i32
    %c0_i32_0 = arith.constant 0 : i32
    %c0_i32_1 = arith.constant 0 : i32
    return %c0_i32, %c0_i32_0 : i32, i32
  }
  func.func @transform_11(%arg0: i32, %arg1: i32) -> (i32, i32) {
    %c0_i32 = arith.constant 0 : i32
    %c0_i32_0 = arith.constant 0 : i32
    return %arg0, %c0_i32 : i32, i32
  }
}

module attributes {stable_mosaic.version = 11 : i64} {
  func.func @kernel(%arg0: i32, %arg1: i32, %arg2: memref<8x16x128xbf16, #tpu.memory_space<vmem>>, %arg3: memref<128x128xbf16, #tpu.memory_space<vmem>>, %arg4: memref<1x128xf32, #tpu.memory_space<vmem>>, %arg5: memref<128x2xbf16, #tpu.memory_space<vmem>>, %arg6: memref<1x2xf32, #tpu.memory_space<vmem>>, %arg7: memref<256x32xbf16, #tpu.memory_space<vmem>>, %arg8: memref<1x32xf32, #tpu.memory_space<vmem>>, %arg9: memref<32x32xbf16, #tpu.memory_space<vmem>>, %arg10: memref<1x32xf32, #tpu.memory_space<vmem>>, %arg11: memref<32x3xbf16, #tpu.memory_space<vmem>>, %arg12: memref<1x3xf32, #tpu.memory_space<vmem>>, %arg13: memref<8x3xf32, #tpu.memory_space<vmem>>, %arg14: memref<8x2x1xf32, #tpu.memory_space<vmem>>, %arg15: memref<8x2x1xf32, #tpu.memory_space<vmem>>, %arg16: memref<8x2x128xf32, #tpu.memory_space<vmem>>) attributes {dimension_semantics = [#tpu.dimension_semantics<parallel>, #tpu.dimension_semantics<arbitrary>], iteration_bounds = array<i64: 2, 2>, scalar_prefetch = 0 : i64, scratch_operands = 3 : i64, tpu.core_type = #tpu.core_type<tc>, window_params = [{transform_indices = @transform_0, window_bounds = array<i64: 8, 16, 128>}, {pipeline_mode = #tpu.pipeline_mode<synchronous>, transform_indices = @transform_1, window_bounds = array<i64: 128, 128>}, {pipeline_mode = #tpu.pipeline_mode<synchronous>, transform_indices = @transform_2, window_bounds = array<i64: 1, 128>}, {pipeline_mode = #tpu.pipeline_mode<synchronous>, transform_indices = @transform_3, window_bounds = array<i64: 128, 2>}, {pipeline_mode = #tpu.pipeline_mode<synchronous>, transform_indices = @transform_4, window_bounds = array<i64: 1, 2>}, {pipeline_mode = #tpu.pipeline_mode<synchronous>, transform_indices = @transform_5, window_bounds = array<i64: 256, 32>}, {pipeline_mode = #tpu.pipeline_mode<synchronous>, transform_indices = @transform_6, window_bounds = array<i64: 1, 32>}, {pipeline_mode = #tpu.pipeline_mode<synchronous>, transform_indices = @transform_7, window_bounds = array<i64: 32, 32>}, {pipeline_mode = #tpu.pipeline_mode<synchronous>, transform_indices = @transform_8, window_bounds = array<i64: 1, 32>}, {pipeline_mode = #tpu.pipeline_mode<synchronous>, transform_indices = @transform_9, window_bounds = array<i64: 32, 3>}, {pipeline_mode = #tpu.pipeline_mode<synchronous>, transform_indices = @transform_10, window_bounds = array<i64: 1, 3>}, {transform_indices = @transform_11, window_bounds = array<i64: 8, 3>}]} {
    %c0_i32 = arith.constant 0 : i32
    %0 = arith.cmpi eq, %arg1, %c0_i32 : i32
    %1 = arith.extui %0 : i1 to i32
    %c0_i32_0 = arith.constant 0 : i32
    %2 = arith.cmpi ne, %1, %c0_i32_0 : i32
    scf.if %2 {
      %cst_34 = arith.constant 0xFF800000 : f32
      %45 = vector.broadcast %cst_34 : f32 to vector<8x2x1xf32>
      %c0_35 = arith.constant 0 : index
      %c0_36 = arith.constant 0 : index
      %c0_37 = arith.constant 0 : index
      %46 = vector.load %arg14[%c0_35, %c0_36, %c0_37] : memref<8x2x1xf32, #tpu.memory_space<vmem>>, vector<8x2x1xf32>
      tpu.vector_store %arg14[%c0_35, %c0_36, %c0_37], %45 {strides = array<i32>} : memref<8x2x1xf32, #tpu.memory_space<vmem>>, vector<8x2x1xf32>,
      %cst_38 = arith.constant 0.000000e+00 : f32
      %47 = vector.broadcast %cst_38 : f32 to vector<8x2x1xf32>
      %c0_39 = arith.constant 0 : index
      %c0_40 = arith.constant 0 : index
      %c0_41 = arith.constant 0 : index
      %48 = vector.load %arg15[%c0_39, %c0_40, %c0_41] : memref<8x2x1xf32, #tpu.memory_space<vmem>>, vector<8x2x1xf32>
      tpu.vector_store %arg15[%c0_39, %c0_40, %c0_41], %47 {strides = array<i32>} : memref<8x2x1xf32, #tpu.memory_space<vmem>>, vector<8x2x1xf32>,
      %cst_42 = arith.constant 0.000000e+00 : f32
      %49 = vector.broadcast %cst_42 : f32 to vector<8x2x128xf32>
      %c0_43 = arith.constant 0 : index
      %c0_44 = arith.constant 0 : index
      %c0_45 = arith.constant 0 : index
      %50 = vector.load %arg16[%c0_43, %c0_44, %c0_45] : memref<8x2x128xf32, #tpu.memory_space<vmem>>, vector<8x2x128xf32>
      tpu.vector_store %arg16[%c0_43, %c0_44, %c0_45], %49 {strides = array<i32>} : memref<8x2x128xf32, #tpu.memory_space<vmem>>, vector<8x2x128xf32>,
    } else {
    }
    %c0 = arith.constant 0 : index
    %c0_1 = arith.constant 0 : index
    %c0_2 = arith.constant 0 : index
    %3 = vector.load %arg2[%c0, %c0_1, %c0_2] : memref<8x16x128xbf16, #tpu.memory_space<vmem>>, vector<8x16x128xbf16>
    %4 = vector.shape_cast %3 : vector<8x16x128xbf16> to vector<128x128xbf16>
    %c0_3 = arith.constant 0 : index
    %c0_4 = arith.constant 0 : index
    %5 = vector.load %arg3[%c0_3, %c0_4] : memref<128x128xbf16, #tpu.memory_space<vmem>>, vector<128x128xbf16>
    %cst = arith.constant dense<0.000000e+00> : vector<128x128xf32>
    %6 = tpu.matmul %4, %5, %cst {dimension_numbers = #tpu.dot_dimension_numbers<[1], [0], [0], [1], [0, 0, 1, 1], [], []>} : vector<128x128xbf16>, vector<128x128xbf16>, vector<128x128xf32> -> vector<128x128xf32>
    %c0_5 = arith.constant 0 : index
    %c0_6 = arith.constant 0 : index
    %7 = vector.load %arg4[%c0_5, %c0_6] : memref<1x128xf32, #tpu.memory_space<vmem>>, vector<1x128xf32>
    %8 = vector.broadcast %7 : vector<1x128xf32> to vector<128x128xf32>
    %9 = arith.addf %6, %8 : vector<128x128xf32>
    %10 = math.tanh %9 : vector<128x128xf32>
    %11 = arith.truncf %10 : vector<128x128xf32> to vector<128x128xbf16>
    %c0_7 = arith.constant 0 : index
    %c0_8 = arith.constant 0 : index
    %12 = vector.load %arg5[%c0_7, %c0_8] : memref<128x2xbf16, #tpu.memory_space<vmem>>, vector<128x2xbf16>
    %cst_9 = arith.constant dense<0.000000e+00> : vector<128x2xf32>
    %13 = tpu.matmul %11, %12, %cst_9 {dimension_numbers = #tpu.dot_dimension_numbers<[1], [0], [0], [1], [0, 0, 1, 1], [], []>} : vector<128x128xbf16>, vector<128x2xbf16>, vector<128x2xf32> -> vector<128x2xf32>
    %c0_10 = arith.constant 0 : index
    %c0_11 = arith.constant 0 : index
    %14 = vector.load %arg6[%c0_10, %c0_11] : memref<1x2xf32, #tpu.memory_space<vmem>>, vector<1x2xf32>
    %15 = vector.broadcast %14 : vector<1x2xf32> to vector<128x2xf32>
    %16 = arith.addf %13, %15 : vector<128x2xf32>
    %17 = vector.shape_cast %16 : vector<128x2xf32> to vector<8x16x2xf32>
    %18 = tpu.transpose %17, [0, 2, 1] : vector<8x16x2xf32> -> vector<8x2x16xf32>
    %c0_12 = arith.constant 0 : index
    %c0_13 = arith.constant 0 : index
    %c0_14 = arith.constant 0 : index
    %19 = vector.load %arg14[%c0_12, %c0_13, %c0_14] : memref<8x2x1xf32, #tpu.memory_space<vmem>>, vector<8x2x1xf32>
    %cst_15 = arith.constant dense<0xFF800000> : vector<8x2xf32>
    %20 = vector.multi_reduction <maximumf>, %18, %cst_15 [2] : vector<8x2x16xf32> to vector<8x2xf32>
    %21 = vector.shape_cast %20 : vector<8x2xf32> to vector<8x2x1xf32>
    %22 = arith.maximumf %19, %21 : vector<8x2x1xf32>
    %23 = arith.subf %19, %22 : vector<8x2x1xf32>
    %24 = math.exp %23 : vector<8x2x1xf32>
    %25 = vector.broadcast %22 : vector<8x2x1xf32> to vector<8x2x16xf32>
    %26 = arith.subf %18, %25 : vector<8x2x16xf32>
    %27 = math.exp %26 : vector<8x2x16xf32>
    %c0_16 = arith.constant 0 : index
    %c0_17 = arith.constant 0 : index
    %c0_18 = arith.constant 0 : index
    %28 = vector.load %arg15[%c0_16, %c0_17, %c0_18] : memref<8x2x1xf32, #tpu.memory_space<vmem>>, vector<8x2x1xf32>
    %29 = arith.mulf %24, %28 : vector<8x2x1xf32>
    %cst_19 = arith.constant dense<0.000000e+00> : vector<8x2xf32>
    %30 = vector.multi_reduction <add>, %27, %cst_19 [2] : vector<8x2x16xf32> to vector<8x2xf32>
    %31 = vector.shape_cast %30 : vector<8x2xf32> to vector<8x2x1xf32>
    %32 = arith.addf %29, %31 : vector<8x2x1xf32>
    %c0_20 = arith.constant 0 : index
    %c0_21 = arith.constant 0 : index
    %c0_22 = arith.constant 0 : index
    %33 = vector.load %arg15[%c0_20, %c0_21, %c0_22] : memref<8x2x1xf32, #tpu.memory_space<vmem>>, vector<8x2x1xf32>
    tpu.vector_store %arg15[%c0_20, %c0_21, %c0_22], %32 {strides = array<i32>} : memref<8x2x1xf32, #tpu.memory_space<vmem>>, vector<8x2x1xf32>,
    %c0_23 = arith.constant 0 : index
    %c0_24 = arith.constant 0 : index
    %c0_25 = arith.constant 0 : index
    %34 = vector.load %arg16[%c0_23, %c0_24, %c0_25] : memref<8x2x128xf32, #tpu.memory_space<vmem>>, vector<8x2x128xf32>
    %35 = vector.broadcast %24 : vector<8x2x1xf32> to vector<8x2x128xf32>
    %36 = arith.mulf %35, %34 : vector<8x2x128xf32>
    %37 = arith.truncf %27 : vector<8x2x16xf32> to vector<8x2x16xbf16>
    "tpu.trace_start"() <{level = 10 : i32, message = "bht,btf->bhf"}> : () -> ()
    %cst_26 = arith.constant dense<0.000000e+00> : vector<8x2x128xf32>
    %38 = tpu.matmul %37, %3, %cst_26 {dimension_numbers = #tpu.dot_dimension_numbers<[2], [1], [1], [2], [0, 0, 0, 1, 1, 2], [0], [0]>} : vector<8x2x16xbf16>, vector<8x16x128xbf16>, vector<8x2x128xf32> -> vector<8x2x128xf32>
    "tpu.trace_stop"() : () -> ()
    %39 = arith.addf %36, %38 : vector<8x2x128xf32>
    %c0_27 = arith.constant 0 : index
    %c0_28 = arith.constant 0 : index
    %c0_29 = arith.constant 0 : index
    %40 = vector.load %arg16[%c0_27, %c0_28, %c0_29] : memref<8x2x128xf32, #tpu.memory_space<vmem>>, vector<8x2x128xf32>
    tpu.vector_store %arg16[%c0_27, %c0_28, %c0_29], %39 {strides = array<i32>} : memref<8x2x128xf32, #tpu.memory_space<vmem>>, vector<8x2x128xf32>,
    %c0_30 = arith.constant 0 : index
    %c0_31 = arith.constant 0 : index
    %c0_32 = arith.constant 0 : index
    %41 = vector.load %arg14[%c0_30, %c0_31, %c0_32] : memref<8x2x1xf32, #tpu.memory_space<vmem>>, vector<8x2x1xf32>
    tpu.vector_store %arg14[%c0_30, %c0_31, %c0_32], %22 {strides = array<i32>} : memref<8x2x1xf32, #tpu.memory_space<vmem>>, vector<8x2x1xf32>,
    %c1_i32 = arith.constant 1 : i32
    %42 = arith.cmpi eq, %arg1, %c1_i32 : i32
    %43 = arith.extui %42 : i1 to i32
    %c0_i32_33 = arith.constant 0 : i32
    %44 = arith.cmpi ne, %43, %c0_i32_33 : i32
    scf.if %44 {
      %c0_34 = arith.constant 0 : index
      %c0_35 = arith.constant 0 : index
      %c0_36 = arith.constant 0 : index
      %45 = vector.load %arg15[%c0_34, %c0_35, %c0_36] : memref<8x2x1xf32, #tpu.memory_space<vmem>>, vector<8x2x1xf32>
      %46 = tpu.reciprocal %45 {approx = true} : vector<8x2x1xf32> -> vector<8x2x1xf32>
      %c0_37 = arith.constant 0 : index
      %c0_38 = arith.constant 0 : index
      %c0_39 = arith.constant 0 : index
      %47 = vector.load %arg16[%c0_37, %c0_38, %c0_39] : memref<8x2x128xf32, #tpu.memory_space<vmem>>, vector<8x2x128xf32>
      %48 = vector.broadcast %46 : vector<8x2x1xf32> to vector<8x2x128xf32>
      %49 = arith.mulf %47, %48 : vector<8x2x128xf32>
      %50 = vector.extract_strided_slice %49 {offsets = [0, 0, 0], sizes = [8, 1, 128], strides = [1, 1, 1]} : vector<8x2x128xf32> to vector<8x1x128xf32>
      %51 = vector.shape_cast %50 : vector<8x1x128xf32> to vector<8x128xf32>
      %52 = vector.extract_strided_slice %49 {offsets = [0, 1, 0], sizes = [8, 1, 128], strides = [1, 1, 1]} : vector<8x2x128xf32> to vector<8x1x128xf32>
      %53 = vector.shape_cast %52 : vector<8x1x128xf32> to vector<8x128xf32>
      %54 = tpu.concatenate %51, %53 in 1 : vector<8x128xf32>, vector<8x128xf32> -> vector<8x256xf32>
      %55 = arith.truncf %54 : vector<8x256xf32> to vector<8x256xbf16>
      %c0_40 = arith.constant 0 : index
      %c0_41 = arith.constant 0 : index
      %56 = vector.load %arg7[%c0_40, %c0_41] : memref<256x32xbf16, #tpu.memory_space<vmem>>, vector<256x32xbf16>
      %cst_42 = arith.constant dense<0.000000e+00> : vector<8x32xf32>
      %57 = tpu.matmul %55, %56, %cst_42 {dimension_numbers = #tpu.dot_dimension_numbers<[1], [0], [0], [1], [0, 0, 1, 1], [], []>} : vector<8x256xbf16>, vector<256x32xbf16>, vector<8x32xf32> -> vector<8x32xf32>
      %c0_43 = arith.constant 0 : index
      %c0_44 = arith.constant 0 : index
      %58 = vector.load %arg8[%c0_43, %c0_44] : memref<1x32xf32, #tpu.memory_space<vmem>>, vector<1x32xf32>
      %59 = vector.broadcast %58 : vector<1x32xf32> to vector<8x32xf32>
      %60 = arith.addf %57, %59 : vector<8x32xf32>
      %cst_45 = arith.constant 0.000000e+00 : f32
      %61 = vector.broadcast %cst_45 : f32 to vector<8x32xf32>
      %62 = arith.maximumf %60, %61 : vector<8x32xf32>
      %63 = arith.truncf %62 : vector<8x32xf32> to vector<8x32xbf16>
      %c0_46 = arith.constant 0 : index
      %c0_47 = arith.constant 0 : index
      %64 = vector.load %arg9[%c0_46, %c0_47] : memref<32x32xbf16, #tpu.memory_space<vmem>>, vector<32x32xbf16>
      %cst_48 = arith.constant dense<0.000000e+00> : vector<8x32xf32>
      %65 = tpu.matmul %63, %64, %cst_48 {dimension_numbers = #tpu.dot_dimension_numbers<[1], [0], [0], [1], [0, 0, 1, 1], [], []>} : vector<8x32xbf16>, vector<32x32xbf16>, vector<8x32xf32> -> vector<8x32xf32>
      %c0_49 = arith.constant 0 : index
      %c0_50 = arith.constant 0 : index
      %66 = vector.load %arg10[%c0_49, %c0_50] : memref<1x32xf32, #tpu.memory_space<vmem>>, vector<1x32xf32>
      %67 = vector.broadcast %66 : vector<1x32xf32> to vector<8x32xf32>
      %68 = arith.addf %65, %67 : vector<8x32xf32>
      %cst_51 = arith.constant 0.000000e+00 : f32
      %69 = vector.broadcast %cst_51 : f32 to vector<8x32xf32>
      %70 = arith.maximumf %68, %69 : vector<8x32xf32>
      %71 = arith.truncf %70 : vector<8x32xf32> to vector<8x32xbf16>
      %c0_52 = arith.constant 0 : index
      %c0_53 = arith.constant 0 : index
      %72 = vector.load %arg11[%c0_52, %c0_53] : memref<32x3xbf16, #tpu.memory_space<vmem>>, vector<32x3xbf16>
      %cst_54 = arith.constant dense<0.000000e+00> : vector<8x3xf32>
      %73 = tpu.matmul %71, %72, %cst_54 {dimension_numbers = #tpu.dot_dimension_numbers<[1], [0], [0], [1], [0, 0, 1, 1], [], []>} : vector<8x32xbf16>, vector<32x3xbf16>, vector<8x3xf32> -> vector<8x3xf32>
      %c0_55 = arith.constant 0 : index
      %c0_56 = arith.constant 0 : index
      %74 = vector.load %arg12[%c0_55, %c0_56] : memref<1x3xf32, #tpu.memory_space<vmem>>, vector<1x3xf32>
      %75 = vector.broadcast %74 : vector<1x3xf32> to vector<8x3xf32>
      %76 = arith.addf %73, %75 : vector<8x3xf32>
      %c0_57 = arith.constant 0 : index
      %c0_58 = arith.constant 0 : index
      %77 = vector.load %arg13[%c0_57, %c0_58] : memref<8x3xf32, #tpu.memory_space<vmem>>, vector<8x3xf32>
      tpu.vector_store %arg13[%c0_57, %c0_58], %76 {strides = array<i32>} : memref<8x3xf32, #tpu.memory_space<vmem>>, vector<8x3xf32>,
    } else {
    }
    return
  }
  func.func @transform_0(%arg0: i32, %arg1: i32) -> (i32, i32, i32) {
    %c0_i32 = arith.constant 0 : i32
    %c0_i32_0 = arith.constant 0 : i32
    return %arg0, %arg1, %c0_i32 : i32, i32, i32
  }
  func.func @transform_1(%arg0: i32, %arg1: i32) -> (i32, i32) {
    %c0_i32 = arith.constant 0 : i32
    %c0_i32_0 = arith.constant 0 : i32
    %c0_i32_1 = arith.constant 0 : i32
    return %c0_i32, %c0_i32_0 : i32, i32
  }
  func.func @transform_2(%arg0: i32, %arg1: i32) -> (i32, i32) {
    %c0_i32 = arith.constant 0 : i32
    %c0_i32_0 = arith.constant 0 : i32
    %c0_i32_1 = arith.constant 0 : i32
    return %c0_i32, %c0_i32_0 : i32, i32
  }
  func.func @transform_3(%arg0: i32, %arg1: i32) -> (i32, i32) {
    %c0_i32 = arith.constant 0 : i32
    %c0_i32_0 = arith.constant 0 : i32
    %c0_i32_1 = arith.constant 0 : i32
    return %c0_i32, %c0_i32_0 : i32, i32
  }
  func.func @transform_4(%arg0: i32, %arg1: i32) -> (i32, i32) {
    %c0_i32 = arith.constant 0 : i32
    %c0_i32_0 = arith.constant 0 : i32
    %c0_i32_1 = arith.constant 0 : i32
    return %c0_i32, %c0_i32_0 : i32, i32
  }
  func.func @transform_5(%arg0: i32, %arg1: i32) -> (i32, i32) {
    %c0_i32 = arith.constant 0 : i32
    %c0_i32_0 = arith.constant 0 : i32
    %c0_i32_1 = arith.constant 0 : i32
    return %c0_i32, %c0_i32_0 : i32, i32
  }
  func.func @transform_6(%arg0: i32, %arg1: i32) -> (i32, i32) {
    %c0_i32 = arith.constant 0 : i32
    %c0_i32_0 = arith.constant 0 : i32
    %c0_i32_1 = arith.constant 0 : i32
    return %c0_i32, %c0_i32_0 : i32, i32
  }
  func.func @transform_7(%arg0: i32, %arg1: i32) -> (i32, i32) {
    %c0_i32 = arith.constant 0 : i32
    %c0_i32_0 = arith.constant 0 : i32
    %c0_i32_1 = arith.constant 0 : i32
    return %c0_i32, %c0_i32_0 : i32, i32
  }
  func.func @transform_8(%arg0: i32, %arg1: i32) -> (i32, i32) {
    %c0_i32 = arith.constant 0 : i32
    %c0_i32_0 = arith.constant 0 : i32
    %c0_i32_1 = arith.constant 0 : i32
    return %c0_i32, %c0_i32_0 : i32, i32
  }
  func.func @transform_9(%arg0: i32, %arg1: i32) -> (i32, i32) {
    %c0_i32 = arith.constant 0 : i32
    %c0_i32_0 = arith.constant 0 : i32
    %c0_i32_1 = arith.constant 0 : i32
    return %c0_i32, %c0_i32_0 : i32, i32
  }
  func.func @transform_10(%arg0: i32, %arg1: i32) -> (i32, i32) {
    %c0_i32 = arith.constant 0 : i32
    %c0_i32_0 = arith.constant 0 : i32
    %c0_i32_1 = arith.constant 0 : i32
    return %c0_i32, %c0_i32_0 : i32, i32
  }
  func.func @transform_11(%arg0: i32, %arg1: i32) -> (i32, i32) {
    %c0_i32 = arith.constant 0 : i32
    %c0_i32_0 = arith.constant 0 : i32
    return %arg0, %c0_i32 : i32, i32
  }
}

</mosaic_0001>

<bundles_post_ra>
// kernel: tpu_custom_call.1
= control target key start
LH: loop header
LB: loop body
LE: loop exit
PB: predicated region body
PF: predicated region fallthrough
CT: control target
= control target key end

     0   :  { %s3405_s0 = inlined_call_operand.hbm [shape: bf16[16,32,128], index: 0, kind: input, shape index: {}]   ;;  %s3406_s1 = inlined_call_operand.vmem [shape: bf16[128,128], index: 1, kind: input, shape index: {}]   ;;  %s3407_s2 = inlined_call_operand.vmem [shape: f32[1,128], index: 2, kind: input, shape index: {}]   ;;  %s3408_s3 = inlined_call_operand.vmem [shape: bf16[128,2], index: 3, kind: input, shape index: {}]   ;;  %s3409_s4 = inlined_call_operand.vmem [shape: f32[1,2], index: 4, kind: input, shape index: {}]   ;;  %s3410_s5 = inlined_call_operand.vmem [shape: bf16[256,32], index: 5, kind: input, shape index: {}]   ;;  %s3411_s6 = inlined_call_operand.vmem [shape: f32[1,32], index: 6, kind: input, shape index: {}]   ;;  %s3412_s7 = inlined_call_operand.vmem [shape: bf16[32,32], index: 7, kind: input, shape index: {}]   ;;  %s3413_s8 = inlined_call_operand.vmem [shape: f32[1,32], index: 8, kind: input, shape index: {}]   ;;  %s3414_s9 = inlined_call_operand.vmem [shape: bf16[32,3], index: 9, kind: input, shape index: {}]   ;;  %s3415_s10 = inlined_call_operand.vmem [shape: f32[1,3], index: 10, kind: input, shape index: {}]   ;;  %s3416_s11 = inlined_call_operand.vmem [shape: f32[16,3], index: 11, kind: output, shape index: {}]  }
   0x1   :  { %3421 = sst [smem:[#allocation16_spill]] %s3413_s8 }
   0x2   :  { %3422 = sst [smem:[#allocation17_spill]] %s3415_s10 }
   0x3   :  { %16 = vsyncpa [#allocation6], 0 }
   0x4   :  { %18 = vsyncpa [#allocation6 + $0x1], 0  ;;  %s2933_s17 = smov 0   ;;  %s2935_s18 = smov 0  }
   0x5   :  { %s2937_s19 = smov 0   ;;  %s2939_s20 = smov 0  }
   0x6   :  { %s2941_s21 = smov 0   ;;  %s2943_s22 = smov 0  }
   0x7   :  { %s2945_s23 = smov 0   ;;  %s2947_s24 = smov 0  }
   0x8 LB: > { %3423 = sst [smem:[#allocation11_spill]] %s2849_s22  ;;  %s33_s25 = sadd.s32 1, %s2849_s22  ;;  %s2857_s24 = sphi %s2947_s24, %s24_s24   ;;  %s2853_s23 = sphi %s2945_s23, %s3436_s23   ;;  %s2849_s22 = sphi %s2943_s22, %s3435_s22   ;;  %s2845_s21 = sphi %s2941_s21, %s3434_s21   ;;  %s2841_s20 = sphi %s2939_s20, %s3433_s20   ;;  %s2837_s19 = sphi %s2937_s19, %s3439_s19   ;;  %s2833_s18 = sphi %s2935_s18, %s3438_s18   ;;  %s2829_s17 = sphi %s2933_s17, %s3437_s17  }
   0x9   : > { %3424 = sst [smem:[#allocation12_spill]] %s2853_s23  ;;  %p34_p0 = scmp.ge.s32.totalorder %s33_s25, 2 }
   0xa   : > { %s36_s26 = sadd.s32 1, %s2853_s23  ;;  %s2294_s27 = sadd.s32 4294967295, %s2857_s24  }
   0xb   : > { %p52_p1 = scmp.ne.s32.totalorder %s2837_s19, %s2833_s18  ;;  %s3441_s25 = smov (%p34_p0, %s33_s25), 0 }
   0xc   : > { %3425 = sst [smem:[#allocation13_spill]] %s3441_s25  ;;  %s3443_s26 = smov (!%p34_p0, %s36_s26), %s2853_s23 }
   0xd   : > { %s41_s28 = ssub.s32 %s2849_s22, %s3441_s25  ;;  %p53_p2 = scmp.eq.s32.totalorder %s2857_s24, 0 }
   0xe   : > { %p38_p3 = scmp.ge.s32.totalorder %s3443_s26, 2  ;;  %p58_p4 = scmp.ne.s32.totalorder %s2833_s18, %s2829_s17 }
   0xf   : > { %p2983_p5 = por %p53_p2, %p52_p1  ;;  %p59_p6 = scmp.eq.s32.totalorder %s2294_s27, 0 }
  0x10   : > { %s3445_s26 = smov (%p38_p3, %s3443_s26), 0  ;;  %s45_s14 = sadd.s32 1, %s2837_s19 }
  0x11   : > { %3427 = sst [smem:[#allocation14_spill]] %s3445_s26  ;;  %p2989_p7 = por %p59_p6, %p58_p4 }
  0x12   : > { %s40_s12 = ssub.s32 %s2853_s23, %s3445_s26  ;;  %p2297_p9 = scmp.ge.s32.totalorder %s2857_s24, 4 }
  0x13   : > { %s42_s13 = sor.u32 %s41_s28, %s40_s12 }
  0x14   : > { %p43_p8 = scmp.eq.s32.totalorder %s42_s13, 0  ;;  %344 = sbr.rel (%p2297_p9) target bundleno = 43 (0x2b), region = 56 }
  0x16   : > { %s2997_s15 = scalar_select %p43_p8, %s2837_s19, %s45_s14  }
  0x18   : > { %3429 = sst [smem:[#allocation15_spill]] %s2997_s15 }
  0x1b   : > { %s348_s16 = sand.u32 1, %s2837_s19   ;;  %s2300_s17 = sshll.u32 %s2849_s22, 1 }
  0x1c   : > { %s2298_s27 = sshll.u32 %s348_s16, 6  ;;  %s2371_s26 = sshll.u32 %s2853_s23, 5 }
  0x1d   : > { %s359_s28 = sadd.s32 %s2371_s26, %s2300_s17  ;;  %s352_s12 = scalar_lea.vmem [#allocation5], %s2298_s27 }
  0x1e   : > { %s374_s13 = sshll.u32 %s352_s12, 4  ;;  %s2302_s14 = sshll.u32 %s359_s28, 6  ;;  %s375_s13 = int_to_ptr.vmem [resolvable:$true] %s374_s13 }
  0x1f   : > { %s2576_s25 = scalar_select %p2983_p5, [#allocation0], [#allocation9] }
  0x20   : > { %s2859_s15 = smov 256   ;;  %s2860_s8 = smov 128  }
  0x21   : > { %2577 = sst [smem:[#allocation8]] (%p2983_p5), %s2859_s15  ;;  %s2861_s22 = smov 2  }
  0x22   : > { %s366_s10 = sld [smem:[%s2576_s25]]   ;;  %s2862_s26 = smov 64  }
  0x23   : > { %2578 = sst [smem:[#allocation8 + $0x1]] (%p2983_p5), %s2860_s8  ;;  %s361_s28 = scalar_lea.hbm %s3405_s0, %s2302_s14 }
  0x24   : > { %2579 = sst [smem:[#allocation8 + $0x2]] (%p2983_p5), %s2861_s22  ;;  %s2863_s12 = smov 4  }
  0x25   : > { %2580 = sst [smem:[#allocation8 + $0x3]] (%p2983_p5), %s2862_s26  ;;  %s349_s23 = scalar_lea.sflag [#allocation6], %s348_s16 }
  0x26   : > { %2581 = sst [smem:[#allocation8 + $0x4]] (%p2983_p5), %s2862_s26  ;;  %s2864_s8 = smov [#allocation7]  }
  0x27   : > { %2582 = sst [smem:[#allocation8 + $0x5]] (%p2983_p5), %s2863_s12 }
  0x28   : > { %s2303_s25 = sshll.u32 %s366_s10, 26 }
  0x29   : > { %s2304_s15 = sadd.s32 134217728, %s2303_s25 }
  0x2a   : > { %2583 = dma.general (%p2983_p5), %s361_s28, 1024, %s375_s13, %s349_s23, %s2864_s8, [#allocation8], %s2304_s15, 0  }
  0x2b PF: > { %p2305_p10 = scmp.ge.s32.totalorder %s2857_s24, 1  ;;  %p395_p11 = scmp.lt.s32.totalorder %s2857_s24, 5 }
  0x2d   : > { %p396_p12 = pnand %p2305_p10, %p395_p11 }
  0x2e   : > { %s401_s22 = sand.u32 (!%p396_p12), 1, %s2833_s18  }
  0x2f   : > { %399 = sbr.rel (%p396_p12) target bundleno = 1988 (0x7c4), region = 64  ;;  %s2306_s14 = sshll.u32 (!%p396_p12), %s401_s22, 6 }
  0x30   : > { %s402_s26 = scalar_lea.sflag (!%p396_p12), [#allocation6], %s401_s22  ;;  %s3025_s17 = scalar_lea.vmem (!%p396_p12), [#allocation5], %s2306_s14 }
  0x36   : > { %2824 = dma.done.wait (%p2989_p7), %s402_s26, 1024  }
  0x37   : > { %2826 = vsyncadd (%p2989_p7), %s402_s26, 4294966272  ;;  %p445_p13 = scmp.lt.s32.totalorder %s2845_s21, 1  ;;  %p2308_p0 = scmp.ne.s32.totalorder %s2841_s20, 0 }
  0x38   : > { %vm454_vm0 = vcmask (!%p2308_p0), 1024   ;;  %v2865_v0 = vmov (!%p2308_p0), -inf   ;;  %v2866_v1 = vmov (!%p2308_p0), 0.0  }
  0x39   : > { %s3447_s21 = smov (!%p445_p13, %s2845_s21), 1  ;;  %453 = sbr.rel (%p2308_p0) target bundleno = 70 (0x46), region = 72 }
  0x3a   : > { %s2307_s10 = sshll.u32 %s3447_s21, 3  ;;  %455 = vst.msk [vmem:[#allocation2] sm:$0x3] (!%p2308_p0), %vm454_vm0, %v2865_v0  ;;  %456 = vst.msk [vmem:[#allocation2 + $0x2] sm:$0x3] (!%p2308_p0), %vm454_vm0, %v2865_v0 }
  0x3b   : > { %s3036_s16 = scalar_lea.vmem %s3416_s11, %s2307_s10  ;;  %457 = vst.msk [vmem:[#allocation2 + $0x4] sm:$0x3] (!%p2308_p0), %vm454_vm0, %v2865_v0  ;;  %458 = vst.msk [vmem:[#allocation2 + $0x6] sm:$0x3] (!%p2308_p0), %vm454_vm0, %v2865_v0 }
  0x3c   : > { %459 = vst.msk [vmem:[#allocation2 + $0x8] sm:$0x3] (!%p2308_p0), %vm454_vm0, %v2865_v0  ;;  %460 = vst.msk [vmem:[#allocation2 + $0xa] sm:$0x3] (!%p2308_p0), %vm454_vm0, %v2865_v0 }
  0x3d   : > { %461 = vst.msk [vmem:[#allocation2 + $0xc] sm:$0x3] (!%p2308_p0), %vm454_vm0, %v2865_v0  ;;  %462 = vst.msk [vmem:[#allocation2 + $0xe] sm:$0x3] (!%p2308_p0), %vm454_vm0, %v2865_v0 }
  0x3e   : > { %463 = vst.msk [vmem:[#allocation3] sm:$0x3] (!%p2308_p0), %vm454_vm0, %v2866_v1  ;;  %464 = vst.msk [vmem:[#allocation3 + $0x2] sm:$0x3] (!%p2308_p0), %vm454_vm0, %v2866_v1 }
  0x3f   : > { %465 = vst.msk [vmem:[#allocation3 + $0x4] sm:$0x3] (!%p2308_p0), %vm454_vm0, %v2866_v1  ;;  %466 = vst.msk [vmem:[#allocation3 + $0x6] sm:$0x3] (!%p2308_p0), %vm454_vm0, %v2866_v1 }
  0x40   : > { %467 = vst.msk [vmem:[#allocation3 + $0x8] sm:$0x3] %vm454_vm0, %v2866_v1  ;;  %468 = vst.msk [vmem:[#allocation3 + $0xa] sm:$0x3] %vm454_vm0, %v2866_v1 }
  0x41   : > { %469 = vst.msk [vmem:[#allocation3 + $0xc] sm:$0x3] %vm454_vm0, %v2866_v1  ;;  %470 = vst.msk [vmem:[#allocation3 + $0xe] sm:$0x3] %vm454_vm0, %v2866_v1 }
  0x42   : > { %471 = vst [vmem:[#allocation4] sm:$0x3] %v2866_v1  ;;  %472 = vst [vmem:[#allocation4 + $0x2] sm:$0x3] %v2866_v1 }
  0x43   : > { %473 = vst [vmem:[#allocation4 + $0x4] sm:$0x3] %v2866_v1  ;;  %474 = vst [vmem:[#allocation4 + $0x6] sm:$0x3] %v2866_v1 }
  0x44   : > { %475 = vst [vmem:[#allocation4 + $0x8] sm:$0x3] %v2866_v1  ;;  %476 = vst [vmem:[#allocation4 + $0xa] sm:$0x3] %v2866_v1 }
  0x45   : > { %477 = vst [vmem:[#allocation4 + $0xc] sm:$0x3] %v2866_v1  ;;  %478 = vst [vmem:[#allocation4 + $0xe] sm:$0x3] %v2866_v1 }
  0x46 PF: > { %v2665_v2 = vld [vmem:[%s3406_s1] sm:$0xff]   ;;  %v2666_v3 = vld [vmem:[%s3406_s1 + $0x8] sm:$0xff]   ;;  %v2667_v4 = vld [vmem:[%s3406_s1 + $0x10] sm:$0xff]   ;;  %vm1167_vm1 = vcmask 123904   ;;  %vm1336_vm2 = vcmask 1024   ;;  %vm2869_vm3 = vmmov 0  }
  0x47   : > { %2448 = vmatprep.subr.bf16.mxu0 %v2665_v2  ;;  %v2668_v5 = vld [vmem:[%s3406_s1 + $0x18] sm:$0xff]   ;;  %v3068_v6 = vld [vmem:[%s3025_s17] sm:$0xff]   ;;  %v2669_v7 = vld [vmem:[%s3406_s1 + $0x20] sm:$0xff]   ;;  %vm1409_vm4 = vcmask 130048   ;;  %p2343_p1 = scmp.ne.s32.totalorder %s2841_s20, 1 }
  0x48   : > { %2449 = vmatpush3.bf16.msra.mxu0 %v2665_v2  ;;  %2464 = vmatprep.mubr.bf16.mxu0 %v3068_v6  ;;  %v2670_v8 = vld [vmem:[%s3406_s1 + $0x28] sm:$0xff]   ;;  %v2681_v9 = vld [vmem:[%s3408_s3] sm:$0xff]   ;;  %v2671_v11 = vld [vmem:[%s3406_s1 + $0x30] sm:$0xff]   ;;  %vm1863_vm5 = vcmask (!%p2343_p1), 1041409   ;;  %vm1866_vm6 = vcmask (!%p2343_p1), 1042434   ;;  %vm1869_vm7 = vcmask (!%p2343_p1), 1043459  }
  0x49   : > { %2450 = vmatprep.subr.bf16.mxu0 %v2666_v3  ;;  %v2682_v10 = vld [vmem:[%s3408_s3 + $0x8] sm:$0xff]   ;;  %2480 = vmatprep.subr.bf16.mxu1 %v2681_v9  ;;  %v2683_v12 = vld [vmem:[%s3408_s3 + $0x10] sm:$0xff]   ;;  %v2672_v13 = vld [vmem:[%s3406_s1 + $0x38] sm:$0xff]   ;;  %vm1872_vm8 = vcmask (!%p2343_p1), 1044484   ;;  %vm1875_vm9 = vcmask (!%p2343_p1), 1045509   ;;  %vm1878_vm10 = vcmask (!%p2343_p1), 1046534  }
  0x4a   : > { %2481 = vmatpush3.bf16.msra.mxu1 %v2681_v9  ;;  %v3093_v14 = vld [vmem:[%s3025_s17 + $0x8] sm:$0xff]   ;;  %v3096_v15 = vld [vmem:[%s3025_s17 + $0x10] sm:$0xff]   ;;  %v3101_v16 = vld [vmem:[%s3025_s17 + $0x18] sm:$0xff]   ;;  %vm1881_vm11 = vcmask (!%p2343_p1), 1047559   ;;  %vm2872_vm12 = vmmov (!%p2343_p1), 0   ;;  %vm2101_vm13 = vcmask (!%p2343_p1), 261120  }
  0x4b   : > { %2482 = vmatprep.subr.bf16.mxu1 %v2682_v10  ;;  %v3104_v17 = vld [vmem:[%s3025_s17 + $0x20] sm:$0xff]   ;;  %v3109_v18 = vld [vmem:[%s3025_s17 + $0x28] sm:$0xff]   ;;  %v3112_v19 = vld [vmem:[%s3025_s17 + $0x30] sm:$0xff]   ;;  %s3430_s23 = sld [smem:[#allocation16_spill]] (!%p2343_p1)  ;;  %s3431_s30 = sld [smem:[#allocation17_spill]] (!%p2343_p1)  ;;  %vm2213_vm14 = vcmask (!%p2343_p1), 23552  }
  0x4c   : > { %2451 = vmatpush3.bf16.msra.mxu0 %v2666_v3  ;;  %v3117_v20 = vld [vmem:[%s3025_s17 + $0x38] sm:$0xff]   ;;  %v2684_v21 = vld [vmem:[%s3408_s3 + $0x18] sm:$0xff]   ;;  %v2685_v22 = vld [vmem:[%s3408_s3 + $0x20] sm:$0xff]  }
  0x4d   : > { %2452 = vmatprep.subr.bf16.mxu0 %v2667_v4  ;;  %v2686_v23 = vld [vmem:[%s3408_s3 + $0x28] sm:$0xff]   ;;  %v2687_v24 = vld [vmem:[%s3408_s3 + $0x30] sm:$0xff]   ;;  %v2688_v25 = vld [vmem:[%s3408_s3 + $0x38] sm:$0xff]  }
  0x4e   : > { %2483 = vmatpush3.bf16.msra.mxu1 %v2682_v10  ;;  %v2309_v26 = vld [vmem:[%s3407_s2] ss:$0 sm:$0xff] }
  0x4f   : > { %2484 = vmatprep.subr.bf16.mxu1 %v2683_v12 }
  0x50   : > { %2453 = vmatpush3.bf16.msra.mxu0 %v2667_v4 }
  0x51   : > { %2454 = vmatprep.subr.bf16.mxu0 %v2668_v5 }
  0x52   : > { %2485 = vmatpush3.bf16.msra.mxu1 %v2683_v12 }
  0x53   : > { %2486 = vmatprep.subr.bf16.mxu1 %v2684_v21 }
  0x54   : > { %2455 = vmatpush3.bf16.msra.mxu0 %v2668_v5 }
  0x55   : > { %2456 = vmatprep.subr.bf16.mxu0 %v2669_v7 }
  0x56   : > { %2487 = vmatpush3.bf16.msra.mxu1 %v2684_v21 }
  0x57   : > { %2488 = vmatprep.subr.bf16.mxu1 %v2685_v22 }
  0x58   : > { %2457 = vmatpush3.bf16.msra.mxu0 %v2669_v7 }
  0x59   : > { %2458 = vmatprep.subr.bf16.mxu0 %v2670_v8 }
  0x5a   : > { %2489 = vmatpush3.bf16.msra.mxu1 %v2685_v22 }
  0x5b   : > { %2490 = vmatprep.subr.bf16.mxu1 %v2686_v23 }
  0x5c   : > { %2459 = vmatpush3.bf16.msra.mxu0 %v2670_v8 }
  0x5d   : > { %2460 = vmatprep.subr.bf16.mxu0 %v2671_v11 }
  0x5e   : > { %2491 = vmatpush3.bf16.msra.mxu1 %v2686_v23 }
  0x5f   : > { %2492 = vmatprep.subr.bf16.mxu1 %v2687_v24 }
  0x60   : > { %2461 = vmatpush3.bf16.msra.mxu0 %v2671_v11 }
  0x61   : > { %2462 = vmatprep.subr.bf16.mxu0 %v2672_v13 }
  0x62   : > { %2493 = vmatpush3.bf16.msra.mxu1 %v2687_v24 }
  0x63   : > { %2494 = vmatprep.subr.bf16.mxu1 %v2688_v25 }
  0x64   : > { %2463 = vmatpush3.bf16.msra.mxu0 %v2672_v13 }
  0x66   : > { %2495 = vmatpush3.bf16.msra.mxu1 %v2688_v25 }
  0x67   : > { %2465 = vmatmul.mubr.bf16.vlgmr.msra.gmra.mrb[0].mxu0 %v3093_v14 }
  0x68   : > { %2468 = vmatprep.mubr.bf16.mxu0 %v3096_v15 }
  0x6f   : > { %2469 = vmatmul.mubr.bf16.gmra.mrb[4].mxu0 %v3101_v16 }
  0x70   : > { %2472 = vmatprep.mubr.bf16.mxu0 %v3104_v17 }
  0x77   : > { %2473 = vmatmul.mubr.bf16.gmra.mrb[8].mxu0 %v3109_v18 }
  0x78   : > { %2476 = vmatprep.mubr.bf16.mxu0 %v3112_v19 }
  0x7f   : > { %2477 = vmatmul.mubr.bf16.gmra.mrb[12].mxu0 %v3117_v20 }
 0x13a   : > { %v2466_v27 = vpop.f32.mrb[0].mxu0 }
 0x13b   : > { %v657_v28 = vadd.f32 %v2466_v27, %v2309_v26  ;;  %v648_v29 = vpop.f32.mrb[1].mxu0 }
 0x13c   : > { %v649_v30 = vadd.f32 %v2309_v26, %v648_v29  ;;  %v2467_v31 = vpop.f32.mrb[2].mxu0 }
 0x13d   : > { %2689 = vtanh.f32 %v657_v28  ;;  %v660_v32 = vadd.f32 %v2467_v31, %v2309_v26  ;;  %v651_v33 = vpop.f32.mrb[3].mxu0 }
 0x13e   : > { %2691 = vtanh.f32 %v649_v30  ;;  %v652_v34 = vadd.f32 %v2309_v26, %v651_v33 }
 0x13f   : > { %2693 = vtanh.f32 %v660_v32 }
 0x140   : > { %2695 = vtanh.f32 %v652_v34 }
 0x142   : > { %v2470_v35 = vpop.f32.mrb[4].mxu0 }
 0x143   : > { %v673_v36 = vadd.f32 %v2470_v35, %v2309_v26  ;;  %v664_v37 = vpop.f32.mrb[5].mxu0 }
 0x144   : > { %v665_v38 = vadd.f32 %v2309_v26, %v664_v37  ;;  %v2471_v39 = vpop.f32.mrb[6].mxu0 }
 0x145   : > { %2697 = vtanh.f32 %v673_v36  ;;  %v676_v40 = vadd.f32 %v2471_v39, %v2309_v26  ;;  %v667_v41 = vpop.f32.mrb[7].mxu0 }
 0x146   : > { %2699 = vtanh.f32 %v665_v38  ;;  %v668_v42 = vadd.f32 %v2309_v26, %v667_v41 }
 0x147   : > { %v2690_v43 = vpop.eup %2689  ;;  %2701 = vtanh.f32 %v676_v40 }
 0x148   : > { %v2692_v44 = vpop.eup %2691  ;;  %2703 = vtanh.f32 %v668_v42 }
 0x149   : > { %v2694_v45 = vpop.eup %2693 }
 0x14a   : > { %v2696_v46 = vpop.eup %2695  ;;  %v2474_v47 = vpop.f32.mrb[8].mxu0  ;;  %v728_v48 = vpack.c.bf16 %v2694_v45, %v2690_v43 }
 0x14b   : > { %v689_v49 = vadd.f32 %v2474_v47, %v2309_v26  ;;  %v680_v50 = vpop.f32.mrb[9].mxu0  ;;  %v727_v51 = vpack.c.bf16 %v2696_v46, %v2692_v44 }
 0x14c   : > { %v681_v52 = vadd.f32 %v2309_v26, %v680_v50  ;;  %v2475_v53 = vpop.f32.mrb[10].mxu0 }
 0x14d   : > { %2705 = vtanh.f32 %v689_v49  ;;  %v692_v54 = vadd.f32 %v2475_v53, %v2309_v26  ;;  %v683_v55 = vpop.f32.mrb[11].mxu0  ;;  %2496 = vmatprep.mubr.bf16.mxu1 %v727_v51 }
 0x14e   : > { %2707 = vtanh.f32 %v681_v52  ;;  %v684_v56 = vadd.f32 %v2309_v26, %v683_v55  ;;  %2497 = vmatmul.mubr.bf16.vlgmr.msra.gmra.mrb[0].mxu1 %v728_v48 }
 0x14f   : > { %v2698_v57 = vpop.eup %2697  ;;  %2709 = vtanh.f32 %v692_v54 }
 0x150   : > { %v2700_v58 = vpop.eup %2699  ;;  %2711 = vtanh.f32 %v684_v56 }
 0x151   : > { %v2702_v59 = vpop.eup %2701 }
 0x152   : > { %v2704_v60 = vpop.eup %2703  ;;  %v2478_v61 = vpop.f32.mrb[12].mxu0  ;;  %v730_v62 = vpack.c.bf16 %v2702_v59, %v2698_v57 }
 0x153   : > { %v705_v63 = vadd.f32 %v2478_v61, %v2309_v26  ;;  %v696_v0 = vpop.f32.mrb[13].mxu0  ;;  %v729_v1 = vpack.c.bf16 %v2704_v60, %v2700_v58 }
 0x154   : > { %v697_v2 = vadd.f32 %v2309_v26, %v696_v0  ;;  %v2479_v3 = vpop.f32.mrb[14].mxu0 }
 0x155   : > { %2713 = vtanh.f32 %v705_v63  ;;  %v708_v4 = vadd.f32 %v2479_v3, %v2309_v26  ;;  %v699_v5 = vpop.f32.mrb[15].mxu0  ;;  %2500 = vmatprep.mubr.bf16.mxu1 %v729_v1 }
 0x156   : > { %2715 = vtanh.f32 %v697_v2  ;;  %v700_v7 = vadd.f32 %v2309_v26, %v699_v5  ;;  %2501 = vmatmul.mubr.bf16.gmra.mrb[4].mxu1 %v730_v62  ;;  %v2326_v26 = vld [vmem:[%s3409_s4] ss:$0 sm:$0xff] }
 0x157   : > { %v2706_v8 = vpop.eup %2705  ;;  %2717 = vtanh.f32 %v708_v4 }
 0x158   : > { %v2708_v9 = vpop.eup %2707  ;;  %2719 = vtanh.f32 %v700_v7 }
 0x159   : > { %v2710_v10 = vpop.eup %2709 }
 0x15a   : > { %v2712_v11 = vpop.eup %2711  ;;  %v732_v12 = vpack.c.bf16 %v2710_v10, %v2706_v8  ;;  %v2867_v8 = vmov 0  }
 0x15b   : > { %v731_v13 = vpack.c.bf16 %v2712_v11, %v2708_v9 }
 0x15d   : > { %2504 = vmatprep.mubr.bf16.mxu1 %v731_v13 }
 0x15e   : > { %2505 = vmatmul.mubr.bf16.gmra.mrb[8].mxu1 %v732_v12 }
 0x15f   : > { %v2714_v21 = vpop.eup %2713 }
 0x160   : > { %v2716_v22 = vpop.eup %2715 }
 0x161   : > { %v2718_v23 = vpop.eup %2717 }
 0x162   : > { %v2720_v24 = vpop.eup %2719  ;;  %v734_v25 = vpack.c.bf16 %v2718_v23, %v2714_v21  ;;  %v2868_v21 = vmov 0.0   ;;  %v1159_v23 = vld [vmem:[#allocation2] sm:$0x3] }
 0x163   : > { %v733_v27 = vpack.c.bf16 %v2720_v24, %v2716_v22  ;;  %2512 = vmatprep.subr.bf16.mxu0 %v2868_v21  ;;  %2518 = vmatprep.subr.bf16.mxu1 %v2868_v21  ;;  %v1160_v22 = vld [vmem:[#allocation2 + $0x2] sm:$0x3] }
 0x164   : > { %2513 = vmatpush3.bf16.msra.mxu0 %v3068_v6  ;;  %2519 = vmatpush3.bf16.msra.mxu1 %v3093_v14  ;;  %v1161_v14 = vld [vmem:[#allocation2 + $0x4] sm:$0x3] }
 0x165   : > { %2508 = vmatprep.mubr.bf16.mxu1 %v733_v27  ;;  %2524 = vmatprep.subr.bf16.mxu0 %v2868_v21 }
 0x166   : > { %2509 = vmatmul.mubr.bf16.gmra.mrb[12].mxu1 %v734_v25  ;;  %2530 = vmatprep.subr.bf16.mxu1 %v2868_v21 }
 0x167   : > { %2520 = vmatprep.mubr.msk.bf16.mxu1 %vm2869_vm3, %v2868_v21  ;;  %2514 = vmatprep.mubr.msk.bf16.mxu0 %vm2869_vm3, %v2868_v21 }
 0x221   : > { %v2498_v28 = vpop.f32.mrb[0].mxu1 }
 0x222   : > { %v840_v29 = vpop.f32.mrb[1].mxu1  ;;  %v849_v30 = vadd.f32 %v2498_v28, %v2326_v26 }
 0x223   : > { %v2499_v31 = vpop.f32.mrb[2].mxu1  ;;  %v841_v32 = vadd.f32 %v2326_v26, %v840_v29 }
 0x224   : > { %935 = vxpose.xlu1.b32.start [1/2] (short) (narrow) %v849_v30, 8  ;;  %v843_v33 = vpop.f32.mrb[3].mxu1  ;;  %v852_v34 = vadd.f32 %v2499_v31, %v2326_v26  ;;  %v1162_v31 = vld [vmem:[#allocation2 + $0x6] sm:$0x3] }
 0x225   : > { %903 = vxpose.xlu0.b32.start [1/2] (short) (narrow) %v841_v32, 8  ;;  %v844_v35 = vadd.f32 %v2326_v26, %v843_v33 }
 0x228   : > { %936 = vxpose.xlu1.b32.end [2/2] (short) (narrow) %v852_v34, 8  ;;  %v1164_v34 = vld [vmem:[#allocation2 + $0xa] sm:$0x3] }
 0x229   : > { %v2502_v36 = vpop.f32.mrb[4].mxu1  ;;  %904 = vxpose.xlu0.b32.end [2/2] (short) (narrow) %v844_v35, 8  ;;  %v1163_v35 = vld [vmem:[#allocation2 + $0x8] sm:$0x3] }
 0x22a   : > { %v865_v37 = vadd.f32 %v2502_v36, %v2326_v26  ;;  %v856_v38 = vpop.f32.mrb[5].mxu1 }
 0x22b   : > { %v857_v39 = vadd.f32 %v2326_v26, %v856_v38  ;;  %v2503_v40 = vpop.f32.mrb[6].mxu1 }
 0x22c   : > { %999 = vxpose.xlu1.b32.start [1/2] (short) (narrow) %v865_v37, 8  ;;  %v859_v41 = vpop.f32.mrb[7].mxu1  ;;  %v868_v42 = vadd.f32 %v2503_v40, %v2326_v26 }
 0x22d   : > { %967 = vxpose.xlu0.b32.start [1/2] (short) (narrow) %v857_v39, 8  ;;  %v860_v43 = vadd.f32 %v2326_v26, %v859_v41 }
 0x230   : > { %1000 = vxpose.xlu1.b32.end [2/2] (short) (narrow) %v868_v42, 8 }
 0x231   : > { %v2506_v44 = vpop.f32.mrb[8].mxu1  ;;  %968 = vxpose.xlu0.b32.end [2/2] (short) (narrow) %v860_v43, 8 }
 0x232   : > { %v881_v45 = vadd.f32 %v2506_v44, %v2326_v26  ;;  %v872_v46 = vpop.f32.mrb[9].mxu1  ;;  %v3192_v44 = vld [vmem:[#allocation2 + $0xe] sm:$0x3] }
 0x233   : > { %v873_v47 = vadd.f32 %v2326_v26, %v872_v46  ;;  %v2507_v48 = vpop.f32.mrb[10].mxu1 }
 0x234   : > { %1063 = vxpose.xlu1.b32.start [1/2] (short) (narrow) %v881_v45, 8  ;;  %v875_v49 = vpop.f32.mrb[11].mxu1  ;;  %v884_v50 = vadd.f32 %v2507_v48, %v2326_v26  ;;  %v3194_v45 = vld [vmem:[#allocation2 + $0xc] sm:$0x3] }
 0x235   : > { %1031 = vxpose.xlu0.b32.start [1/2] (short) (narrow) %v873_v47, 8  ;;  %v876_v51 = vadd.f32 %v2326_v26, %v875_v49 }
 0x238   : > { %1064 = vxpose.xlu1.b32.end [2/2] (short) (narrow) %v884_v50, 8 }
 0x239   : > { %v2510_v52 = vpop.f32.mrb[12].mxu1  ;;  %1032 = vxpose.xlu0.b32.end [2/2] (short) (narrow) %v876_v51, 8 }
 0x23a   : > { %v897_v53 = vadd.f32 %v2510_v52, %v2326_v26  ;;  %v888_v54 = vpop.f32.mrb[13].mxu1 }
 0x23b   : > { %v889_v55 = vadd.f32 %v2326_v26, %v888_v54  ;;  %v2511_v56 = vpop.f32.mrb[14].mxu1 }
 0x23c   : > { %1127 = vxpose.xlu1.b32.start [1/2] (short) (narrow) %v897_v53, 8  ;;  %v891_v57 = vpop.f32.mrb[15].mxu1  ;;  %v900_v58 = vadd.f32 %v2511_v56, %v2326_v26 }
 0x23d   : > { %1095 = vxpose.xlu0.b32.start [1/2] (short) (narrow) %v889_v55, 8  ;;  %v892_v59 = vadd.f32 %v2326_v26, %v891_v57 }
 0x240   : > { %1128 = vxpose.xlu1.b32.end [2/2] (short) (narrow) %v900_v58, 8 }
 0x241   : > { %1096 = vxpose.xlu0.b32.end [2/2] (short) (narrow) %v892_v59, 8 }
 0x25e   : > { %2664 = vset.pattern.permute.xlu1 %v2867_v8 }
 0x26a   : > { %2663 = vset.pattern.permute.xlu0 %v2867_v8 }
 0x2a4   : > { %v3141_v60 = vpop.trf.xlu1 }
 0x2a5   : > { %v3143_v61 = vpop.trf.xlu0  ;;  %v1171_v62 = vsel %vm1167_vm1, %v3141_v60, -inf }
 0x2a6   : > { %1172 = vmax.xlane.f32.xlu1 %v1171_v62  ;;  %v1168_v63 = vsel %vm1167_vm1, %v3143_v61, -inf }
 0x2a7   : > { %1169 = vmax.xlane.f32.xlu0 %v1168_v63 }
 0x2ac   : > { %v3151_v1 = vpop.trf.xlu1 }
 0x2ad   : > { %v3149_v0 = vpop.trf.xlu0  ;;  %v1177_v3 = vsel %vm1167_vm1, %v3151_v1, -inf }
 0x2ae   : > { %v1174_v2 = vsel %vm1167_vm1, %v3149_v0, -inf }
 0x2af   : > { %1175 = vmax.xlane.f32.xlu1 %v1174_v2 }
 0x2b3   : > { %1178 = vmax.xlane.f32.xlu1 %v1177_v3 }
 0x2b4   : > { %v3157_v4 = vpop.trf.xlu1 }
 0x2b5   : > { %v1183_v5 = vsel %vm1167_vm1, %v3157_v4, -inf  ;;  %v3161_v7 = vpop.trf.xlu0 }
 0x2b6   : > { %v1180_v9 = vsel %vm1167_vm1, %v3161_v7, -inf }
 0x2b7   : > { %1184 = vmax.xlane.f32.xlu1 %v1183_v5  ;;  %1181 = vmax.xlane.f32.xlu0 %v1180_v9 }
 0x2bc   : > { %v3165_v10 = vpop.trf.xlu1 }
 0x2bd   : > { %v3167_v11 = vpop.trf.xlu0  ;;  %v1189_v12 = vsel %vm1167_vm1, %v3165_v10, -inf }
 0x2be   : > { %v1186_v13 = vsel %vm1167_vm1, %v3167_v11, -inf  ;;  %1190 = vmax.xlane.f32.xlu1 %v1189_v12 }
 0x2bf   : > { %1187 = vmax.xlane.f32.xlu0 %v1186_v13 }
 0x333   : > { %v1173_v24 = vpop.xlane.xlu1 %1172 }
 0x334   : > { %v1193_v25 = vmax.f32 %v1160_v22, %v1173_v24  ;;  %v1170_v27 = vpop.xlane.xlu0 %1169 }
 0x335   : > { %v1192_v26 = vmax.f32 %v1159_v23, %v1170_v27 }
 0x336   : > { %v1201_v28 = vsub.f32 %v1160_v22, %v1193_v25  ;;  %1771 = vst.msk [vmem:[#allocation2 + $0x2] sm:$0x3] %vm1336_vm2, %v1193_v25  ;;  %1231 = vperm.xlu1 %2664, %v1193_v25  }
 0x337   : > { %1770 = vst.msk [vmem:[#allocation2] sm:$0x3] %vm1336_vm2, %v1192_v26  ;;  %1226 = vperm.xlu0 %2663, %v1192_v26   ;;  %v1200_v42 = vsub.f32 %v1159_v23, %v1192_v26 }
 0x338   : > { %v1210_v6 = vmul.f32 1.442695, %v1201_v28 }
 0x339   : > { %v1208_v47 = vmul.f32 1.442695, %v1200_v42 }
 0x33a   : > { %2721 = vpow2.f32 %v1210_v6 }
 0x33c   : > { %v1176_v29 = vpop.xlane.xlu1 %1175 }
 0x33d   : > { %v1194_v30 = vmax.f32 %v1161_v14, %v1176_v29 }
 0x33f   : > { %1772 = vst.msk [vmem:[#allocation2 + $0x4] sm:$0x3] %vm1336_vm2, %v1194_v30  ;;  %v1202_v48 = vsub.f32 %v1161_v14, %v1194_v30 }
 0x340   : > { %v1179_v32 = vpop.xlane.xlu1 %1178 }
 0x341   : > { %v1195_v33 = vmax.f32 %v1162_v31, %v1179_v32  ;;  %v1212_v54 = vmul.f32 1.442695, %v1202_v48 }
 0x343   : > { %1773 = vst.msk [vmem:[#allocation2 + $0x6] sm:$0x3] %vm1336_vm2, %v1195_v33  ;;  %1241 = vperm.xlu1 %2664, %v1195_v33   ;;  %v1203_v55 = vsub.f32 %v1162_v31, %v1195_v33 }
 0x344   : > { %v3183_v36 = vpop.eup %2721  ;;  %v1185_v37 = vpop.xlane.xlu1 %1184 }
 0x345   : > { %v1182_v38 = vpop.xlane.xlu0 %1181  ;;  %v1197_v39 = vmax.f32 %v1164_v34, %v1185_v37  ;;  %1360 = vperm.xlu0 %2663, %v3183_v36   ;;  %v1214_v56 = vmul.f32 1.442695, %v1203_v55 }
 0x346   : > { %v1196_v40 = vmax.f32 %v1163_v35, %v1182_v38 }
 0x347   : > { %v1205_v41 = vsub.f32 %v1164_v34, %v1197_v39  ;;  %1775 = vst.msk [vmem:[#allocation2 + $0xa] sm:$0x3] %vm1336_vm2, %v1197_v39  ;;  %1236 = vperm.xlu1 %2664, %v1194_v30  }
 0x348   : > { %1774 = vst.msk [vmem:[#allocation2 + $0x8] sm:$0x3] %vm1336_vm2, %v1196_v40  ;;  %v1204_v57 = vsub.f32 %v1163_v35, %v1196_v40 }
 0x349   : > { %v1218_v43 = vmul.f32 1.442695, %v1205_v41 }
 0x34a   : > { %v1216_v59 = vmul.f32 1.442695, %v1204_v57 }
 0x34b   : > { %2723 = vpow2.f32 %v1218_v43  ;;  %1251 = vperm.xlu1 %2664, %v1197_v39   ;;  %v1191_v46 = vpop.xlane.xlu1 %1190 }
 0x34c   : > { %v1188_v49 = vpop.xlane.xlu0 %1187  ;;  %v3197_v50 = vmax.f32 %v3192_v44, %v1191_v46  ;;  %2725 = vpow2.f32 %v1208_v47 }
 0x34d   : > { %v3200_v51 = vmax.f32 %v3194_v45, %v1188_v49  ;;  %2727 = vpow2.f32 %v1212_v54 }
 0x34e   : > { %v1207_v52 = vsub.f32 %v3192_v44, %v3197_v50  ;;  %1777 = vst.msk [vmem:[#allocation2 + $0xe] sm:$0x3] %vm1336_vm2, %v3197_v50  ;;  %2729 = vpow2.f32 %v1214_v56 }
 0x34f   : > { %1246 = vperm.xlu1 %2664, %v1196_v40   ;;  %v1206_v53 = vsub.f32 %v3194_v45, %v3200_v51  ;;  %1776 = vst.msk [vmem:[#allocation2 + $0xc] sm:$0x3] %vm1336_vm2, %v3200_v51  ;;  %2731 = vpow2.f32 %v1216_v59 }
 0x353   : > { %1256 = vperm.xlu1 %2664, %v3200_v51  }
 0x355   : > { %v3211_v58 = vpop.eup %2723 }
 0x356   : > { %1380 = vperm.xlu0 %2663, %v3211_v58   ;;  %v3215_v62 = vpop.eup %2725 }
 0x357   : > { %1261 = vperm.xlu1 %2664, %v3197_v50   ;;  %v3218_v63 = vpop.eup %2727 }
 0x358   : > { %v3221_v2 = vpop.eup %2729 }
 0x359   : > { %v3224_v3 = vpop.eup %2731 }
 0x35b   : > { %1355 = vperm.xlu1 %2664, %v3215_v62  }
 0x35f   : > { %1365 = vperm.xlu1 %2664, %v3218_v63  }
 0x363   : > { %1370 = vperm.xlu1 %2664, %v3221_v2  }
 0x367   : > { %1375 = vperm.xlu1 %2664, %v3224_v3  }
 0x3b5   : > { %v1232_v5 = vpop.permute.xlu1 %1231 }
 0x3b6   : > { %v1265_v8 = vsub.f32 %v3141_v60, %v1232_v5  ;;  %v1227_v9 = vpop.permute.xlu0 %1226 }
 0x3b7   : > { %v1264_v12 = vsub.f32 %v3143_v61, %v1227_v9  ;;  %v1289_v9 = vld [vmem:[#allocation3 + $0x2] sm:$0x3] }
 0x3b8   : > { %v1274_v13 = vmul.f32 1.442695, %v1265_v8 }
 0x3b9   : > { %v1272_v22 = vmul.f32 1.442695, %v1264_v12 }
 0x3ba   : > { %2733 = vpow2.f32 %v1274_v13  ;;  %v1288_v13 = vld [vmem:[#allocation3] sm:$0x3] }
 0x3bb   : > { %2735 = vpow2.f32 %v1272_v22  ;;  %v1297_v22 = vmul.f32 %v3183_v36, %v1289_v9  ;;  %v1296_v50 = vmul.f32 %v3215_v62, %v1288_v13 }
 0x3c2   : > { %v1242_v23 = vpop.permute.xlu1 %1241 }
 0x3c3   : > { %v1267_v24 = vsub.f32 %v3151_v1, %v1242_v23 }
 0x3c4   : > { %v2734_v25 = vpop.eup %2733  ;;  %v1361_v5 = vpop.permute.xlu0 %1360 }
 0x3c5   : > { %v2736_v27 = vpop.eup %2735  ;;  %v1402_v26 = vpack.c.bf16 %v2734_v25, %v2734_v25  ;;  %v1278_v28 = vmul.f32 1.442695, %v1267_v24  ;;  %v1307_v6 = vsel %vm1167_vm1, %v2734_v25, 0.0  ;;  %v1291_v25 = vld [vmem:[#allocation3 + $0x6] sm:$0x3] }
 0x3c6   : > { %v1401_v14 = vpack.c.bf16 %v2736_v27, %v2736_v27  ;;  %v1237_v29 = vpop.permute.xlu1 %1236  ;;  %1308 = vadd.xlane.f32.xlu0 %v1307_v6  ;;  %v1304_v60 = vsel %vm1167_vm1, %v2736_v27, 0.0  ;;  %v1299_v27 = vmul.f32 %v3221_v2, %v1291_v25 }
 0x3c7   : > { %2737 = vpow2.f32 %v1278_v28  ;;  %v1266_v61 = vsub.f32 %v3149_v0, %v1237_v29  ;;  %2521 = vmatmul.mubr.msk.bf16.vlgmr.msra.gmra.mrb[16].mxu1 %vm1409_vm4, %v1402_v26  ;;  %1305 = vadd.xlane.f32.xlu1 %v1304_v60  ;;  %v1290_v28 = vld [vmem:[#allocation3 + $0x4] sm:$0x3]  ;;  %v1293_v29 = vld [vmem:[#allocation3 + $0xa] sm:$0x3] }
 0x3c8   : > { %2515 = vmatmul.mubr.msk.bf16.vlgmr.msra.gmra.mrb[16].mxu0 %vm1409_vm4, %v1401_v14  ;;  %2531 = vmatpush3.bf16.msra.mxu1 %v3101_v16  ;;  %v1298_v36 = vmul.f32 %v3218_v63, %v1290_v28  ;;  %v1301_v60 = vmul.f32 %v3211_v58, %v1293_v29 }
 0x3c9   : > { %v1276_v1 = vmul.f32 1.442695, %v1266_v61  ;;  %2525 = vmatpush3.bf16.msra.mxu0 %v3096_v15  ;;  %2532 = vmatprep.mubr.msk.bf16.mxu1 %vm2869_vm3, %v2868_v21 }
 0x3ca   : > { %v1252_v30 = vpop.permute.xlu1 %1251  ;;  %2542 = vmatprep.subr.bf16.mxu1 %v2868_v21  ;;  %2526 = vmatprep.mubr.msk.bf16.mxu0 %vm2869_vm3, %v2868_v21 }
 0x3cb   : > { %2739 = vpow2.f32 %v1276_v1  ;;  %v1269_v0 = vsub.f32 %v3157_v4, %v1252_v30  ;;  %2536 = vmatprep.subr.bf16.mxu0 %v2868_v21  ;;  %v1292_v1 = vld [vmem:[#allocation3 + $0x8] sm:$0x3] }
 0x3cc   : > { %v1300_v2 = vmul.f32 %v3224_v3, %v1292_v1 }
 0x3cd   : > { %v1282_v31 = vmul.f32 1.442695, %v1269_v0 }
 0x3ce   : > { %v1247_v32 = vpop.permute.xlu1 %1246 }
 0x3cf   : > { %2741 = vpow2.f32 %v1282_v31  ;;  %v1268_v16 = vsub.f32 %v3161_v7, %v1247_v32  ;;  %v1294_v31 = vld [vmem:[#allocation3 + $0xc] sm:$0x3] }
 0x3d1   : > { %v2738_v15 = vpop.eup %2737  ;;  %v1280_v33 = vmul.f32 1.442695, %v1268_v16 }
 0x3d2   : > { %v1257_v34 = vpop.permute.xlu1 %1256  ;;  %v1313_v35 = vsel %vm1167_vm1, %v2738_v15, 0.0  ;;  %v1404_v37 = vpack.c.bf16 %v2738_v15, %v2738_v15  ;;  %v1295_v15 = vld [vmem:[#allocation3 + $0xe] sm:$0x3] }
 0x3d3   : > { %2743 = vpow2.f32 %v1280_v33  ;;  %v1270_v38 = vsub.f32 %v3167_v11, %v1257_v34  ;;  %1314 = vadd.xlane.f32.xlu0 %v1313_v35 }
 0x3d4   : > { %2533 = vmatmul.mubr.msk.bf16.vlgmr.msra.gmra.mrb[20].mxu1 %vm1409_vm4, %v1404_v37  ;;  %v1346_v37 = vld [vmem:[#allocation4 + $0x2] sm:$0x3] }
 0x3d5   : > { %v2740_v4 = vpop.eup %2739  ;;  %v1284_v39 = vmul.f32 1.442695, %v1270_v38  ;;  %2543 = vmatpush3.bf16.msra.mxu1 %v3109_v18  ;;  %2544 = vmatprep.mubr.msk.bf16.mxu1 %vm2869_vm3, %v2868_v21  ;;  %v3281_v8 = vpop.permute.xlu0 %1380  ;;  %v1345_v38 = vld [vmem:[#allocation4] sm:$0x3] }
 0x3d6   : > { %v1262_v7 = vpop.permute.xlu1 %1261  ;;  %v1310_v40 = vsel %vm1167_vm1, %v2740_v4, 0.0  ;;  %v1403_v41 = vpack.c.bf16 %v2740_v4, %v2740_v4  ;;  %2554 = vmatprep.subr.bf16.mxu1 %v2868_v21  ;;  %v1394_v4 = vmul.f32 %v1361_v5, %v1346_v37 }
 0x3d7   : > { %2745 = vpow2.f32 %v1284_v39  ;;  %v1271_v42 = vsub.f32 %v3165_v10, %v1262_v7  ;;  %1311 = vadd.xlane.f32.xlu0 %v1310_v40 }
 0x3d8   : > { %2527 = vmatmul.mubr.msk.bf16.vlgmr.msra.gmra.mrb[20].mxu0 %vm1409_vm4, %v1403_v41 }
 0x3d9   : > { %v2742_v11 = vpop.eup %2741  ;;  %v1286_v43 = vmul.f32 1.442695, %v1271_v42  ;;  %2537 = vmatpush3.bf16.msra.mxu0 %v3104_v17  ;;  %2538 = vmatprep.mubr.msk.bf16.mxu0 %vm2869_vm3, %v2868_v21 }
 0x3da   : > { %v1319_v18 = vsel %vm1167_vm1, %v2742_v11, 0.0  ;;  %v1406_v46 = vpack.c.bf16 %v2742_v11, %v2742_v11  ;;  %2548 = vmatprep.subr.bf16.mxu0 %v2868_v21  ;;  %v1356_v45 = vpop.permute.xlu1 %1355 }
 0x3db   : > { %2747 = vpow2.f32 %v1286_v43  ;;  %1320 = vadd.xlane.f32.xlu0 %v1319_v18  ;;  %v1393_v3 = vmul.f32 %v1356_v45, %v1345_v38 }
 0x3dc   : > { %2545 = vmatmul.mubr.msk.bf16.vlgmr.msra.gmra.mrb[24].mxu1 %vm1409_vm4, %v1406_v46 }
 0x3dd   : > { %v2744_v10 = vpop.eup %2743  ;;  %2555 = vmatpush3.bf16.msra.mxu1 %v3117_v20  ;;  %2556 = vmatprep.mubr.msk.bf16.mxu1 %vm2869_vm3, %v2868_v21  ;;  %v1220_v20 = vmul.f32 1.442695, %v1206_v53 }
 0x3de   : > { %v1316_v17 = vsel %vm1167_vm1, %v2744_v10, 0.0  ;;  %v1405_v47 = vpack.c.bf16 %v2744_v10, %v2744_v10  ;;  %v3279_v51 = vpop.permute.xlu1 %1365 }
 0x3df   : > { %1317 = vadd.xlane.f32.xlu1 %v1316_v17  ;;  %2749 = vpow2.f32 %v1220_v20  ;;  %v1348_v17 = vld [vmem:[#allocation4 + $0x6] sm:$0x3] }
 0x3e0   : > { %2539 = vmatmul.mubr.msk.bf16.vlgmr.msra.gmra.mrb[24].mxu0 %vm1409_vm4, %v1405_v47 }
 0x3e1   : > { %v2746_v48 = vpop.eup %2745  ;;  %2549 = vmatpush3.bf16.msra.mxu0 %v3112_v19  ;;  %2550 = vmatprep.mubr.msk.bf16.mxu0 %vm2869_vm3, %v2868_v21  ;;  %v1222_v19 = vmul.f32 1.442695, %v1207_v52 }
 0x3e2   : > { %v1322_v49 = vsel %vm1167_vm1, %v2746_v48, 0.0  ;;  %v1407_v56 = vpack.c.bf16 %v2746_v48, %v2746_v48  ;;  %v1371_v53 = vpop.permute.xlu1 %1370  ;;  %v1347_v48 = vld [vmem:[#allocation4 + $0x4] sm:$0x3] }
 0x3e3   : > { %1323 = vadd.xlane.f32.xlu1 %v1322_v49  ;;  %2751 = vpow2.f32 %v1222_v19  ;;  %v1396_v47 = vmul.f32 %v1371_v53, %v1348_v17  ;;  %v1350_v19 = vld [vmem:[#allocation4 + $0xa] sm:$0x3] }
 0x3e4   : > { %v1398_v9 = vmul.f32 %v3281_v8, %v1350_v19  ;;  %v1352_v8 = vld [vmem:[#allocation4 + $0xe] sm:$0x3]  ;;  %v2767_v19 = vld [vmem:[%s3410_s5 + $0x70] sm:$0xff] (!%p2343_p1)  }
 0x3e5   : > { %v2748_v54 = vpop.eup %2747 }
 0x3e6   : > { %v1325_v55 = vsel %vm1167_vm1, %v2748_v54, 0.0  ;;  %v1408_v57 = vpack.c.bf16 %v2748_v54, %v2748_v54  ;;  %v3283_v12 = vpop.permute.xlu1 %1375 }
 0x3e7   : > { %1326 = vadd.xlane.f32.xlu0 %v1325_v55 }
 0x3e8   : > { %2551 = vmatmul.mubr.msk.bf16.vlgmr.msra.gmra.mrb[28].mxu0 %vm1409_vm4, %v1407_v56  ;;  %2557 = vmatmul.mubr.msk.bf16.vlgmr.msra.gmra.mrb[28].mxu1 %vm1409_vm4, %v1408_v57  ;;  %v1395_v56 = vmul.f32 %v3279_v51, %v1347_v48 }
 0x3e9   : > { %v2750_v21 = vpop.eup %2749 }
 0x3ea   : > { %v1302_v63 = vmul.f32 %v2750_v21, %v1294_v31 }
 0x3ed   : > { %v2752_v59 = vpop.eup %2751 }
 0x3ee   : > { %v1303_v34 = vmul.f32 %v2752_v59, %v1295_v15 }
 0x3f4   : > { %1385 = vperm.xlu1 %2664, %v2750_v21  }
 0x3fd   : > { %1390 = vperm.xlu0 %2663, %v2752_v59  }
 0x453   : > { %v1309_v44 = vpop.xlane.xlu0 %1308 }
 0x454   : > { %v1329_v52 = vadd.f32 %v1309_v44, %v1297_v22  ;;  %v1306_v23 = vpop.xlane.xlu1 %1305  ;;  %v1349_v22 = vld [vmem:[#allocation4 + $0x8] sm:$0x3] }
 0x455   : > { %v1328_v24 = vadd.f32 %v1306_v23, %v1296_v50  ;;  %v1397_v23 = vmul.f32 %v3283_v12, %v1349_v22 }
 0x456   : > { %1338 = vst.msk [vmem:[#allocation3 + $0x2] sm:$0x3] %vm1336_vm2, %v1329_v52 }
 0x457   : > { %1337 = vst.msk [vmem:[#allocation3] sm:$0x3] %vm1336_vm2, %v1328_v24 }
 0x45e   : > { %v1782_v15 = vld [vmem:[#allocation3] sm:$0x3] (!%p2343_p1) }
 0x460   : > { %v1315_v26 = vpop.xlane.xlu0 %1314 }
 0x461   : > { %v1331_v6 = vadd.f32 %v1315_v26, %v1299_v27 }
 0x463   : > { %1340 = vst.msk [vmem:[#allocation3 + $0x6] sm:$0x3] %vm1336_vm2, %v1331_v6  ;;  %v1351_v6 = vld [vmem:[#allocation4 + $0xc] sm:$0x3] }
 0x464   : > { %v1312_v14 = vpop.xlane.xlu0 %1311 }
 0x465   : > { %v1330_v62 = vadd.f32 %v1312_v14, %v1298_v36 }
 0x467   : > { %1339 = vst.msk [vmem:[#allocation3 + $0x4] sm:$0x3] %vm1336_vm2, %v1330_v62 }
 0x468   : > { %v1321_v61 = vpop.xlane.xlu0 %1320 }
 0x469   : > { %v1333_v30 = vadd.f32 %v1321_v61, %v1301_v60 }
 0x46b   : > { %1342 = vst.msk [vmem:[#allocation3 + $0xa] sm:$0x3] %vm1336_vm2, %v1333_v30 }
 0x46c   : > { %v1318_v0 = vpop.xlane.xlu1 %1317 }
 0x46d   : > { %v1332_v32 = vadd.f32 %v1318_v0, %v1300_v2 }
 0x46f   : > { %1341 = vst.msk [vmem:[#allocation3 + $0x8] sm:$0x3] %vm1336_vm2, %v1332_v32 }
 0x470   : > { %v1324_v16 = vpop.xlane.xlu1 %1323 }
 0x471   : > { %v1334_v33 = vadd.f32 %v1324_v16, %v1302_v63  ;;  %v1784_v16 = vld [vmem:[#allocation3 + $0x4] sm:$0x3] (!%p2343_p1) }
 0x472   : > { %2775 = vrcp.f32 (!%p2343_p1), %v1784_v16  ;;  %v1787_v37 = vld [vmem:[#allocation3 + $0xa] sm:$0x3] (!%p2343_p1) }
 0x473   : > { %1343 = vst.msk [vmem:[#allocation3 + $0xc] sm:$0x3] %vm1336_vm2, %v1334_v33  ;;  %v2755_v33 = vld [vmem:[%s3410_s5 + $0x40] sm:$0xff] (!%p2343_p1)   ;;  %2777 = vrcp.f32 (!%p2343_p1), %v1782_v15 }
 0x474   : > { %v1327_v58 = vpop.xlane.xlu0 %1326  ;;  %v1386_v36 = vpop.permute.xlu1 %1385  ;;  %2420 = vmatprep.subr.bf16.mxu0 (!%p2343_p1), %v2755_v33 }
 0x475   : > { %v1335_v35 = vadd.f32 %v1327_v58, %v1303_v34  ;;  %v1399_v29 = vmul.f32 %v1386_v36, %v1351_v6  ;;  %v2870_v34 = vmov (!%p2343_p1), 0   ;;  %v1785_v58 = vld [vmem:[#allocation3 + $0x6] sm:$0x3] (!%p2343_p1) }
 0x476   : > { %2754 = vset.pattern.permute.xlu1 (!%p2343_p1), %v2870_v34  ;;  %2753 = vset.pattern.permute.xlu0 (!%p2343_p1), %v2870_v34  ;;  %2779 = vrcp.f32 (!%p2343_p1), %v1785_v58  ;;  %v1786_v38 = vld [vmem:[#allocation3 + $0x8] sm:$0x3] (!%p2343_p1) }
 0x477   : > { %1344 = vst.msk [vmem:[#allocation3 + $0xe] sm:$0x3] %vm1336_vm2, %v1335_v35  ;;  %v1783_v35 = vld [vmem:[#allocation3 + $0x2] sm:$0x3] (!%p2343_p1) }
 0x478   : > { %2781 = vrcp.f32 (!%p2343_p1), %v1783_v35 }
 0x479   : > { %2783 = vrcp.f32 (!%p2343_p1), %v1787_v37 }
 0x47a   : > { %2785 = vrcp.f32 (!%p2343_p1), %v1786_v38 }
 0x47c   : > { %v1391_v14 = vpop.permute.xlu0 %1390 }
 0x47d   : > { %v1400_v62 = vmul.f32 %v1391_v14, %v1352_v8 }
 0x49a   : > { %v1490_v39 = vpop.f32.mrb[16].mxu1 }
 0x49b   : > { %v1755_v7 = vadd.f32 %v1490_v39, %v1394_v4  ;;  %v1447_v40 = vpop.f32.mrb[16].mxu0  ;;  %v2522_v41 = vpop.f32.mrb[17].mxu1  ;;  %v2756_v4 = vld [vmem:[%s3410_s5] sm:$0xff] (!%p2343_p1)   ;;  %v1789_v39 = vld [vmem:[#allocation3 + $0xe] sm:$0x3] (!%p2343_p1) }
 0x49c   : > { %v1754_v42 = vadd.f32 %v1447_v40, %v1393_v3  ;;  %v2516_v11 = vpop.f32.mrb[17].mxu0  ;;  %v1493_v43 = vpop.f32.mrb[18].mxu1  ;;  %v2757_v3 = vld [vmem:[%s3410_s5 + $0x48] sm:$0xff] (!%p2343_p1)   ;;  %2421 = vmatpush3.bf16.msra.mxu0 (!%p2343_p1), %v2756_v4  ;;  %v2759_v40 = vld [vmem:[%s3410_s5 + $0x50] sm:$0xff] (!%p2343_p1)   ;;  %v1788_v41 = vld [vmem:[#allocation3 + $0xc] sm:$0x3] (!%p2343_p1)  ;;  %2787 = vrcp.f32 (!%p2343_p1), %v1789_v39 }
 0x49d   : > { %1763 = vst [vmem:[#allocation4 + $0x2] sm:$0x3] %v1755_v7  ;;  %v1450_v18 = vpop.f32.mrb[18].mxu0  ;;  %v2523_v46 = vpop.f32.mrb[19].mxu1  ;;  %v2758_v7 = vld [vmem:[%s3410_s5 + $0x8] sm:$0xff] (!%p2343_p1)   ;;  %2422 = vmatprep.subr.bf16.mxu0 (!%p2343_p1), %v2757_v3  ;;  %2789 = vrcp.f32 (!%p2343_p1), %v1788_v41 }
 0x49e   : > { %1762 = vst [vmem:[#allocation4] sm:$0x3] %v1754_v42  ;;  %v2517_v10 = vpop.f32.mrb[19].mxu0  ;;  %v2760_v42 = vld [vmem:[%s3410_s5 + $0x10] sm:$0xff] (!%p2343_p1)   ;;  %v2776_v11 = vpop.eup (!%p2343_p1), %2775  ;;  %v2761_v18 = vld [vmem:[%s3410_s5 + $0x58] sm:$0xff] (!%p2343_p1)  }
 0x49f   : > { %v2778_v43 = vpop.eup (!%p2343_p1), %2777  ;;  %1818 = vperm.xlu1 (!%p2343_p1), %2754, %v2776_v11   ;;  %v2762_v10 = vld [vmem:[%s3410_s5 + $0x18] sm:$0xff] (!%p2343_p1)  }
 0x4a0   : > { %2423 = vmatpush3.bf16.msra.mxu0 (!%p2343_p1), %v2758_v7  ;;  %v2780_v46 = vpop.eup (!%p2343_p1), %2779  ;;  %1808 = vperm.xlu0 (!%p2343_p1), %2753, %v2778_v43  }
 0x4a1   : > { %2424 = vmatprep.subr.bf16.mxu0 (!%p2343_p1), %v2759_v40  ;;  %v2782_v17 = vpop.eup (!%p2343_p1), %2781 }
 0x4a2   : > { %v2784_v48 = vpop.eup (!%p2343_p1), %2783 }
 0x4a3   : > { %1823 = vperm.xlu1 (!%p2343_p1), %2754, %v2780_v46  }
 0x4a4   : > { %2425 = vmatpush3.bf16.msra.mxu0 (!%p2343_p1), %v2760_v42  ;;  %1813 = vperm.xlu0 (!%p2343_p1), %2753, %v2782_v17  }
 0x4a5   : > { %2426 = vmatprep.subr.bf16.mxu0 (!%p2343_p1), %v2761_v18 }
 0x4a7   : > { %v1576_v49 = vpop.f32.mrb[20].mxu1  ;;  %1833 = vperm.xlu1 (!%p2343_p1), %2754, %v2784_v48  }
 0x4a8   : > { %v1757_v54 = vadd.f32 %v1576_v49, %v1396_v47  ;;  %v2534_v20 = vpop.f32.mrb[21].mxu1  ;;  %v2763_v47 = vld [vmem:[%s3410_s5 + $0x60] sm:$0xff] (!%p2343_p1)   ;;  %v2786_v49 = vpop.eup (!%p2343_p1), %2785  ;;  %2427 = vmatpush3.bf16.msra.mxu0 (!%p2343_p1), %v2762_v10 }
 0x4a9   : > { %v1579_v55 = vpop.f32.mrb[22].mxu1  ;;  %2428 = vmatprep.subr.bf16.mxu0 (!%p2343_p1), %v2763_v47  ;;  %v2765_v20 = vld [vmem:[%s3410_s5 + $0x68] sm:$0xff] (!%p2343_p1)   ;;  %1828 = vperm.xlu0 (!%p2343_p1), %2753, %v2786_v49   ;;  %v2771_v49 = vld [vmem:[%s3412_s7] sm:$0xff] (!%p2343_p1)  }
 0x4aa   : > { %1765 = vst [vmem:[#allocation4 + $0x6] sm:$0x3] %v1757_v54  ;;  %v2535_v57 = vpop.f32.mrb[23].mxu1  ;;  %v2764_v54 = vld [vmem:[%s3410_s5 + $0x20] sm:$0xff] (!%p2343_p1)   ;;  %v2788_v55 = vpop.eup (!%p2343_p1), %2787 }
 0x4ab   : > { %v1533_v21 = vpop.f32.mrb[20].mxu0  ;;  %v2766_v57 = vld [vmem:[%s3410_s5 + $0x28] sm:$0xff] (!%p2343_p1)   ;;  %1843 = vperm.xlu1 (!%p2343_p1), %2754, %v2788_v55  }
 0x4ac   : > { %v1756_v59 = vadd.f32 %v1533_v21, %v1395_v56  ;;  %v2528_v45 = vpop.f32.mrb[21].mxu0  ;;  %v2790_v56 = vpop.eup (!%p2343_p1), %2789  ;;  %2429 = vmatpush3.bf16.msra.mxu0 (!%p2343_p1), %v2764_v54  ;;  %v2768_v21 = vld [vmem:[%s3410_s5 + $0x30] sm:$0xff] (!%p2343_p1)   ;;  %v2871_v54 = vmov (!%p2343_p1), 0.0  }
 0x4ad   : > { %v1536_v5 = vpop.f32.mrb[22].mxu0  ;;  %2430 = vmatprep.subr.bf16.mxu0 (!%p2343_p1), %v2765_v20  ;;  %1838 = vperm.xlu0 (!%p2343_p1), %2753, %v2790_v56   ;;  %v2770_v45 = vld [vmem:[%s3410_s5 + $0x38] sm:$0xff] (!%p2343_p1)   ;;  %v2772_v20 = vld [vmem:[%s3412_s7 + $0x8] sm:$0xff] (!%p2343_p1)   ;;  %v2344_v56 = vld [vmem:[%s3411_s6] ss:$0 sm:$0xff] (!%p2343_p1) }
 0x4ae   : > { %1764 = vst [vmem:[#allocation4 + $0x4] sm:$0x3] %v1756_v59  ;;  %v2529_v13 = vpop.f32.mrb[23].mxu0  ;;  %v2769_v59 = vld [vmem:[%s3410_s5 + $0x78] sm:$0xff] (!%p2343_p1)   ;;  %v1798_v5 = vld [vmem:[#allocation4] sm:$0x3] (!%p2343_p1)  ;;  %2560 = vmatprep.subr.bf16.mxu1 (!%p2343_p1), %v2871_v54  ;;  %2564 = vmatprep.mubr.msk.bf16.mxu1 (!%p2343_p1), %vm2872_vm12, %v2871_v54 }
 0x4af   : > { %v1662_v53 = vpop.f32.mrb[24].mxu1  ;;  %2561 = vmatpush3.bf16.msra.mxu1 (!%p2343_p1), %v2771_v49 }
 0x4b0   : > { %v1759_v44 = vadd.f32 %v1662_v53, %v1398_v9  ;;  %v2546_v50 = vpop.f32.mrb[25].mxu1  ;;  %2431 = vmatpush3.bf16.msra.mxu0 (!%p2343_p1), %v2766_v57  ;;  %2562 = vmatprep.subr.bf16.mxu1 (!%p2343_p1), %v2871_v54 }
 0x4b1   : > { %v1665_v52 = vpop.f32.mrb[26].mxu1  ;;  %2432 = vmatprep.subr.bf16.mxu0 (!%p2343_p1), %v2767_v19  ;;  %v1799_v50 = vld [vmem:[#allocation4 + $0x2] sm:$0x3] (!%p2343_p1) }
 0x4b2   : > { %1767 = vst [vmem:[#allocation4 + $0xa] sm:$0x3] %v1759_v44  ;;  %v2547_v51 = vpop.f32.mrb[27].mxu1  ;;  %v1801_v44 = vld [vmem:[#allocation4 + $0x6] sm:$0x3] (!%p2343_p1) }
 0x4b3   : > { %v1619_v24 = vpop.f32.mrb[24].mxu0  ;;  %2563 = vmatpush3.bf16.msra.mxu1 (!%p2343_p1), %v2772_v20 }
 0x4b4   : > { %v1758_v25 = vadd.f32 %v1619_v24, %v1397_v23  ;;  %v2540_v27 = vpop.f32.mrb[25].mxu0  ;;  %2433 = vmatpush3.bf16.msra.mxu0 (!%p2343_p1), %v2768_v21  ;;  %2568 = vmatprep.subr.bf16.mxu1 (!%p2343_p1), %v2871_v54 }
 0x4b5   : > { %v1622_v26 = vpop.f32.mrb[26].mxu0  ;;  %2434 = vmatprep.subr.bf16.mxu0 (!%p2343_p1), %v2769_v59  ;;  %v1800_v13 = vld [vmem:[#allocation4 + $0x4] sm:$0x3] (!%p2343_p1) }
 0x4b6   : > { %1766 = vst [vmem:[#allocation4 + $0x8] sm:$0x3] %v1758_v25  ;;  %v2541_v28 = vpop.f32.mrb[27].mxu0 }
 0x4b8   : > { %1781 = sbr.rel (%p2343_p1) target bundleno = 1988 (0x7c4), region = 76  ;;  %2435 = vmatpush3.bf16.msra.mxu0 (!%p2343_p1), %v2770_v45 }
 0x4b9   : > { %v1803_v26 = vld [vmem:[#allocation4 + $0xa] sm:$0x3] (!%p2343_p1) }
 0x4bb   : > { %v1705_v60 = vpop.f32.mrb[28].mxu0  ;;  %v1748_v61 = vpop.f32.mrb[28].mxu1 }
 0x4bc   : > { %v1760_v1 = vadd.f32 %v1705_v60, %v1399_v29  ;;  %v1761_v30 = vadd.f32 %v1748_v61, %v1400_v62  ;;  %v2552_v2 = vpop.f32.mrb[29].mxu0  ;;  %v2558_v12 = vpop.f32.mrb[29].mxu1 }
 0x4bd   : > { %v1708_v0 = vpop.f32.mrb[30].mxu0  ;;  %v1751_v31 = vpop.f32.mrb[30].mxu1  ;;  %v1802_v28 = vld [vmem:[#allocation4 + $0x8] sm:$0x3] (!%p2343_p1) }
 0x4be   : > { %1768 = vst [vmem:[#allocation4 + $0xc] sm:$0x3] %v1760_v1  ;;  %1769 = vst [vmem:[#allocation4 + $0xe] sm:$0x3] %v1761_v30  ;;  %v2553_v32 = vpop.f32.mrb[31].mxu0  ;;  %v2559_v63 = vpop.f32.mrb[31].mxu1 }
 0x4c5   : > { %v1805_v0 = vld [vmem:[#allocation4 + $0xe] sm:$0x3]  ;;  %v1804_v32 = vld [vmem:[#allocation4 + $0xc] sm:$0x3] }
 0x51e   : > { %v1819_v9 = vpop.permute.xlu1 %1818 }
 0x51f   : > { %v1809_v22 = vpop.permute.xlu0 %1808  ;;  %v1848_v52 = vmul.f32 %v1819_v9, %v1800_v13  ;;  %v2773_v9 = vld [vmem:[%s3414_s9] sm:$0xff]  }
 0x520   : > { %v1846_v53 = vmul.f32 %v1809_v22, %v1798_v5  ;;  %v2774_v22 = vld [vmem:[%s3414_s9 + $0x8] sm:$0xff]  }
 0x521   : > { %v1886_v6 = vrot.slane %v1848_v52, 7  ;;  %v1865_v29 = vrot.slane %v1848_v52, 6 }
 0x522   : > { %v1824_v23 = vpop.permute.xlu1 %1823  ;;  %v1884_v25 = vrot.slane %v1846_v53, 1 }
 0x523   : > { %v1849_v51 = vmul.f32 %v1824_v23, %v1801_v44  ;;  %v1814_v24 = vpop.permute.xlu0 %1813 }
 0x524   : > { %v1847_v27 = vmul.f32 %v1814_v24, %v1799_v50 }
 0x525   : > { %v1888_v62 = vrot.slane %v1849_v51, 6  ;;  %v1868_v1 = vrot.slane %v1849_v51, 5 }
 0x526   : > { %v1862_v36 = vrot.slane %v1847_v27, 7  ;;  %v1885_v8 = vsel %vm1863_vm5, %v1847_v27, %v1884_v25  ;;  %v1834_v14 = vpop.permute.xlu1 %1833  ;;  %v2365_v27 = vld [vmem:[%s3431_s30] ss:$0 sm:$0xff] }
 0x527   : > { %v1851_v60 = vmul.f32 %v1834_v14, %v1803_v26  ;;  %v1887_v2 = vsel %vm1866_vm6, %v1886_v6, %v1885_v8 }
 0x528   : > { %v1829_v61 = vpop.permute.xlu0 %1828  ;;  %v1864_v30 = vsel %vm1863_vm5, %v1862_v36, %v1846_v53  ;;  %v1889_v38 = vsel %vm1869_vm7, %v1888_v62, %v1887_v2  ;;  %v2361_v53 = vld [vmem:[%s3430_s23] ss:$0 sm:$0xff] }
 0x529   : > { %v1850_v12 = vmul.f32 %v1829_v61, %v1802_v28  ;;  %v1867_v31 = vsel %vm1866_vm6, %v1865_v29, %v1864_v30  ;;  %v1874_v34 = vrot.slane %v1851_v60, 3  ;;  %v1892_v58 = vrot.slane %v1851_v60, 4 }
 0x52a   : > { %v1870_v63 = vsel %vm1869_vm7, %v1868_v1, %v1867_v31  ;;  %v1844_v33 = vpop.permute.xlu1 %1843 }
 0x52b   : > { %v1871_v16 = vrot.slane %v1850_v12, 4  ;;  %v1890_v15 = vrot.slane %v1850_v12, 5  ;;  %v1853_v35 = vmul.f32 %v1844_v33, %v1805_v0 }
 0x52c   : > { %v1839_v37 = vpop.permute.xlu0 %1838 }
 0x52d   : > { %v1873_v4 = vsel %vm1872_vm8, %v1871_v16, %v1870_v63  ;;  %v1852_v3 = vmul.f32 %v1839_v37, %v1804_v32  ;;  %v1891_v39 = vsel %vm1872_vm8, %v1890_v15, %v1889_v38  ;;  %v1880_v7 = vrot.slane %v1853_v35, 1 }
 0x52e   : > { %v1896_v40 = vrot.slane %v1853_v35, 2  ;;  %v1893_v11 = vsel %vm1875_vm9, %v1892_v58, %v1891_v39  ;;  %v1876_v43 = vsel %vm1875_vm9, %v1874_v34, %v1873_v4 }
 0x52f   : > { %v1877_v41 = vrot.slane %v1852_v3, 2  ;;  %v1894_v42 = vrot.slane %v1852_v3, 3 }
 0x531   : > { %v1895_v18 = vsel %vm1878_vm10, %v1894_v42, %v1893_v11  ;;  %v1879_v46 = vsel %vm1878_vm10, %v1877_v41, %v1876_v43 }
 0x532   : > { %v1897_v10 = vsel %vm1881_vm11, %v1896_v40, %v1895_v18  ;;  %v1882_v17 = vsel %vm1881_vm11, %v1880_v7, %v1879_v46 }
 0x533   : > { %v1900_v47 = vpack.c.bf16 %v1897_v10, %v1897_v10  ;;  %v1899_v48 = vpack.c.bf16 %v1882_v17, %v1882_v17 }
 0x535   : > { %2068 = vmatprep.mubr.bf16.mxu0 %v1900_v47 }
 0x536   : > { %2069 = vmatmul.mubr.bf16.vlgmr.msra.gmra.mrb[0].mxu0 %v1899_v48 }
 0x609   : > { %v2436_v55 = vpop.f32.mrb[0].mxu0 }
 0x60a   : > { %v2437_v57 = vpop.f32.mrb[1].mxu0 }
 0x60b   : > { %v2438_v19 = vadd.f32 %v2437_v57, %v2436_v55  ;;  %v2439_v21 = vpop.f32.mrb[2].mxu0 }
 0x60c   : > { %v2440_v59 = vpop.f32.mrb[3].mxu0 }
 0x60d   : > { %v2071_v45 = vadd.f32 %v2438_v19, %v2344_v56 }
 0x60f   : > { %v2076_v5 = vmax.f32 %v2071_v45, 0.0 }
 0x611   : > { %v2077_v13 = vpack.c.bf16 %v2076_v5, %v2076_v5 }
 0x613   : > { %2565 = vmatmul.mubr.msk.bf16.vlgmr.msra.gmra.mrb[0].mxu1 %vm2101_vm13, %v2077_v13 }
 0x614   : > { %2569 = vmatpush3.bf16.msra.mxu1 %v2773_v9  ;;  %2572 = vmatprep.mubr.msk.bf16.mxu1 %vm2872_vm12, %v2871_v54 }
 0x615   : > { %2570 = vmatprep.subr.bf16.mxu1 %v2871_v54 }
 0x618   : > { %2571 = vmatpush3.bf16.msra.mxu1 %v2774_v22 }
 0x6e6   : > { %v2139_v44 = vpop.f32.mrb[0].mxu1 }
 0x6e7   : > { %v2140_v50 = vadd.f32 %v2361_v53, %v2139_v44  ;;  %v2566_v52 = vpop.f32.mrb[1].mxu1 }
 0x6e8   : > { %v2142_v23 = vpop.f32.mrb[2].mxu1 }
 0x6e9   : > { %v2145_v51 = vmax.f32 %v2140_v50, 0.0  ;;  %v2567_v24 = vpop.f32.mrb[3].mxu1 }
 0x6eb   : > { %v2146_v25 = vpack.c.bf16 %v2145_v51, %v2145_v51 }
 0x6ed   : > { %2573 = vmatmul.mubr.msk.bf16.vlgmr.msra.gmra.mrb[4].mxu1 %vm2101_vm13, %v2146_v25 }
 0x7c0   : > { %v2207_v26 = vpop.f32.mrb[4].mxu1 }
 0x7c1   : > { %v2208_v28 = vadd.f32 %v2365_v27, %v2207_v26  ;;  %v2574_v6 = vpop.f32.mrb[5].mxu1 }
 0x7c2   : > { %v2210_v36 = vpop.f32.mrb[6].mxu1 }
 0x7c3   : > { %2214 = vst.msk [vmem:[%s3036_s16] sm:$0xff] %vm2213_vm14, %v2208_v28  ;;  %v2575_v8 = vpop.f32.mrb[7].mxu1 }
 0x7c4 PF: > { %s24_s24 = sadd.s32 1, %s2857_s24   ;;  %s3432_s13 = sld [smem:[#allocation15_spill]] }
 0x7c5   : > { %p21_p2 = scmp.ge.s32.totalorder %s24_s24, 6   ;;  %s3433_s20 = sld [smem:[#allocation11_spill]] }
 0x7c6   : > { %s3434_s21 = sld [smem:[#allocation12_spill]]  ;;  %s3435_s22 = sld [smem:[#allocation13_spill]] }
 0x7c7   : > { %s3436_s23 = sld [smem:[#allocation14_spill]]  ;;  %s3437_s17 = smov %s2833_s18 }
 0x7c8   : > { %s3438_s18 = smov %s2837_s19  ;;  %23 = sbr.rel (!%p21_p2) target bundleno = 8 (0x8), region = 117 }
 0x7ca   : > { %s3439_s19 = smov %s3432_s13 }
 0x7cf   :  { %2234 = vsyncpa [#allocation6], 1 }
 0x7d0   :  { %2236 = vsyncpa [#allocation6 + $0x1], 1 }

// kernel: tpu_custom_call.1
= control target key start
LH: loop header
LB: loop body
LE: loop exit
PB: predicated region body
PF: predicated region fallthrough
CT: control target
= control target key end

     0   :  { %s3405_s0 = inlined_call_operand.hbm [shape: bf16[16,32,128], index: 0, kind: input, shape index: {}]   ;;  %s3406_s1 = inlined_call_operand.vmem [shape: bf16[128,128], index: 1, kind: input, shape index: {}]   ;;  %s3407_s2 = inlined_call_operand.vmem [shape: f32[1,128], index: 2, kind: input, shape index: {}]   ;;  %s3408_s3 = inlined_call_operand.vmem [shape: bf16[128,2], index: 3, kind: input, shape index: {}]   ;;  %s3409_s4 = inlined_call_operand.vmem [shape: f32[1,2], index: 4, kind: input, shape index: {}]   ;;  %s3410_s5 = inlined_call_operand.vmem [shape: bf16[256,32], index: 5, kind: input, shape index: {}]   ;;  %s3411_s6 = inlined_call_operand.vmem [shape: f32[1,32], index: 6, kind: input, shape index: {}]   ;;  %s3412_s7 = inlined_call_operand.vmem [shape: bf16[32,32], index: 7, kind: input, shape index: {}]   ;;  %s3413_s8 = inlined_call_operand.vmem [shape: f32[1,32], index: 8, kind: input, shape index: {}]   ;;  %s3414_s9 = inlined_call_operand.vmem [shape: bf16[32,3], index: 9, kind: input, shape index: {}]   ;;  %s3415_s10 = inlined_call_operand.vmem [shape: f32[1,3], index: 10, kind: input, shape index: {}]   ;;  %s3416_s11 = inlined_call_operand.vmem [shape: f32[16,3], index: 11, kind: output, shape index: {}]  }
   0x1   :  { %3421 = sst [smem:[#allocation16_spill]] %s3413_s8 }
   0x2   :  { %3422 = sst [smem:[#allocation17_spill]] %s3415_s10 }
   0x3   :  { %16 = vsyncpa [#allocation6], 0 }
   0x4   :  { %18 = vsyncpa [#allocation6 + $0x1], 0  ;;  %s2933_s17 = smov 0   ;;  %s2935_s18 = smov 0  }
   0x5   :  { %s2937_s19 = smov 0   ;;  %s2939_s20 = smov 0  }
   0x6   :  { %s2941_s21 = smov 0   ;;  %s2943_s22 = smov 0  }
   0x7   :  { %s2945_s23 = smov 0   ;;  %s2947_s24 = smov 0  }
   0x8 LB: > { %3423 = sst [smem:[#allocation11_spill]] %s2849_s22  ;;  %s33_s25 = sadd.s32 1, %s2849_s22  ;;  %s2857_s24 = sphi %s2947_s24, %s24_s24   ;;  %s2853_s23 = sphi %s2945_s23, %s3436_s23   ;;  %s2849_s22 = sphi %s2943_s22, %s3435_s22   ;;  %s2845_s21 = sphi %s2941_s21, %s3434_s21   ;;  %s2841_s20 = sphi %s2939_s20, %s3433_s20   ;;  %s2837_s19 = sphi %s2937_s19, %s3439_s19   ;;  %s2833_s18 = sphi %s2935_s18, %s3438_s18   ;;  %s2829_s17 = sphi %s2933_s17, %s3437_s17  }
   0x9   : > { %3424 = sst [smem:[#allocation12_spill]] %s2853_s23  ;;  %p34_p0 = scmp.ge.s32.totalorder %s33_s25, 2 }
   0xa   : > { %s36_s26 = sadd.s32 1, %s2853_s23  ;;  %s2294_s27 = sadd.s32 4294967295, %s2857_s24  }
   0xb   : > { %p52_p1 = scmp.ne.s32.totalorder %s2837_s19, %s2833_s18  ;;  %s3441_s25 = smov (%p34_p0, %s33_s25), 0 }
   0xc   : > { %3425 = sst [smem:[#allocation13_spill]] %s3441_s25  ;;  %s3443_s26 = smov (!%p34_p0, %s36_s26), %s2853_s23 }
   0xd   : > { %s41_s28 = ssub.s32 %s2849_s22, %s3441_s25  ;;  %p53_p2 = scmp.eq.s32.totalorder %s2857_s24, 0 }
   0xe   : > { %p38_p3 = scmp.ge.s32.totalorder %s3443_s26, 2  ;;  %p58_p4 = scmp.ne.s32.totalorder %s2833_s18, %s2829_s17 }
   0xf   : > { %p2983_p5 = por %p53_p2, %p52_p1  ;;  %p59_p6 = scmp.eq.s32.totalorder %s2294_s27, 0 }
  0x10   : > { %s3445_s26 = smov (%p38_p3, %s3443_s26), 0  ;;  %s45_s14 = sadd.s32 1, %s2837_s19 }
  0x11   : > { %3427 = sst [smem:[#allocation14_spill]] %s3445_s26  ;;  %p2989_p7 = por %p59_p6, %p58_p4 }
  0x12   : > { %s40_s12 = ssub.s32 %s2853_s23, %s3445_s26  ;;  %p2297_p9 = scmp.ge.s32.totalorder %s2857_s24, 4 }
  0x13   : > { %s42_s13 = sor.u32 %s41_s28, %s40_s12 }
  0x14   : > { %p43_p8 = scmp.eq.s32.totalorder %s42_s13, 0  ;;  %344 = sbr.rel (%p2297_p9) target bundleno = 43 (0x2b), region = 56 }
  0x16   : > { %s2997_s15 = scalar_select %p43_p8, %s2837_s19, %s45_s14  }
  0x18   : > { %3429 = sst [smem:[#allocation15_spill]] %s2997_s15 }
  0x1b   : > { %s348_s16 = sand.u32 1, %s2837_s19   ;;  %s2300_s17 = sshll.u32 %s2849_s22, 1 }
  0x1c   : > { %s2298_s27 = sshll.u32 %s348_s16, 6  ;;  %s2371_s26 = sshll.u32 %s2853_s23, 5 }
  0x1d   : > { %s359_s28 = sadd.s32 %s2371_s26, %s2300_s17  ;;  %s352_s12 = scalar_lea.vmem [#allocation5], %s2298_s27 }
  0x1e   : > { %s374_s13 = sshll.u32 %s352_s12, 4  ;;  %s2302_s14 = sshll.u32 %s359_s28, 6  ;;  %s375_s13 = int_to_ptr.vmem [resolvable:$true] %s374_s13 }
  0x1f   : > { %s2576_s25 = scalar_select %p2983_p5, [#allocation0], [#allocation9] }
  0x20   : > { %s2859_s15 = smov 256   ;;  %s2860_s8 = smov 128  }
  0x21   : > { %2577 = sst [smem:[#allocation8]] (%p2983_p5), %s2859_s15  ;;  %s2861_s22 = smov 2  }
  0x22   : > { %s366_s10 = sld [smem:[%s2576_s25]]   ;;  %s2862_s26 = smov 64  }
  0x23   : > { %2578 = sst [smem:[#allocation8 + $0x1]] (%p2983_p5), %s2860_s8  ;;  %s361_s28 = scalar_lea.hbm %s3405_s0, %s2302_s14 }
  0x24   : > { %2579 = sst [smem:[#allocation8 + $0x2]] (%p2983_p5), %s2861_s22  ;;  %s2863_s12 = smov 4  }
  0x25   : > { %2580 = sst [smem:[#allocation8 + $0x3]] (%p2983_p5), %s2862_s26  ;;  %s349_s23 = scalar_lea.sflag [#allocation6], %s348_s16 }
  0x26   : > { %2581 = sst [smem:[#allocation8 + $0x4]] (%p2983_p5), %s2862_s26  ;;  %s2864_s8 = smov [#allocation7]  }
  0x27   : > { %2582 = sst [smem:[#allocation8 + $0x5]] (%p2983_p5), %s2863_s12 }
  0x28   : > { %s2303_s25 = sshll.u32 %s366_s10, 26 }
  0x29   : > { %s2304_s15 = sadd.s32 134217728, %s2303_s25 }
  0x2a   : > { %2583 = dma.general (%p2983_p5), %s361_s28, 1024, %s375_s13, %s349_s23, %s2864_s8, [#allocation8], %s2304_s15, 0  }
  0x2b PF: > { %p2305_p10 = scmp.ge.s32.totalorder %s2857_s24, 1  ;;  %p395_p11 = scmp.lt.s32.totalorder %s2857_s24, 5 }
  0x2d   : > { %p396_p12 = pnand %p2305_p10, %p395_p11 }
  0x2e   : > { %s401_s22 = sand.u32 (!%p396_p12), 1, %s2833_s18  }
  0x2f   : > { %399 = sbr.rel (%p396_p12) target bundleno = 1988 (0x7c4), region = 64  ;;  %s2306_s14 = sshll.u32 (!%p396_p12), %s401_s22, 6 }
  0x30   : > { %s402_s26 = scalar_lea.sflag (!%p396_p12), [#allocation6], %s401_s22  ;;  %s3025_s17 = scalar_lea.vmem (!%p396_p12), [#allocation5], %s2306_s14 }
  0x36   : > { %2824 = dma.done.wait (%p2989_p7), %s402_s26, 1024  }
  0x37   : > { %2826 = vsyncadd (%p2989_p7), %s402_s26, 4294966272  ;;  %p445_p13 = scmp.lt.s32.totalorder %s2845_s21, 1  ;;  %p2308_p0 = scmp.ne.s32.totalorder %s2841_s20, 0 }
  0x38   : > { %vm454_vm0 = vcmask (!%p2308_p0), 1024   ;;  %v2865_v0 = vmov (!%p2308_p0), -inf   ;;  %v2866_v1 = vmov (!%p2308_p0), 0.0  }
  0x39   : > { %s3447_s21 = smov (!%p445_p13, %s2845_s21), 1  ;;  %453 = sbr.rel (%p2308_p0) target bundleno = 70 (0x46), region = 72 }
  0x3a   : > { %s2307_s10 = sshll.u32 %s3447_s21, 3  ;;  %455 = vst.msk [vmem:[#allocation2] sm:$0x3] (!%p2308_p0), %vm454_vm0, %v2865_v0  ;;  %456 = vst.msk [vmem:[#allocation2 + $0x2] sm:$0x3] (!%p2308_p0), %vm454_vm0, %v2865_v0 }
  0x3b   : > { %s3036_s16 = scalar_lea.vmem %s3416_s11, %s2307_s10  ;;  %457 = vst.msk [vmem:[#allocation2 + $0x4] sm:$0x3] (!%p2308_p0), %vm454_vm0, %v2865_v0  ;;  %458 = vst.msk [vmem:[#allocation2 + $0x6] sm:$0x3] (!%p2308_p0), %vm454_vm0, %v2865_v0 }
  0x3c   : > { %459 = vst.msk [vmem:[#allocation2 + $0x8] sm:$0x3] (!%p2308_p0), %vm454_vm0, %v2865_v0  ;;  %460 = vst.msk [vmem:[#allocation2 + $0xa] sm:$0x3] (!%p2308_p0), %vm454_vm0, %v2865_v0 }
  0x3d   : > { %461 = vst.msk [vmem:[#allocation2 + $0xc] sm:$0x3] (!%p2308_p0), %vm454_vm0, %v2865_v0  ;;  %462 = vst.msk [vmem:[#allocation2 + $0xe] sm:$0x3] (!%p2308_p0), %vm454_vm0, %v2865_v0 }
  0x3e   : > { %463 = vst.msk [vmem:[#allocation3] sm:$0x3] (!%p2308_p0), %vm454_vm0, %v2866_v1  ;;  %464 = vst.msk [vmem:[#allocation3 + $0x2] sm:$0x3] (!%p2308_p0), %vm454_vm0, %v2866_v1 }
  0x3f   : > { %465 = vst.msk [vmem:[#allocation3 + $0x4] sm:$0x3] (!%p2308_p0), %vm454_vm0, %v2866_v1  ;;  %466 = vst.msk [vmem:[#allocation3 + $0x6] sm:$0x3] (!%p2308_p0), %vm454_vm0, %v2866_v1 }
  0x40   : > { %467 = vst.msk [vmem:[#allocation3 + $0x8] sm:$0x3] %vm454_vm0, %v2866_v1  ;;  %468 = vst.msk [vmem:[#allocation3 + $0xa] sm:$0x3] %vm454_vm0, %v2866_v1 }
  0x41   : > { %469 = vst.msk [vmem:[#allocation3 + $0xc] sm:$0x3] %vm454_vm0, %v2866_v1  ;;  %470 = vst.msk [vmem:[#allocation3 + $0xe] sm:$0x3] %vm454_vm0, %v2866_v1 }
  0x42   : > { %471 = vst [vmem:[#allocation4] sm:$0x3] %v2866_v1  ;;  %472 = vst [vmem:[#allocation4 + $0x2] sm:$0x3] %v2866_v1 }
  0x43   : > { %473 = vst [vmem:[#allocation4 + $0x4] sm:$0x3] %v2866_v1  ;;  %474 = vst [vmem:[#allocation4 + $0x6] sm:$0x3] %v2866_v1 }
  0x44   : > { %475 = vst [vmem:[#allocation4 + $0x8] sm:$0x3] %v2866_v1  ;;  %476 = vst [vmem:[#allocation4 + $0xa] sm:$0x3] %v2866_v1 }
  0x45   : > { %477 = vst [vmem:[#allocation4 + $0xc] sm:$0x3] %v2866_v1  ;;  %478 = vst [vmem:[#allocation4 + $0xe] sm:$0x3] %v2866_v1 }
  0x46 PF: > { %v2665_v2 = vld [vmem:[%s3406_s1] sm:$0xff]   ;;  %v2666_v3 = vld [vmem:[%s3406_s1 + $0x8] sm:$0xff]   ;;  %v2667_v4 = vld [vmem:[%s3406_s1 + $0x10] sm:$0xff]   ;;  %vm1167_vm1 = vcmask 123904   ;;  %vm1336_vm2 = vcmask 1024   ;;  %vm2869_vm3 = vmmov 0  }
  0x47   : > { %2448 = vmatprep.subr.bf16.mxu0 %v2665_v2  ;;  %v2668_v5 = vld [vmem:[%s3406_s1 + $0x18] sm:$0xff]   ;;  %v3068_v6 = vld [vmem:[%s3025_s17] sm:$0xff]   ;;  %v2669_v7 = vld [vmem:[%s3406_s1 + $0x20] sm:$0xff]   ;;  %vm1409_vm4 = vcmask 130048   ;;  %p2343_p1 = scmp.ne.s32.totalorder %s2841_s20, 1 }
  0x48   : > { %2449 = vmatpush3.bf16.msra.mxu0 %v2665_v2  ;;  %2464 = vmatprep.mubr.bf16.mxu0 %v3068_v6  ;;  %v2670_v8 = vld [vmem:[%s3406_s1 + $0x28] sm:$0xff]   ;;  %v2681_v9 = vld [vmem:[%s3408_s3] sm:$0xff]   ;;  %v2671_v11 = vld [vmem:[%s3406_s1 + $0x30] sm:$0xff]   ;;  %vm1863_vm5 = vcmask (!%p2343_p1), 1041409   ;;  %vm1866_vm6 = vcmask (!%p2343_p1), 1042434   ;;  %vm1869_vm7 = vcmask (!%p2343_p1), 1043459  }
  0x49   : > { %2450 = vmatprep.subr.bf16.mxu0 %v2666_v3  ;;  %v2682_v10 = vld [vmem:[%s3408_s3 + $0x8] sm:$0xff]   ;;  %2480 = vmatprep.subr.bf16.mxu1 %v2681_v9  ;;  %v2683_v12 = vld [vmem:[%s3408_s3 + $0x10] sm:$0xff]   ;;  %v2672_v13 = vld [vmem:[%s3406_s1 + $0x38] sm:$0xff]   ;;  %vm1872_vm8 = vcmask (!%p2343_p1), 1044484   ;;  %vm1875_vm9 = vcmask (!%p2343_p1), 1045509   ;;  %vm1878_vm10 = vcmask (!%p2343_p1), 1046534  }
  0x4a   : > { %2481 = vmatpush3.bf16.msra.mxu1 %v2681_v9  ;;  %v3093_v14 = vld [vmem:[%s3025_s17 + $0x8] sm:$0xff]   ;;  %v3096_v15 = vld [vmem:[%s3025_s17 + $0x10] sm:$0xff]   ;;  %v3101_v16 = vld [vmem:[%s3025_s17 + $0x18] sm:$0xff]   ;;  %vm1881_vm11 = vcmask (!%p2343_p1), 1047559   ;;  %vm2872_vm12 = vmmov (!%p2343_p1), 0   ;;  %vm2101_vm13 = vcmask (!%p2343_p1), 261120  }
  0x4b   : > { %2482 = vmatprep.subr.bf16.mxu1 %v2682_v10  ;;  %v3104_v17 = vld [vmem:[%s3025_s17 + $0x20] sm:$0xff]   ;;  %v3109_v18 = vld [vmem:[%s3025_s17 + $0x28] sm:$0xff]   ;;  %v3112_v19 = vld [vmem:[%s3025_s17 + $0x30] sm:$0xff]   ;;  %s3430_s23 = sld [smem:[#allocation16_spill]] (!%p2343_p1)  ;;  %s3431_s30 = sld [smem:[#allocation17_spill]] (!%p2343_p1)  ;;  %vm2213_vm14 = vcmask (!%p2343_p1), 23552  }
  0x4c   : > { %2451 = vmatpush3.bf16.msra.mxu0 %v2666_v3  ;;  %v3117_v20 = vld [vmem:[%s3025_s17 + $0x38] sm:$0xff]   ;;  %v2684_v21 = vld [vmem:[%s3408_s3 + $0x18] sm:$0xff]   ;;  %v2685_v22 = vld [vmem:[%s3408_s3 + $0x20] sm:$0xff]  }
  0x4d   : > { %2452 = vmatprep.subr.bf16.mxu0 %v2667_v4  ;;  %v2686_v23 = vld [vmem:[%s3408_s3 + $0x28] sm:$0xff]   ;;  %v2687_v24 = vld [vmem:[%s3408_s3 + $0x30] sm:$0xff]   ;;  %v2688_v25 = vld [vmem:[%s3408_s3 + $0x38] sm:$0xff]  }
  0x4e   : > { %2483 = vmatpush3.bf16.msra.mxu1 %v2682_v10  ;;  %v2309_v26 = vld [vmem:[%s3407_s2] ss:$0 sm:$0xff] }
  0x4f   : > { %2484 = vmatprep.subr.bf16.mxu1 %v2683_v12 }
  0x50   : > { %2453 = vmatpush3.bf16.msra.mxu0 %v2667_v4 }
  0x51   : > { %2454 = vmatprep.subr.bf16.mxu0 %v2668_v5 }
  0x52   : > { %2485 = vmatpush3.bf16.msra.mxu1 %v2683_v12 }
  0x53   : > { %2486 = vmatprep.subr.bf16.mxu1 %v2684_v21 }
  0x54   : > { %2455 = vmatpush3.bf16.msra.mxu0 %v2668_v5 }
  0x55   : > { %2456 = vmatprep.subr.bf16.mxu0 %v2669_v7 }
  0x56   : > { %2487 = vmatpush3.bf16.msra.mxu1 %v2684_v21 }
  0x57   : > { %2488 = vmatprep.subr.bf16.mxu1 %v2685_v22 }
  0x58   : > { %2457 = vmatpush3.bf16.msra.mxu0 %v2669_v7 }
  0x59   : > { %2458 = vmatprep.subr.bf16.mxu0 %v2670_v8 }
  0x5a   : > { %2489 = vmatpush3.bf16.msra.mxu1 %v2685_v22 }
  0x5b   : > { %2490 = vmatprep.subr.bf16.mxu1 %v2686_v23 }
  0x5c   : > { %2459 = vmatpush3.bf16.msra.mxu0 %v2670_v8 }
  0x5d   : > { %2460 = vmatprep.subr.bf16.mxu0 %v2671_v11 }
  0x5e   : > { %2491 = vmatpush3.bf16.msra.mxu1 %v2686_v23 }
  0x5f   : > { %2492 = vmatprep.subr.bf16.mxu1 %v2687_v24 }
  0x60   : > { %2461 = vmatpush3.bf16.msra.mxu0 %v2671_v11 }
  0x61   : > { %2462 = vmatprep.subr.bf16.mxu0 %v2672_v13 }
  0x62   : > { %2493 = vmatpush3.bf16.msra.mxu1 %v2687_v24 }
  0x63   : > { %2494 = vmatprep.subr.bf16.mxu1 %v2688_v25 }
  0x64   : > { %2463 = vmatpush3.bf16.msra.mxu0 %v2672_v13 }
  0x66   : > { %2495 = vmatpush3.bf16.msra.mxu1 %v2688_v25 }
  0x67   : > { %2465 = vmatmul.mubr.bf16.vlgmr.msra.gmra.mrb[0].mxu0 %v3093_v14 }
  0x68   : > { %2468 = vmatprep.mubr.bf16.mxu0 %v3096_v15 }
  0x6f   : > { %2469 = vmatmul.mubr.bf16.gmra.mrb[4].mxu0 %v3101_v16 }
  0x70   : > { %2472 = vmatprep.mubr.bf16.mxu0 %v3104_v17 }
  0x77   : > { %2473 = vmatmul.mubr.bf16.gmra.mrb[8].mxu0 %v3109_v18 }
  0x78   : > { %2476 = vmatprep.mubr.bf16.mxu0 %v3112_v19 }
  0x7f   : > { %2477 = vmatmul.mubr.bf16.gmra.mrb[12].mxu0 %v3117_v20 }
 0x13a   : > { %v2466_v27 = vpop.f32.mrb[0].mxu0 }
 0x13b   : > { %v657_v28 = vadd.f32 %v2466_v27, %v2309_v26  ;;  %v648_v29 = vpop.f32.mrb[1].mxu0 }
 0x13c   : > { %v649_v30 = vadd.f32 %v2309_v26, %v648_v29  ;;  %v2467_v31 = vpop.f32.mrb[2].mxu0 }
 0x13d   : > { %2689 = vtanh.f32 %v657_v28  ;;  %v660_v32 = vadd.f32 %v2467_v31, %v2309_v26  ;;  %v651_v33 = vpop.f32.mrb[3].mxu0 }
 0x13e   : > { %2691 = vtanh.f32 %v649_v30  ;;  %v652_v34 = vadd.f32 %v2309_v26, %v651_v33 }
 0x13f   : > { %2693 = vtanh.f32 %v660_v32 }
 0x140   : > { %2695 = vtanh.f32 %v652_v34 }
 0x142   : > { %v2470_v35 = vpop.f32.mrb[4].mxu0 }
 0x143   : > { %v673_v36 = vadd.f32 %v2470_v35, %v2309_v26  ;;  %v664_v37 = vpop.f32.mrb[5].mxu0 }
 0x144   : > { %v665_v38 = vadd.f32 %v2309_v26, %v664_v37  ;;  %v2471_v39 = vpop.f32.mrb[6].mxu0 }
 0x145   : > { %2697 = vtanh.f32 %v673_v36  ;;  %v676_v40 = vadd.f32 %v2471_v39, %v2309_v26  ;;  %v667_v41 = vpop.f32.mrb[7].mxu0 }
 0x146   : > { %2699 = vtanh.f32 %v665_v38  ;;  %v668_v42 = vadd.f32 %v2309_v26, %v667_v41 }
 0x147   : > { %v2690_v43 = vpop.eup %2689  ;;  %2701 = vtanh.f32 %v676_v40 }
 0x148   : > { %v2692_v44 = vpop.eup %2691  ;;  %2703 = vtanh.f32 %v668_v42 }
 0x149   : > { %v2694_v45 = vpop.eup %2693 }
 0x14a   : > { %v2696_v46 = vpop.eup %2695  ;;  %v2474_v47 = vpop.f32.mrb[8].mxu0  ;;  %v728_v48 = vpack.c.bf16 %v2694_v45, %v2690_v43 }
 0x14b   : > { %v689_v49 = vadd.f32 %v2474_v47, %v2309_v26  ;;  %v680_v50 = vpop.f32.mrb[9].mxu0  ;;  %v727_v51 = vpack.c.bf16 %v2696_v46, %v2692_v44 }
 0x14c   : > { %v681_v52 = vadd.f32 %v2309_v26, %v680_v50  ;;  %v2475_v53 = vpop.f32.mrb[10].mxu0 }
 0x14d   : > { %2705 = vtanh.f32 %v689_v49  ;;  %v692_v54 = vadd.f32 %v2475_v53, %v2309_v26  ;;  %v683_v55 = vpop.f32.mrb[11].mxu0  ;;  %2496 = vmatprep.mubr.bf16.mxu1 %v727_v51 }
 0x14e   : > { %2707 = vtanh.f32 %v681_v52  ;;  %v684_v56 = vadd.f32 %v2309_v26, %v683_v55  ;;  %2497 = vmatmul.mubr.bf16.vlgmr.msra.gmra.mrb[0].mxu1 %v728_v48 }
 0x14f   : > { %v2698_v57 = vpop.eup %2697  ;;  %2709 = vtanh.f32 %v692_v54 }
 0x150   : > { %v2700_v58 = vpop.eup %2699  ;;  %2711 = vtanh.f32 %v684_v56 }
 0x151   : > { %v2702_v59 = vpop.eup %2701 }
 0x152   : > { %v2704_v60 = vpop.eup %2703  ;;  %v2478_v61 = vpop.f32.mrb[12].mxu0  ;;  %v730_v62 = vpack.c.bf16 %v2702_v59, %v2698_v57 }
 0x153   : > { %v705_v63 = vadd.f32 %v2478_v61, %v2309_v26  ;;  %v696_v0 = vpop.f32.mrb[13].mxu0  ;;  %v729_v1 = vpack.c.bf16 %v2704_v60, %v2700_v58 }
 0x154   : > { %v697_v2 = vadd.f32 %v2309_v26, %v696_v0  ;;  %v2479_v3 = vpop.f32.mrb[14].mxu0 }
 0x155   : > { %2713 = vtanh.f32 %v705_v63  ;;  %v708_v4 = vadd.f32 %v2479_v3, %v2309_v26  ;;  %v699_v5 = vpop.f32.mrb[15].mxu0  ;;  %2500 = vmatprep.mubr.bf16.mxu1 %v729_v1 }
 0x156   : > { %2715 = vtanh.f32 %v697_v2  ;;  %v700_v7 = vadd.f32 %v2309_v26, %v699_v5  ;;  %2501 = vmatmul.mubr.bf16.gmra.mrb[4].mxu1 %v730_v62  ;;  %v2326_v26 = vld [vmem:[%s3409_s4] ss:$0 sm:$0xff] }
 0x157   : > { %v2706_v8 = vpop.eup %2705  ;;  %2717 = vtanh.f32 %v708_v4 }
 0x158   : > { %v2708_v9 = vpop.eup %2707  ;;  %2719 = vtanh.f32 %v700_v7 }
 0x159   : > { %v2710_v10 = vpop.eup %2709 }
 0x15a   : > { %v2712_v11 = vpop.eup %2711  ;;  %v732_v12 = vpack.c.bf16 %v2710_v10, %v2706_v8  ;;  %v2867_v8 = vmov 0  }
 0x15b   : > { %v731_v13 = vpack.c.bf16 %v2712_v11, %v2708_v9 }
 0x15d   : > { %2504 = vmatprep.mubr.bf16.mxu1 %v731_v13 }
 0x15e   : > { %2505 = vmatmul.mubr.bf16.gmra.mrb[8].mxu1 %v732_v12 }
 0x15f   : > { %v2714_v21 = vpop.eup %2713 }
 0x160   : > { %v2716_v22 = vpop.eup %2715 }
 0x161   : > { %v2718_v23 = vpop.eup %2717 }
 0x162   : > { %v2720_v24 = vpop.eup %2719  ;;  %v734_v25 = vpack.c.bf16 %v2718_v23, %v2714_v21  ;;  %v2868_v21 = vmov 0.0   ;;  %v1159_v23 = vld [vmem:[#allocation2] sm:$0x3] }
 0x163   : > { %v733_v27 = vpack.c.bf16 %v2720_v24, %v2716_v22  ;;  %2512 = vmatprep.subr.bf16.mxu0 %v2868_v21  ;;  %2518 = vmatprep.subr.bf16.mxu1 %v2868_v21  ;;  %v1160_v22 = vld [vmem:[#allocation2 + $0x2] sm:$0x3] }
 0x164   : > { %2513 = vmatpush3.bf16.msra.mxu0 %v3068_v6  ;;  %2519 = vmatpush3.bf16.msra.mxu1 %v3093_v14  ;;  %v1161_v14 = vld [vmem:[#allocation2 + $0x4] sm:$0x3] }
 0x165   : > { %2508 = vmatprep.mubr.bf16.mxu1 %v733_v27  ;;  %2524 = vmatprep.subr.bf16.mxu0 %v2868_v21 }
 0x166   : > { %2509 = vmatmul.mubr.bf16.gmra.mrb[12].mxu1 %v734_v25  ;;  %2530 = vmatprep.subr.bf16.mxu1 %v2868_v21 }
 0x167   : > { %2520 = vmatprep.mubr.msk.bf16.mxu1 %vm2869_vm3, %v2868_v21  ;;  %2514 = vmatprep.mubr.msk.bf16.mxu0 %vm2869_vm3, %v2868_v21 }
 0x221   : > { %v2498_v28 = vpop.f32.mrb[0].mxu1 }
 0x222   : > { %v840_v29 = vpop.f32.mrb[1].mxu1  ;;  %v849_v30 = vadd.f32 %v2498_v28, %v2326_v26 }
 0x223   : > { %v2499_v31 = vpop.f32.mrb[2].mxu1  ;;  %v841_v32 = vadd.f32 %v2326_v26, %v840_v29 }
 0x224   : > { %935 = vxpose.xlu1.b32.start [1/2] (short) (narrow) %v849_v30, 8  ;;  %v843_v33 = vpop.f32.mrb[3].mxu1  ;;  %v852_v34 = vadd.f32 %v2499_v31, %v2326_v26  ;;  %v1162_v31 = vld [vmem:[#allocation2 + $0x6] sm:$0x3] }
 0x225   : > { %903 = vxpose.xlu0.b32.start [1/2] (short) (narrow) %v841_v32, 8  ;;  %v844_v35 = vadd.f32 %v2326_v26, %v843_v33 }
 0x228   : > { %936 = vxpose.xlu1.b32.end [2/2] (short) (narrow) %v852_v34, 8  ;;  %v1164_v34 = vld [vmem:[#allocation2 + $0xa] sm:$0x3] }
 0x229   : > { %v2502_v36 = vpop.f32.mrb[4].mxu1  ;;  %904 = vxpose.xlu0.b32.end [2/2] (short) (narrow) %v844_v35, 8  ;;  %v1163_v35 = vld [vmem:[#allocation2 + $0x8] sm:$0x3] }
 0x22a   : > { %v865_v37 = vadd.f32 %v2502_v36, %v2326_v26  ;;  %v856_v38 = vpop.f32.mrb[5].mxu1 }
 0x22b   : > { %v857_v39 = vadd.f32 %v2326_v26, %v856_v38  ;;  %v2503_v40 = vpop.f32.mrb[6].mxu1 }
 0x22c   : > { %999 = vxpose.xlu1.b32.start [1/2] (short) (narrow) %v865_v37, 8  ;;  %v859_v41 = vpop.f32.mrb[7].mxu1  ;;  %v868_v42 = vadd.f32 %v2503_v40, %v2326_v26 }
 0x22d   : > { %967 = vxpose.xlu0.b32.start [1/2] (short) (narrow) %v857_v39, 8  ;;  %v860_v43 = vadd.f32 %v2326_v26, %v859_v41 }
 0x230   : > { %1000 = vxpose.xlu1.b32.end [2/2] (short) (narrow) %v868_v42, 8 }
 0x231   : > { %v2506_v44 = vpop.f32.mrb[8].mxu1  ;;  %968 = vxpose.xlu0.b32.end [2/2] (short) (narrow) %v860_v43, 8 }
 0x232   : > { %v881_v45 = vadd.f32 %v2506_v44, %v2326_v26  ;;  %v872_v46 = vpop.f32.mrb[9].mxu1  ;;  %v3192_v44 = vld [vmem:[#allocation2 + $0xe] sm:$0x3] }
 0x233   : > { %v873_v47 = vadd.f32 %v2326_v26, %v872_v46  ;;  %v2507_v48 = vpop.f32.mrb[10].mxu1 }
 0x234   : > { %1063 = vxpose.xlu1.b32.start [1/2] (short) (narrow) %v881_v45, 8  ;;  %v875_v49 = vpop.f32.mrb[11].mxu1  ;;  %v884_v50 = vadd.f32 %v2507_v48, %v2326_v26  ;;  %v3194_v45 = vld [vmem:[#allocation2 + $0xc] sm:$0x3] }
 0x235   : > { %1031 = vxpose.xlu0.b32.start [1/2] (short) (narrow) %v873_v47, 8  ;;  %v876_v51 = vadd.f32 %v2326_v26, %v875_v49 }
 0x238   : > { %1064 = vxpose.xlu1.b32.end [2/2] (short) (narrow) %v884_v50, 8 }
 0x239   : > { %v2510_v52 = vpop.f32.mrb[12].mxu1  ;;  %1032 = vxpose.xlu0.b32.end [2/2] (short) (narrow) %v876_v51, 8 }
 0x23a   : > { %v897_v53 = vadd.f32 %v2510_v52, %v2326_v26  ;;  %v888_v54 = vpop.f32.mrb[13].mxu1 }
 0x23b   : > { %v889_v55 = vadd.f32 %v2326_v26, %v888_v54  ;;  %v2511_v56 = vpop.f32.mrb[14].mxu1 }
 0x23c   : > { %1127 = vxpose.xlu1.b32.start [1/2] (short) (narrow) %v897_v53, 8  ;;  %v891_v57 = vpop.f32.mrb[15].mxu1  ;;  %v900_v58 = vadd.f32 %v2511_v56, %v2326_v26 }
 0x23d   : > { %1095 = vxpose.xlu0.b32.start [1/2] (short) (narrow) %v889_v55, 8  ;;  %v892_v59 = vadd.f32 %v2326_v26, %v891_v57 }
 0x240   : > { %1128 = vxpose.xlu1.b32.end [2/2] (short) (narrow) %v900_v58, 8 }
 0x241   : > { %1096 = vxpose.xlu0.b32.end [2/2] (short) (narrow) %v892_v59, 8 }
 0x25e   : > { %2664 = vset.pattern.permute.xlu1 %v2867_v8 }
 0x26a   : > { %2663 = vset.pattern.permute.xlu0 %v2867_v8 }
 0x2a4   : > { %v3141_v60 = vpop.trf.xlu1 }
 0x2a5   : > { %v3143_v61 = vpop.trf.xlu0  ;;  %v1171_v62 = vsel %vm1167_vm1, %v3141_v60, -inf }
 0x2a6   : > { %1172 = vmax.xlane.f32.xlu1 %v1171_v62  ;;  %v1168_v63 = vsel %vm1167_vm1, %v3143_v61, -inf }
 0x2a7   : > { %1169 = vmax.xlane.f32.xlu0 %v1168_v63 }
 0x2ac   : > { %v3151_v1 = vpop.trf.xlu1 }
 0x2ad   : > { %v3149_v0 = vpop.trf.xlu0  ;;  %v1177_v3 = vsel %vm1167_vm1, %v3151_v1, -inf }
 0x2ae   : > { %v1174_v2 = vsel %vm1167_vm1, %v3149_v0, -inf }
 0x2af   : > { %1175 = vmax.xlane.f32.xlu1 %v1174_v2 }
 0x2b3   : > { %1178 = vmax.xlane.f32.xlu1 %v1177_v3 }
 0x2b4   : > { %v3157_v4 = vpop.trf.xlu1 }
 0x2b5   : > { %v1183_v5 = vsel %vm1167_vm1, %v3157_v4, -inf  ;;  %v3161_v7 = vpop.trf.xlu0 }
 0x2b6   : > { %v1180_v9 = vsel %vm1167_vm1, %v3161_v7, -inf }
 0x2b7   : > { %1184 = vmax.xlane.f32.xlu1 %v1183_v5  ;;  %1181 = vmax.xlane.f32.xlu0 %v1180_v9 }
 0x2bc   : > { %v3165_v10 = vpop.trf.xlu1 }
 0x2bd   : > { %v3167_v11 = vpop.trf.xlu0  ;;  %v1189_v12 = vsel %vm1167_vm1, %v3165_v10, -inf }
 0x2be   : > { %v1186_v13 = vsel %vm1167_vm1, %v3167_v11, -inf  ;;  %1190 = vmax.xlane.f32.xlu1 %v1189_v12 }
 0x2bf   : > { %1187 = vmax.xlane.f32.xlu0 %v1186_v13 }
 0x333   : > { %v1173_v24 = vpop.xlane.xlu1 %1172 }
 0x334   : > { %v1193_v25 = vmax.f32 %v1160_v22, %v1173_v24  ;;  %v1170_v27 = vpop.xlane.xlu0 %1169 }
 0x335   : > { %v1192_v26 = vmax.f32 %v1159_v23, %v1170_v27 }
 0x336   : > { %v1201_v28 = vsub.f32 %v1160_v22, %v1193_v25  ;;  %1771 = vst.msk [vmem:[#allocation2 + $0x2] sm:$0x3] %vm1336_vm2, %v1193_v25  ;;  %1231 = vperm.xlu1 %2664, %v1193_v25  }
 0x337   : > { %1770 = vst.msk [vmem:[#allocation2] sm:$0x3] %vm1336_vm2, %v1192_v26  ;;  %1226 = vperm.xlu0 %2663, %v1192_v26   ;;  %v1200_v42 = vsub.f32 %v1159_v23, %v1192_v26 }
 0x338   : > { %v1210_v6 = vmul.f32 1.442695, %v1201_v28 }
 0x339   : > { %v1208_v47 = vmul.f32 1.442695, %v1200_v42 }
 0x33a   : > { %2721 = vpow2.f32 %v1210_v6 }
 0x33c   : > { %v1176_v29 = vpop.xlane.xlu1 %1175 }
 0x33d   : > { %v1194_v30 = vmax.f32 %v1161_v14, %v1176_v29 }
 0x33f   : > { %1772 = vst.msk [vmem:[#allocation2 + $0x4] sm:$0x3] %vm1336_vm2, %v1194_v30  ;;  %v1202_v48 = vsub.f32 %v1161_v14, %v1194_v30 }
 0x340   : > { %v1179_v32 = vpop.xlane.xlu1 %1178 }
 0x341   : > { %v1195_v33 = vmax.f32 %v1162_v31, %v1179_v32  ;;  %v1212_v54 = vmul.f32 1.442695, %v1202_v48 }
 0x343   : > { %1773 = vst.msk [vmem:[#allocation2 + $0x6] sm:$0x3] %vm1336_vm2, %v1195_v33  ;;  %1241 = vperm.xlu1 %2664, %v1195_v33   ;;  %v1203_v55 = vsub.f32 %v1162_v31, %v1195_v33 }
 0x344   : > { %v3183_v36 = vpop.eup %2721  ;;  %v1185_v37 = vpop.xlane.xlu1 %1184 }
 0x345   : > { %v1182_v38 = vpop.xlane.xlu0 %1181  ;;  %v1197_v39 = vmax.f32 %v1164_v34, %v1185_v37  ;;  %1360 = vperm.xlu0 %2663, %v3183_v36   ;;  %v1214_v56 = vmul.f32 1.442695, %v1203_v55 }
 0x346   : > { %v1196_v40 = vmax.f32 %v1163_v35, %v1182_v38 }
 0x347   : > { %v1205_v41 = vsub.f32 %v1164_v34, %v1197_v39  ;;  %1775 = vst.msk [vmem:[#allocation2 + $0xa] sm:$0x3] %vm1336_vm2, %v1197_v39  ;;  %1236 = vperm.xlu1 %2664, %v1194_v30  }
 0x348   : > { %1774 = vst.msk [vmem:[#allocation2 + $0x8] sm:$0x3] %vm1336_vm2, %v1196_v40  ;;  %v1204_v57 = vsub.f32 %v1163_v35, %v1196_v40 }
 0x349   : > { %v1218_v43 = vmul.f32 1.442695, %v1205_v41 }
 0x34a   : > { %v1216_v59 = vmul.f32 1.442695, %v1204_v57 }
 0x34b   : > { %2723 = vpow2.f32 %v1218_v43  ;;  %1251 = vperm.xlu1 %2664, %v1197_v39   ;;  %v1191_v46 = vpop.xlane.xlu1 %1190 }
 0x34c   : > { %v1188_v49 = vpop.xlane.xlu0 %1187  ;;  %v3197_v50 = vmax.f32 %v3192_v44, %v1191_v46  ;;  %2725 = vpow2.f32 %v1208_v47 }
 0x34d   : > { %v3200_v51 = vmax.f32 %v3194_v45, %v1188_v49  ;;  %2727 = vpow2.f32 %v1212_v54 }
 0x34e   : > { %v1207_v52 = vsub.f32 %v3192_v44, %v3197_v50  ;;  %1777 = vst.msk [vmem:[#allocation2 + $0xe] sm:$0x3] %vm1336_vm2, %v3197_v50  ;;  %2729 = vpow2.f32 %v1214_v56 }
 0x34f   : > { %1246 = vperm.xlu1 %2664, %v1196_v40   ;;  %v1206_v53 = vsub.f32 %v3194_v45, %v3200_v51  ;;  %1776 = vst.msk [vmem:[#allocation2 + $0xc] sm:$0x3] %vm1336_vm2, %v3200_v51  ;;  %2731 = vpow2.f32 %v1216_v59 }
 0x353   : > { %1256 = vperm.xlu1 %2664, %v3200_v51  }
 0x355   : > { %v3211_v58 = vpop.eup %2723 }
 0x356   : > { %1380 = vperm.xlu0 %2663, %v3211_v58   ;;  %v3215_v62 = vpop.eup %2725 }
 0x357   : > { %1261 = vperm.xlu1 %2664, %v3197_v50   ;;  %v3218_v63 = vpop.eup %2727 }
 0x358   : > { %v3221_v2 = vpop.eup %2729 }
 0x359   : > { %v3224_v3 = vpop.eup %2731 }
 0x35b   : > { %1355 = vperm.xlu1 %2664, %v3215_v62  }
 0x35f   : > { %1365 = vperm.xlu1 %2664, %v3218_v63  }
 0x363   : > { %1370 = vperm.xlu1 %2664, %v3221_v2  }
 0x367   : > { %1375 = vperm.xlu1 %2664, %v3224_v3  }
 0x3b5   : > { %v1232_v5 = vpop.permute.xlu1 %1231 }
 0x3b6   : > { %v1265_v8 = vsub.f32 %v3141_v60, %v1232_v5  ;;  %v1227_v9 = vpop.permute.xlu0 %1226 }
 0x3b7   : > { %v1264_v12 = vsub.f32 %v3143_v61, %v1227_v9  ;;  %v1289_v9 = vld [vmem:[#allocation3 + $0x2] sm:$0x3] }
 0x3b8   : > { %v1274_v13 = vmul.f32 1.442695, %v1265_v8 }
 0x3b9   : > { %v1272_v22 = vmul.f32 1.442695, %v1264_v12 }
 0x3ba   : > { %2733 = vpow2.f32 %v1274_v13  ;;  %v1288_v13 = vld [vmem:[#allocation3] sm:$0x3] }
 0x3bb   : > { %2735 = vpow2.f32 %v1272_v22  ;;  %v1297_v22 = vmul.f32 %v3183_v36, %v1289_v9  ;;  %v1296_v50 = vmul.f32 %v3215_v62, %v1288_v13 }
 0x3c2   : > { %v1242_v23 = vpop.permute.xlu1 %1241 }
 0x3c3   : > { %v1267_v24 = vsub.f32 %v3151_v1, %v1242_v23 }
 0x3c4   : > { %v2734_v25 = vpop.eup %2733  ;;  %v1361_v5 = vpop.permute.xlu0 %1360 }
 0x3c5   : > { %v2736_v27 = vpop.eup %2735  ;;  %v1402_v26 = vpack.c.bf16 %v2734_v25, %v2734_v25  ;;  %v1278_v28 = vmul.f32 1.442695, %v1267_v24  ;;  %v1307_v6 = vsel %vm1167_vm1, %v2734_v25, 0.0  ;;  %v1291_v25 = vld [vmem:[#allocation3 + $0x6] sm:$0x3] }
 0x3c6   : > { %v1401_v14 = vpack.c.bf16 %v2736_v27, %v2736_v27  ;;  %v1237_v29 = vpop.permute.xlu1 %1236  ;;  %1308 = vadd.xlane.f32.xlu0 %v1307_v6  ;;  %v1304_v60 = vsel %vm1167_vm1, %v2736_v27, 0.0  ;;  %v1299_v27 = vmul.f32 %v3221_v2, %v1291_v25 }
 0x3c7   : > { %2737 = vpow2.f32 %v1278_v28  ;;  %v1266_v61 = vsub.f32 %v3149_v0, %v1237_v29  ;;  %2521 = vmatmul.mubr.msk.bf16.vlgmr.msra.gmra.mrb[16].mxu1 %vm1409_vm4, %v1402_v26  ;;  %1305 = vadd.xlane.f32.xlu1 %v1304_v60  ;;  %v1290_v28 = vld [vmem:[#allocation3 + $0x4] sm:$0x3]  ;;  %v1293_v29 = vld [vmem:[#allocation3 + $0xa] sm:$0x3] }
 0x3c8   : > { %2515 = vmatmul.mubr.msk.bf16.vlgmr.msra.gmra.mrb[16].mxu0 %vm1409_vm4, %v1401_v14  ;;  %2531 = vmatpush3.bf16.msra.mxu1 %v3101_v16  ;;  %v1298_v36 = vmul.f32 %v3218_v63, %v1290_v28  ;;  %v1301_v60 = vmul.f32 %v3211_v58, %v1293_v29 }
 0x3c9   : > { %v1276_v1 = vmul.f32 1.442695, %v1266_v61  ;;  %2525 = vmatpush3.bf16.msra.mxu0 %v3096_v15  ;;  %2532 = vmatprep.mubr.msk.bf16.mxu1 %vm2869_vm3, %v2868_v21 }
 0x3ca   : > { %v1252_v30 = vpop.permute.xlu1 %1251  ;;  %2542 = vmatprep.subr.bf16.mxu1 %v2868_v21  ;;  %2526 = vmatprep.mubr.msk.bf16.mxu0 %vm2869_vm3, %v2868_v21 }
 0x3cb   : > { %2739 = vpow2.f32 %v1276_v1  ;;  %v1269_v0 = vsub.f32 %v3157_v4, %v1252_v30  ;;  %2536 = vmatprep.subr.bf16.mxu0 %v2868_v21  ;;  %v1292_v1 = vld [vmem:[#allocation3 + $0x8] sm:$0x3] }
 0x3cc   : > { %v1300_v2 = vmul.f32 %v3224_v3, %v1292_v1 }
 0x3cd   : > { %v1282_v31 = vmul.f32 1.442695, %v1269_v0 }
 0x3ce   : > { %v1247_v32 = vpop.permute.xlu1 %1246 }
 0x3cf   : > { %2741 = vpow2.f32 %v1282_v31  ;;  %v1268_v16 = vsub.f32 %v3161_v7, %v1247_v32  ;;  %v1294_v31 = vld [vmem:[#allocation3 + $0xc] sm:$0x3] }
 0x3d1   : > { %v2738_v15 = vpop.eup %2737  ;;  %v1280_v33 = vmul.f32 1.442695, %v1268_v16 }
 0x3d2   : > { %v1257_v34 = vpop.permute.xlu1 %1256  ;;  %v1313_v35 = vsel %vm1167_vm1, %v2738_v15, 0.0  ;;  %v1404_v37 = vpack.c.bf16 %v2738_v15, %v2738_v15  ;;  %v1295_v15 = vld [vmem:[#allocation3 + $0xe] sm:$0x3] }
 0x3d3   : > { %2743 = vpow2.f32 %v1280_v33  ;;  %v1270_v38 = vsub.f32 %v3167_v11, %v1257_v34  ;;  %1314 = vadd.xlane.f32.xlu0 %v1313_v35 }
 0x3d4   : > { %2533 = vmatmul.mubr.msk.bf16.vlgmr.msra.gmra.mrb[20].mxu1 %vm1409_vm4, %v1404_v37  ;;  %v1346_v37 = vld [vmem:[#allocation4 + $0x2] sm:$0x3] }
 0x3d5   : > { %v2740_v4 = vpop.eup %2739  ;;  %v1284_v39 = vmul.f32 1.442695, %v1270_v38  ;;  %2543 = vmatpush3.bf16.msra.mxu1 %v3109_v18  ;;  %2544 = vmatprep.mubr.msk.bf16.mxu1 %vm2869_vm3, %v2868_v21  ;;  %v3281_v8 = vpop.permute.xlu0 %1380  ;;  %v1345_v38 = vld [vmem:[#allocation4] sm:$0x3] }
 0x3d6   : > { %v1262_v7 = vpop.permute.xlu1 %1261  ;;  %v1310_v40 = vsel %vm1167_vm1, %v2740_v4, 0.0  ;;  %v1403_v41 = vpack.c.bf16 %v2740_v4, %v2740_v4  ;;  %2554 = vmatprep.subr.bf16.mxu1 %v2868_v21  ;;  %v1394_v4 = vmul.f32 %v1361_v5, %v1346_v37 }
 0x3d7   : > { %2745 = vpow2.f32 %v1284_v39  ;;  %v1271_v42 = vsub.f32 %v3165_v10, %v1262_v7  ;;  %1311 = vadd.xlane.f32.xlu0 %v1310_v40 }
 0x3d8   : > { %2527 = vmatmul.mubr.msk.bf16.vlgmr.msra.gmra.mrb[20].mxu0 %vm1409_vm4, %v1403_v41 }
 0x3d9   : > { %v2742_v11 = vpop.eup %2741  ;;  %v1286_v43 = vmul.f32 1.442695, %v1271_v42  ;;  %2537 = vmatpush3.bf16.msra.mxu0 %v3104_v17  ;;  %2538 = vmatprep.mubr.msk.bf16.mxu0 %vm2869_vm3, %v2868_v21 }
 0x3da   : > { %v1319_v18 = vsel %vm1167_vm1, %v2742_v11, 0.0  ;;  %v1406_v46 = vpack.c.bf16 %v2742_v11, %v2742_v11  ;;  %2548 = vmatprep.subr.bf16.mxu0 %v2868_v21  ;;  %v1356_v45 = vpop.permute.xlu1 %1355 }
 0x3db   : > { %2747 = vpow2.f32 %v1286_v43  ;;  %1320 = vadd.xlane.f32.xlu0 %v1319_v18  ;;  %v1393_v3 = vmul.f32 %v1356_v45, %v1345_v38 }
 0x3dc   : > { %2545 = vmatmul.mubr.msk.bf16.vlgmr.msra.gmra.mrb[24].mxu1 %vm1409_vm4, %v1406_v46 }
 0x3dd   : > { %v2744_v10 = vpop.eup %2743  ;;  %2555 = vmatpush3.bf16.msra.mxu1 %v3117_v20  ;;  %2556 = vmatprep.mubr.msk.bf16.mxu1 %vm2869_vm3, %v2868_v21  ;;  %v1220_v20 = vmul.f32 1.442695, %v1206_v53 }
 0x3de   : > { %v1316_v17 = vsel %vm1167_vm1, %v2744_v10, 0.0  ;;  %v1405_v47 = vpack.c.bf16 %v2744_v10, %v2744_v10  ;;  %v3279_v51 = vpop.permute.xlu1 %1365 }
 0x3df   : > { %1317 = vadd.xlane.f32.xlu1 %v1316_v17  ;;  %2749 = vpow2.f32 %v1220_v20  ;;  %v1348_v17 = vld [vmem:[#allocation4 + $0x6] sm:$0x3] }
 0x3e0   : > { %2539 = vmatmul.mubr.msk.bf16.vlgmr.msra.gmra.mrb[24].mxu0 %vm1409_vm4, %v1405_v47 }
 0x3e1   : > { %v2746_v48 = vpop.eup %2745  ;;  %2549 = vmatpush3.bf16.msra.mxu0 %v3112_v19  ;;  %2550 = vmatprep.mubr.msk.bf16.mxu0 %vm2869_vm3, %v2868_v21  ;;  %v1222_v19 = vmul.f32 1.442695, %v1207_v52 }
 0x3e2   : > { %v1322_v49 = vsel %vm1167_vm1, %v2746_v48, 0.0  ;;  %v1407_v56 = vpack.c.bf16 %v2746_v48, %v2746_v48  ;;  %v1371_v53 = vpop.permute.xlu1 %1370  ;;  %v1347_v48 = vld [vmem:[#allocation4 + $0x4] sm:$0x3] }
 0x3e3   : > { %1323 = vadd.xlane.f32.xlu1 %v1322_v49  ;;  %2751 = vpow2.f32 %v1222_v19  ;;  %v1396_v47 = vmul.f32 %v1371_v53, %v1348_v17  ;;  %v1350_v19 = vld [vmem:[#allocation4 + $0xa] sm:$0x3] }
 0x3e4   : > { %v1398_v9 = vmul.f32 %v3281_v8, %v1350_v19  ;;  %v1352_v8 = vld [vmem:[#allocation4 + $0xe] sm:$0x3]  ;;  %v2767_v19 = vld [vmem:[%s3410_s5 + $0x70] sm:$0xff] (!%p2343_p1)  }
 0x3e5   : > { %v2748_v54 = vpop.eup %2747 }
 0x3e6   : > { %v1325_v55 = vsel %vm1167_vm1, %v2748_v54, 0.0  ;;  %v1408_v57 = vpack.c.bf16 %v2748_v54, %v2748_v54  ;;  %v3283_v12 = vpop.permute.xlu1 %1375 }
 0x3e7   : > { %1326 = vadd.xlane.f32.xlu0 %v1325_v55 }
 0x3e8   : > { %2551 = vmatmul.mubr.msk.bf16.vlgmr.msra.gmra.mrb[28].mxu0 %vm1409_vm4, %v1407_v56  ;;  %2557 = vmatmul.mubr.msk.bf16.vlgmr.msra.gmra.mrb[28].mxu1 %vm1409_vm4, %v1408_v57  ;;  %v1395_v56 = vmul.f32 %v3279_v51, %v1347_v48 }
 0x3e9   : > { %v2750_v21 = vpop.eup %2749 }
 0x3ea   : > { %v1302_v63 = vmul.f32 %v2750_v21, %v1294_v31 }
 0x3ed   : > { %v2752_v59 = vpop.eup %2751 }
 0x3ee   : > { %v1303_v34 = vmul.f32 %v2752_v59, %v1295_v15 }
 0x3f4   : > { %1385 = vperm.xlu1 %2664, %v2750_v21  }
 0x3fd   : > { %1390 = vperm.xlu0 %2663, %v2752_v59  }
 0x453   : > { %v1309_v44 = vpop.xlane.xlu0 %1308 }
 0x454   : > { %v1329_v52 = vadd.f32 %v1309_v44, %v1297_v22  ;;  %v1306_v23 = vpop.xlane.xlu1 %1305  ;;  %v1349_v22 = vld [vmem:[#allocation4 + $0x8] sm:$0x3] }
 0x455   : > { %v1328_v24 = vadd.f32 %v1306_v23, %v1296_v50  ;;  %v1397_v23 = vmul.f32 %v3283_v12, %v1349_v22 }
 0x456   : > { %1338 = vst.msk [vmem:[#allocation3 + $0x2] sm:$0x3] %vm1336_vm2, %v1329_v52 }
 0x457   : > { %1337 = vst.msk [vmem:[#allocation3] sm:$0x3] %vm1336_vm2, %v1328_v24 }
 0x45e   : > { %v1782_v15 = vld [vmem:[#allocation3] sm:$0x3] (!%p2343_p1) }
 0x460   : > { %v1315_v26 = vpop.xlane.xlu0 %1314 }
 0x461   : > { %v1331_v6 = vadd.f32 %v1315_v26, %v1299_v27 }
 0x463   : > { %1340 = vst.msk [vmem:[#allocation3 + $0x6] sm:$0x3] %vm1336_vm2, %v1331_v6  ;;  %v1351_v6 = vld [vmem:[#allocation4 + $0xc] sm:$0x3] }
 0x464   : > { %v1312_v14 = vpop.xlane.xlu0 %1311 }
 0x465   : > { %v1330_v62 = vadd.f32 %v1312_v14, %v1298_v36 }
 0x467   : > { %1339 = vst.msk [vmem:[#allocation3 + $0x4] sm:$0x3] %vm1336_vm2, %v1330_v62 }
 0x468   : > { %v1321_v61 = vpop.xlane.xlu0 %1320 }
 0x469   : > { %v1333_v30 = vadd.f32 %v1321_v61, %v1301_v60 }
 0x46b   : > { %1342 = vst.msk [vmem:[#allocation3 + $0xa] sm:$0x3] %vm1336_vm2, %v1333_v30 }
 0x46c   : > { %v1318_v0 = vpop.xlane.xlu1 %1317 }
 0x46d   : > { %v1332_v32 = vadd.f32 %v1318_v0, %v1300_v2 }
 0x46f   : > { %1341 = vst.msk [vmem:[#allocation3 + $0x8] sm:$0x3] %vm1336_vm2, %v1332_v32 }
 0x470   : > { %v1324_v16 = vpop.xlane.xlu1 %1323 }
 0x471   : > { %v1334_v33 = vadd.f32 %v1324_v16, %v1302_v63  ;;  %v1784_v16 = vld [vmem:[#allocation3 + $0x4] sm:$0x3] (!%p2343_p1) }
 0x472   : > { %2775 = vrcp.f32 (!%p2343_p1), %v1784_v16  ;;  %v1787_v37 = vld [vmem:[#allocation3 + $0xa] sm:$0x3] (!%p2343_p1) }
 0x473   : > { %1343 = vst.msk [vmem:[#allocation3 + $0xc] sm:$0x3] %vm1336_vm2, %v1334_v33  ;;  %v2755_v33 = vld [vmem:[%s3410_s5 + $0x40] sm:$0xff] (!%p2343_p1)   ;;  %2777 = vrcp.f32 (!%p2343_p1), %v1782_v15 }
 0x474   : > { %v1327_v58 = vpop.xlane.xlu0 %1326  ;;  %v1386_v36 = vpop.permute.xlu1 %1385  ;;  %2420 = vmatprep.subr.bf16.mxu0 (!%p2343_p1), %v2755_v33 }
 0x475   : > { %v1335_v35 = vadd.f32 %v1327_v58, %v1303_v34  ;;  %v1399_v29 = vmul.f32 %v1386_v36, %v1351_v6  ;;  %v2870_v34 = vmov (!%p2343_p1), 0   ;;  %v1785_v58 = vld [vmem:[#allocation3 + $0x6] sm:$0x3] (!%p2343_p1) }
 0x476   : > { %2754 = vset.pattern.permute.xlu1 (!%p2343_p1), %v2870_v34  ;;  %2753 = vset.pattern.permute.xlu0 (!%p2343_p1), %v2870_v34  ;;  %2779 = vrcp.f32 (!%p2343_p1), %v1785_v58  ;;  %v1786_v38 = vld [vmem:[#allocation3 + $0x8] sm:$0x3] (!%p2343_p1) }
 0x477   : > { %1344 = vst.msk [vmem:[#allocation3 + $0xe] sm:$0x3] %vm1336_vm2, %v1335_v35  ;;  %v1783_v35 = vld [vmem:[#allocation3 + $0x2] sm:$0x3] (!%p2343_p1) }
 0x478   : > { %2781 = vrcp.f32 (!%p2343_p1), %v1783_v35 }
 0x479   : > { %2783 = vrcp.f32 (!%p2343_p1), %v1787_v37 }
 0x47a   : > { %2785 = vrcp.f32 (!%p2343_p1), %v1786_v38 }
 0x47c   : > { %v1391_v14 = vpop.permute.xlu0 %1390 }
 0x47d   : > { %v1400_v62 = vmul.f32 %v1391_v14, %v1352_v8 }
 0x49a   : > { %v1490_v39 = vpop.f32.mrb[16].mxu1 }
 0x49b   : > { %v1755_v7 = vadd.f32 %v1490_v39, %v1394_v4  ;;  %v1447_v40 = vpop.f32.mrb[16].mxu0  ;;  %v2522_v41 = vpop.f32.mrb[17].mxu1  ;;  %v2756_v4 = vld [vmem:[%s3410_s5] sm:$0xff] (!%p2343_p1)   ;;  %v1789_v39 = vld [vmem:[#allocation3 + $0xe] sm:$0x3] (!%p2343_p1) }
 0x49c   : > { %v1754_v42 = vadd.f32 %v1447_v40, %v1393_v3  ;;  %v2516_v11 = vpop.f32.mrb[17].mxu0  ;;  %v1493_v43 = vpop.f32.mrb[18].mxu1  ;;  %v2757_v3 = vld [vmem:[%s3410_s5 + $0x48] sm:$0xff] (!%p2343_p1)   ;;  %2421 = vmatpush3.bf16.msra.mxu0 (!%p2343_p1), %v2756_v4  ;;  %v2759_v40 = vld [vmem:[%s3410_s5 + $0x50] sm:$0xff] (!%p2343_p1)   ;;  %v1788_v41 = vld [vmem:[#allocation3 + $0xc] sm:$0x3] (!%p2343_p1)  ;;  %2787 = vrcp.f32 (!%p2343_p1), %v1789_v39 }
 0x49d   : > { %1763 = vst [vmem:[#allocation4 + $0x2] sm:$0x3] %v1755_v7  ;;  %v1450_v18 = vpop.f32.mrb[18].mxu0  ;;  %v2523_v46 = vpop.f32.mrb[19].mxu1  ;;  %v2758_v7 = vld [vmem:[%s3410_s5 + $0x8] sm:$0xff] (!%p2343_p1)   ;;  %2422 = vmatprep.subr.bf16.mxu0 (!%p2343_p1), %v2757_v3  ;;  %2789 = vrcp.f32 (!%p2343_p1), %v1788_v41 }
 0x49e   : > { %1762 = vst [vmem:[#allocation4] sm:$0x3] %v1754_v42  ;;  %v2517_v10 = vpop.f32.mrb[19].mxu0  ;;  %v2760_v42 = vld [vmem:[%s3410_s5 + $0x10] sm:$0xff] (!%p2343_p1)   ;;  %v2776_v11 = vpop.eup (!%p2343_p1), %2775  ;;  %v2761_v18 = vld [vmem:[%s3410_s5 + $0x58] sm:$0xff] (!%p2343_p1)  }
 0x49f   : > { %v2778_v43 = vpop.eup (!%p2343_p1), %2777  ;;  %1818 = vperm.xlu1 (!%p2343_p1), %2754, %v2776_v11   ;;  %v2762_v10 = vld [vmem:[%s3410_s5 + $0x18] sm:$0xff] (!%p2343_p1)  }
 0x4a0   : > { %2423 = vmatpush3.bf16.msra.mxu0 (!%p2343_p1), %v2758_v7  ;;  %v2780_v46 = vpop.eup (!%p2343_p1), %2779  ;;  %1808 = vperm.xlu0 (!%p2343_p1), %2753, %v2778_v43  }
 0x4a1   : > { %2424 = vmatprep.subr.bf16.mxu0 (!%p2343_p1), %v2759_v40  ;;  %v2782_v17 = vpop.eup (!%p2343_p1), %2781 }
 0x4a2   : > { %v2784_v48 = vpop.eup (!%p2343_p1), %2783 }
 0x4a3   : > { %1823 = vperm.xlu1 (!%p2343_p1), %2754, %v2780_v46  }
 0x4a4   : > { %2425 = vmatpush3.bf16.msra.mxu0 (!%p2343_p1), %v2760_v42  ;;  %1813 = vperm.xlu0 (!%p2343_p1), %2753, %v2782_v17  }
 0x4a5   : > { %2426 = vmatprep.subr.bf16.mxu0 (!%p2343_p1), %v2761_v18 }
 0x4a7   : > { %v1576_v49 = vpop.f32.mrb[20].mxu1  ;;  %1833 = vperm.xlu1 (!%p2343_p1), %2754, %v2784_v48  }
 0x4a8   : > { %v1757_v54 = vadd.f32 %v1576_v49, %v1396_v47  ;;  %v2534_v20 = vpop.f32.mrb[21].mxu1  ;;  %v2763_v47 = vld [vmem:[%s3410_s5 + $0x60] sm:$0xff] (!%p2343_p1)   ;;  %v2786_v49 = vpop.eup (!%p2343_p1), %2785  ;;  %2427 = vmatpush3.bf16.msra.mxu0 (!%p2343_p1), %v2762_v10 }
 0x4a9   : > { %v1579_v55 = vpop.f32.mrb[22].mxu1  ;;  %2428 = vmatprep.subr.bf16.mxu0 (!%p2343_p1), %v2763_v47  ;;  %v2765_v20 = vld [vmem:[%s3410_s5 + $0x68] sm:$0xff] (!%p2343_p1)   ;;  %1828 = vperm.xlu0 (!%p2343_p1), %2753, %v2786_v49   ;;  %v2771_v49 = vld [vmem:[%s3412_s7] sm:$0xff] (!%p2343_p1)  }
 0x4aa   : > { %1765 = vst [vmem:[#allocation4 + $0x6] sm:$0x3] %v1757_v54  ;;  %v2535_v57 = vpop.f32.mrb[23].mxu1  ;;  %v2764_v54 = vld [vmem:[%s3410_s5 + $0x20] sm:$0xff] (!%p2343_p1)   ;;  %v2788_v55 = vpop.eup (!%p2343_p1), %2787 }
 0x4ab   : > { %v1533_v21 = vpop.f32.mrb[20].mxu0  ;;  %v2766_v57 = vld [vmem:[%s3410_s5 + $0x28] sm:$0xff] (!%p2343_p1)   ;;  %1843 = vperm.xlu1 (!%p2343_p1), %2754, %v2788_v55  }
 0x4ac   : > { %v1756_v59 = vadd.f32 %v1533_v21, %v1395_v56  ;;  %v2528_v45 = vpop.f32.mrb[21].mxu0  ;;  %v2790_v56 = vpop.eup (!%p2343_p1), %2789  ;;  %2429 = vmatpush3.bf16.msra.mxu0 (!%p2343_p1), %v2764_v54  ;;  %v2768_v21 = vld [vmem:[%s3410_s5 + $0x30] sm:$0xff] (!%p2343_p1)   ;;  %v2871_v54 = vmov (!%p2343_p1), 0.0  }
 0x4ad   : > { %v1536_v5 = vpop.f32.mrb[22].mxu0  ;;  %2430 = vmatprep.subr.bf16.mxu0 (!%p2343_p1), %v2765_v20  ;;  %1838 = vperm.xlu0 (!%p2343_p1), %2753, %v2790_v56   ;;  %v2770_v45 = vld [vmem:[%s3410_s5 + $0x38] sm:$0xff] (!%p2343_p1)   ;;  %v2772_v20 = vld [vmem:[%s3412_s7 + $0x8] sm:$0xff] (!%p2343_p1)   ;;  %v2344_v56 = vld [vmem:[%s3411_s6] ss:$0 sm:$0xff] (!%p2343_p1) }
 0x4ae   : > { %1764 = vst [vmem:[#allocation4 + $0x4] sm:$0x3] %v1756_v59  ;;  %v2529_v13 = vpop.f32.mrb[23].mxu0  ;;  %v2769_v59 = vld [vmem:[%s3410_s5 + $0x78] sm:$0xff] (!%p2343_p1)   ;;  %v1798_v5 = vld [vmem:[#allocation4] sm:$0x3] (!%p2343_p1)  ;;  %2560 = vmatprep.subr.bf16.mxu1 (!%p2343_p1), %v2871_v54  ;;  %2564 = vmatprep.mubr.msk.bf16.mxu1 (!%p2343_p1), %vm2872_vm12, %v2871_v54 }
 0x4af   : > { %v1662_v53 = vpop.f32.mrb[24].mxu1  ;;  %2561 = vmatpush3.bf16.msra.mxu1 (!%p2343_p1), %v2771_v49 }
 0x4b0   : > { %v1759_v44 = vadd.f32 %v1662_v53, %v1398_v9  ;;  %v2546_v50 = vpop.f32.mrb[25].mxu1  ;;  %2431 = vmatpush3.bf16.msra.mxu0 (!%p2343_p1), %v2766_v57  ;;  %2562 = vmatprep.subr.bf16.mxu1 (!%p2343_p1), %v2871_v54 }
 0x4b1   : > { %v1665_v52 = vpop.f32.mrb[26].mxu1  ;;  %2432 = vmatprep.subr.bf16.mxu0 (!%p2343_p1), %v2767_v19  ;;  %v1799_v50 = vld [vmem:[#allocation4 + $0x2] sm:$0x3] (!%p2343_p1) }
 0x4b2   : > { %1767 = vst [vmem:[#allocation4 + $0xa] sm:$0x3] %v1759_v44  ;;  %v2547_v51 = vpop.f32.mrb[27].mxu1  ;;  %v1801_v44 = vld [vmem:[#allocation4 + $0x6] sm:$0x3] (!%p2343_p1) }
 0x4b3   : > { %v1619_v24 = vpop.f32.mrb[24].mxu0  ;;  %2563 = vmatpush3.bf16.msra.mxu1 (!%p2343_p1), %v2772_v20 }
 0x4b4   : > { %v1758_v25 = vadd.f32 %v1619_v24, %v1397_v23  ;;  %v2540_v27 = vpop.f32.mrb[25].mxu0  ;;  %2433 = vmatpush3.bf16.msra.mxu0 (!%p2343_p1), %v2768_v21  ;;  %2568 = vmatprep.subr.bf16.mxu1 (!%p2343_p1), %v2871_v54 }
 0x4b5   : > { %v1622_v26 = vpop.f32.mrb[26].mxu0  ;;  %2434 = vmatprep.subr.bf16.mxu0 (!%p2343_p1), %v2769_v59  ;;  %v1800_v13 = vld [vmem:[#allocation4 + $0x4] sm:$0x3] (!%p2343_p1) }
 0x4b6   : > { %1766 = vst [vmem:[#allocation4 + $0x8] sm:$0x3] %v1758_v25  ;;  %v2541_v28 = vpop.f32.mrb[27].mxu0 }
 0x4b8   : > { %1781 = sbr.rel (%p2343_p1) target bundleno = 1988 (0x7c4), region = 76  ;;  %2435 = vmatpush3.bf16.msra.mxu0 (!%p2343_p1), %v2770_v45 }
 0x4b9   : > { %v1803_v26 = vld [vmem:[#allocation4 + $0xa] sm:$0x3] (!%p2343_p1) }
 0x4bb   : > { %v1705_v60 = vpop.f32.mrb[28].mxu0  ;;  %v1748_v61 = vpop.f32.mrb[28].mxu1 }
 0x4bc   : > { %v1760_v1 = vadd.f32 %v1705_v60, %v1399_v29  ;;  %v1761_v30 = vadd.f32 %v1748_v61, %v1400_v62  ;;  %v2552_v2 = vpop.f32.mrb[29].mxu0  ;;  %v2558_v12 = vpop.f32.mrb[29].mxu1 }
 0x4bd   : > { %v1708_v0 = vpop.f32.mrb[30].mxu0  ;;  %v1751_v31 = vpop.f32.mrb[30].mxu1  ;;  %v1802_v28 = vld [vmem:[#allocation4 + $0x8] sm:$0x3] (!%p2343_p1) }
 0x4be   : > { %1768 = vst [vmem:[#allocation4 + $0xc] sm:$0x3] %v1760_v1  ;;  %1769 = vst [vmem:[#allocation4 + $0xe] sm:$0x3] %v1761_v30  ;;  %v2553_v32 = vpop.f32.mrb[31].mxu0  ;;  %v2559_v63 = vpop.f32.mrb[31].mxu1 }
 0x4c5   : > { %v1805_v0 = vld [vmem:[#allocation4 + $0xe] sm:$0x3]  ;;  %v1804_v32 = vld [vmem:[#allocation4 + $0xc] sm:$0x3] }
 0x51e   : > { %v1819_v9 = vpop.permute.xlu1 %1818 }
 0x51f   : > { %v1809_v22 = vpop.permute.xlu0 %1808  ;;  %v1848_v52 = vmul.f32 %v1819_v9, %v1800_v13  ;;  %v2773_v9 = vld [vmem:[%s3414_s9] sm:$0xff]  }
 0x520   : > { %v1846_v53 = vmul.f32 %v1809_v22, %v1798_v5  ;;  %v2774_v22 = vld [vmem:[%s3414_s9 + $0x8] sm:$0xff]  }
 0x521   : > { %v1886_v6 = vrot.slane %v1848_v52, 7  ;;  %v1865_v29 = vrot.slane %v1848_v52, 6 }
 0x522   : > { %v1824_v23 = vpop.permute.xlu1 %1823  ;;  %v1884_v25 = vrot.slane %v1846_v53, 1 }
 0x523   : > { %v1849_v51 = vmul.f32 %v1824_v23, %v1801_v44  ;;  %v1814_v24 = vpop.permute.xlu0 %1813 }
 0x524   : > { %v1847_v27 = vmul.f32 %v1814_v24, %v1799_v50 }
 0x525   : > { %v1888_v62 = vrot.slane %v1849_v51, 6  ;;  %v1868_v1 = vrot.slane %v1849_v51, 5 }
 0x526   : > { %v1862_v36 = vrot.slane %v1847_v27, 7  ;;  %v1885_v8 = vsel %vm1863_vm5, %v1847_v27, %v1884_v25  ;;  %v1834_v14 = vpop.permute.xlu1 %1833  ;;  %v2365_v27 = vld [vmem:[%s3431_s30] ss:$0 sm:$0xff] }
 0x527   : > { %v1851_v60 = vmul.f32 %v1834_v14, %v1803_v26  ;;  %v1887_v2 = vsel %vm1866_vm6, %v1886_v6, %v1885_v8 }
 0x528   : > { %v1829_v61 = vpop.permute.xlu0 %1828  ;;  %v1864_v30 = vsel %vm1863_vm5, %v1862_v36, %v1846_v53  ;;  %v1889_v38 = vsel %vm1869_vm7, %v1888_v62, %v1887_v2  ;;  %v2361_v53 = vld [vmem:[%s3430_s23] ss:$0 sm:$0xff] }
 0x529   : > { %v1850_v12 = vmul.f32 %v1829_v61, %v1802_v28  ;;  %v1867_v31 = vsel %vm1866_vm6, %v1865_v29, %v1864_v30  ;;  %v1874_v34 = vrot.slane %v1851_v60, 3  ;;  %v1892_v58 = vrot.slane %v1851_v60, 4 }
 0x52a   : > { %v1870_v63 = vsel %vm1869_vm7, %v1868_v1, %v1867_v31  ;;  %v1844_v33 = vpop.permute.xlu1 %1843 }
 0x52b   : > { %v1871_v16 = vrot.slane %v1850_v12, 4  ;;  %v1890_v15 = vrot.slane %v1850_v12, 5  ;;  %v1853_v35 = vmul.f32 %v1844_v33, %v1805_v0 }
 0x52c   : > { %v1839_v37 = vpop.permute.xlu0 %1838 }
 0x52d   : > { %v1873_v4 = vsel %vm1872_vm8, %v1871_v16, %v1870_v63  ;;  %v1852_v3 = vmul.f32 %v1839_v37, %v1804_v32  ;;  %v1891_v39 = vsel %vm1872_vm8, %v1890_v15, %v1889_v38  ;;  %v1880_v7 = vrot.slane %v1853_v35, 1 }
 0x52e   : > { %v1896_v40 = vrot.slane %v1853_v35, 2  ;;  %v1893_v11 = vsel %vm1875_vm9, %v1892_v58, %v1891_v39  ;;  %v1876_v43 = vsel %vm1875_vm9, %v1874_v34, %v1873_v4 }
 0x52f   : > { %v1877_v41 = vrot.slane %v1852_v3, 2  ;;  %v1894_v42 = vrot.slane %v1852_v3, 3 }
 0x531   : > { %v1895_v18 = vsel %vm1878_vm10, %v1894_v42, %v1893_v11  ;;  %v1879_v46 = vsel %vm1878_vm10, %v1877_v41, %v1876_v43 }
 0x532   : > { %v1897_v10 = vsel %vm1881_vm11, %v1896_v40, %v1895_v18  ;;  %v1882_v17 = vsel %vm1881_vm11, %v1880_v7, %v1879_v46 }
 0x533   : > { %v1900_v47 = vpack.c.bf16 %v1897_v10, %v1897_v10  ;;  %v1899_v48 = vpack.c.bf16 %v1882_v17, %v1882_v17 }
 0x535   : > { %2068 = vmatprep.mubr.bf16.mxu0 %v1900_v47 }
 0x536   : > { %2069 = vmatmul.mubr.bf16.vlgmr.msra.gmra.mrb[0].mxu0 %v1899_v48 }
 0x609   : > { %v2436_v55 = vpop.f32.mrb[0].mxu0 }
 0x60a   : > { %v2437_v57 = vpop.f32.mrb[1].mxu0 }
 0x60b   : > { %v2438_v19 = vadd.f32 %v2437_v57, %v2436_v55  ;;  %v2439_v21 = vpop.f32.mrb[2].mxu0 }
 0x60c   : > { %v2440_v59 = vpop.f32.mrb[3].mxu0 }
 0x60d   : > { %v2071_v45 = vadd.f32 %v2438_v19, %v2344_v56 }
 0x60f   : > { %v2076_v5 = vmax.f32 %v2071_v45, 0.0 }
 0x611   : > { %v2077_v13 = vpack.c.bf16 %v2076_v5, %v2076_v5 }
 0x613   : > { %2565 = vmatmul.mubr.msk.bf16.vlgmr.msra.gmra.mrb[0].mxu1 %vm2101_vm13, %v2077_v13 }
 0x614   : > { %2569 = vmatpush3.bf16.msra.mxu1 %v2773_v9  ;;  %2572 = vmatprep.mubr.msk.bf16.mxu1 %vm2872_vm12, %v2871_v54 }
 0x615   : > { %2570 = vmatprep.subr.bf16.mxu1 %v2871_v54 }
 0x618   : > { %2571 = vmatpush3.bf16.msra.mxu1 %v2774_v22 }
 0x6e6   : > { %v2139_v44 = vpop.f32.mrb[0].mxu1 }
 0x6e7   : > { %v2140_v50 = vadd.f32 %v2361_v53, %v2139_v44  ;;  %v2566_v52 = vpop.f32.mrb[1].mxu1 }
 0x6e8   : > { %v2142_v23 = vpop.f32.mrb[2].mxu1 }
 0x6e9   : > { %v2145_v51 = vmax.f32 %v2140_v50, 0.0  ;;  %v2567_v24 = vpop.f32.mrb[3].mxu1 }
 0x6eb   : > { %v2146_v25 = vpack.c.bf16 %v2145_v51, %v2145_v51 }
 0x6ed   : > { %2573 = vmatmul.mubr.msk.bf16.vlgmr.msra.gmra.mrb[4].mxu1 %vm2101_vm13, %v2146_v25 }
 0x7c0   : > { %v2207_v26 = vpop.f32.mrb[4].mxu1 }
 0x7c1   : > { %v2208_v28 = vadd.f32 %v2365_v27, %v2207_v26  ;;  %v2574_v6 = vpop.f32.mrb[5].mxu1 }
 0x7c2   : > { %v2210_v36 = vpop.f32.mrb[6].mxu1 }
 0x7c3   : > { %2214 = vst.msk [vmem:[%s3036_s16] sm:$0xff] %vm2213_vm14, %v2208_v28  ;;  %v2575_v8 = vpop.f32.mrb[7].mxu1 }
 0x7c4 PF: > { %s24_s24 = sadd.s32 1, %s2857_s24   ;;  %s3432_s13 = sld [smem:[#allocation15_spill]] }
 0x7c5   : > { %p21_p2 = scmp.ge.s32.totalorder %s24_s24, 6   ;;  %s3433_s20 = sld [smem:[#allocation11_spill]] }
 0x7c6   : > { %s3434_s21 = sld [smem:[#allocation12_spill]]  ;;  %s3435_s22 = sld [smem:[#allocation13_spill]] }
 0x7c7   : > { %s3436_s23 = sld [smem:[#allocation14_spill]]  ;;  %s3437_s17 = smov %s2833_s18 }
 0x7c8   : > { %s3438_s18 = smov %s2837_s19  ;;  %23 = sbr.rel (!%p21_p2) target bundleno = 8 (0x8), region = 117 }
 0x7ca   : > { %s3439_s19 = smov %s3432_s13 }
 0x7cf   :  { %2234 = vsyncpa [#allocation6], 1 }
 0x7d0   :  { %2236 = vsyncpa [#allocation6 + $0x1], 1 }

</bundles_post_ra>
